<compile_context>
chip_gen: v5e
topology: v5e:2x2
jax: 0.10.0
libtpu: 0.0.40
codegen_flags: <defaults>
</compile_context>

<pallas_src>
import math

import jax
import jax.numpy as jnp
from jax.experimental import pallas as pl
from jax.experimental.pallas import tpu as pltpu


def _round_up(x, m):
    return (x + m - 1) // m * m


def _prelu(x, alpha):
    return jnp.where(x > 0, x, alpha * x)


# --------------------------------------------------------------------------------------
# Main tiled kernel: per (row-tile m, K-tile k), both views at once
#   acc_v += A[v, m*TM:(m+1)*TM, k*TK:(k+1)*TK] @ XW[v, k*TK:(k+1)*TK, :]     (bf16 -> f32)
#   at last k:  h_v = PReLU(acc_v);  zg_part[m, v] = sum_rows(h_v);
#               zn[m-tile] = PReLU(h_0 @ Wn + bn) + PReLU(h_1 @ Wn + bn)
# --------------------------------------------------------------------------------------
def mvgrl_main_kernel(alpha_ref, a_ref, xw_ref, wn_ref, bn_ref,
                      zn_ref, zgp_ref, acc0_ref, acc1_ref):
    k = pl.program_id(1)
    nk = pl.num_programs(1)

    @pl.when(k == 0)
    def _():
        acc0_ref[...] = jnp.zeros_like(acc0_ref)
        acc1_ref[...] = jnp.zeros_like(acc1_ref)

    # bf16 x bf16 MXU matmuls with f32 accumulation; K (adjacency columns) is tiled.
    acc0_ref[...] += jnp.dot(a_ref[0], xw_ref[0], preferred_element_type=jnp.float32)
    acc1_ref[...] += jnp.dot(a_ref[1], xw_ref[1], preferred_element_type=jnp.float32)

    @pl.when(k == nk - 1)
    def _():
        a_n = alpha_ref[3]                                     # proj_n PReLU slope

        h0 = _prelu(acc0_ref[...], alpha_ref[0])               # (TM, Hp) view-0 node embeddings
        h1 = _prelu(acc1_ref[...], alpha_ref[1])               # (TM, Hp) view-1 node embeddings

        # partial sum-pool per view (padded rows of A are zero -> contribute 0)
        zgp_ref[0, 0:1, :] = jnp.sum(h0, axis=0, keepdims=True)
        zgp_ref[0, 1:2, :] = jnp.sum(h1, axis=0, keepdims=True)

        zn0 = _prelu(
            jnp.dot(h0, wn_ref[...], preferred_element_type=jnp.float32) + bn_ref[...], a_n)
        zn1 = _prelu(
            jnp.dot(h1, wn_ref[...], preferred_element_type=jnp.float32) + bn_ref[...], a_n)
        zn_ref[...] = zn0 + zn1                                # zn_1 + zn_2, single store


# --------------------------------------------------------------------------------------
# Tiny finalize kernel: sum zg partials over row tiles, apply graph projection head per
# view, then sum the two views:  zg = PReLU(zg1@Wg+bg) + PReLU(zg2@Wg+bg)
# --------------------------------------------------------------------------------------
def mvgrl_zg_finalize_kernel(alpha_ref, zgp_ref, wg_ref, bg_ref, zg_ref):
    a_g = alpha_ref[2]                                         # proj PReLU slope
    s = jnp.sum(zgp_ref[...], axis=0)                          # (2, Hp) per-view sum pool
    p = _prelu(jnp.dot(s, wg_ref[...], preferred_element_type=jnp.float32)
               + bg_ref[...], a_g)                             # (2, Hp)
    zg_ref[...] = p[0:1, :] + p[1:2, :]


def mvgrl_enc(alphas, a_view0, a_view1, x, w_enc0, w_enc1, wg, bg, wn, bn,
              *, tm=256, tk=256):
    """alphas = [prelu_enc0, prelu_enc1, prelu_proj, prelu_proj_n]."""
    N, _ = x.shape
    H = w_enc0.shape[1]
    f32 = jnp.float32

    Hp = _round_up(H, 128)                 # lane-dense outputs / weights
    Np = _round_up(N, math.lcm(tm, tk))    # rows & K padded to tile multiples
    num_m = Np // tm
    num_k = Np // tk

    # Reassociated first encoder stage (tiny (N,F)@(F,H) matmul, done once per view here),
    # padded to (Np, Hp) and cast to bf16 for the big MXU pass.
    xw = jnp.stack([jnp.dot(x, w_enc0), jnp.dot(x, w_enc1)], axis=0)       # (2, N, H)
    xw = jnp.pad(xw, ((0, 0), (0, Np - N), (0, Hp - H))).astype(jnp.bfloat16)

    a = jnp.stack([a_view0, a_view1], axis=0)                              # (2, N, N)
    a = jnp.pad(a, ((0, 0), (0, Np - N), (0, Np - N))).astype(jnp.bfloat16)

    wn_p = jnp.pad(wn, ((0, Hp - H), (0, Hp - H))).astype(f32)
    bn_p = jnp.pad(bn, ((0, 0), (0, Hp - H))).astype(f32)
    wg_p = jnp.pad(wg, ((0, Hp - H), (0, Hp - H))).astype(f32)
    bg_p = jnp.pad(bg, ((0, 0), (0, Hp - H))).astype(f32)

    cost = pl.CostEstimate(
        flops=2 * 2 * Np * Np * Hp + 2 * 2 * Np * Hp * Hp,
        transcendentals=0,
        bytes_accessed=int(a.size * 2 + num_m * xw.size * 2 + Np * Hp * 4
                           + wn_p.size * 4 + num_m * 2 * Hp * 4),
    )

    zn_pad, zg_part = pl.pallas_call(
        mvgrl_main_kernel,
        out_shape=(jax.ShapeDtypeStruct((Np, Hp), f32),
                   jax.ShapeDtypeStruct((num_m, 2, Hp), f32)),
        grid=(num_m, num_k),
        in_specs=[
            pl.BlockSpec(memory_space=pltpu.MemorySpace.SMEM),             # alphas
            pl.BlockSpec((2, tm, tk), lambda m, k: (0, m, k)),             # A views (both)
            pl.BlockSpec((2, tk, Hp), lambda m, k: (0, k, 0)),             # XW views (both)
            pl.BlockSpec((Hp, Hp), lambda m, k: (0, 0)),                   # Wn (resident)
            pl.BlockSpec((1, Hp), lambda m, k: (0, 0)),                    # bn (resident)
        ],
        out_specs=(pl.BlockSpec((tm, Hp), lambda m, k: (m, 0)),            # zn (resident / m)
                   pl.BlockSpec((1, 2, Hp), lambda m, k: (m, 0, 0))),      # zg partials
        scratch_shapes=[pltpu.VMEM((tm, Hp), f32),                         # K acc, view 0
                        pltpu.VMEM((tm, Hp), f32)],                        # K acc, view 1
        compiler_params=pltpu.CompilerParams(
            dimension_semantics=("parallel", "arbitrary"),
            vmem_limit_bytes=32 * 1024 * 1024),
        cost_estimate=cost,
    )(alphas, a, xw, wn_p, bn_p)

    zg_pad = pl.pallas_call(
        mvgrl_zg_finalize_kernel,
        out_shape=jax.ShapeDtypeStruct((1, Hp), f32),
        grid=(1,),
        in_specs=[
            pl.BlockSpec(memory_space=pltpu.MemorySpace.SMEM),             # alphas
            pl.BlockSpec((num_m, 2, Hp), lambda i: (0, 0, 0)),             # zg partials
            pl.BlockSpec((Hp, Hp), lambda i: (0, 0)),                      # Wg
            pl.BlockSpec((1, Hp), lambda i: (0, 0)),                       # bg
        ],
        out_specs=pl.BlockSpec((1, Hp), lambda i: (0, 0)),
        compiler_params=pltpu.CompilerParams(dimension_semantics=("arbitrary",)),
    )(alphas, zg_part, wg_p, bg_p)

    return zg_pad[:, :H], zn_pad[:N, :H]


# --------------------------------------------------------------------------------------
# Pure-JAX reference (module semantics). simulate_bf16=True mimics the kernel's bf16 cast
# of A and X@W_enc for a tight numerical check; False is the straight f32 forward.
# --------------------------------------------------------------------------------------
def _reference(alphas, a1, a2, x, w_enc0, w_enc1, wg, bg, wn, bn, simulate_bf16):
    def rnd(m):
        return m.astype(jnp.bfloat16).astype(jnp.float32) if simulate_bf16 else m

    def one_view(adj, w_enc, a_e):
        h = _prelu(rnd(adj) @ rnd(x @ w_enc), a_e)
        zg = jnp.sum(h, axis=0, keepdims=True)
        return _prelu(zg @ wg + bg, alphas[2]), _prelu(h @ wn + bn, alphas[3])

    zg1, zn1 = one_view(a1, w_enc0, alphas[0])
    zg2, zn2 = one_view(a2, w_enc1, alphas[1])
    return zg1 + zg2, zn1 + zn2


if __name__ == "__main__":
    N, F, H = 512, 4, 32           # small, but large enough to exercise the 2x2 tiling
    key = jax.random.PRNGKey(0)
    ks = jax.random.split(key, 8)

    # node features
    x = jax.random.normal(ks[0], (N, F), jnp.float32)

    # random undirected graph, then the two MVGRL views (glue in JAX)
    edges = (jax.random.uniform(ks[1], (N, N)) < 0.05).astype(jnp.float32)
    adj = jnp.maximum(edges, edges.T) * (1.0 - jnp.eye(N, dtype=jnp.float32))
    a_hat = adj + jnp.eye(N, dtype=jnp.float32)
    d_inv_sqrt = 1.0 / jnp.sqrt(jnp.sum(a_hat, axis=1))
    a_view0 = d_inv_sqrt[:, None] * a_hat * d_inv_sqrt[None, :]            # GCN-normalized A
    teleport = 0.2
    a_view1 = teleport * jnp.linalg.inv(                                   # PPR diffusion
        jnp.eye(N, dtype=jnp.float32) - (1.0 - teleport) * a_view0)

    # deterministic parameters (synthetic init; PReLU slope = torch default 0.25)
    w_enc0 = 0.1 * jax.random.normal(ks[2], (F, H), jnp.float32)
    w_enc1 = 0.1 * jax.random.normal(ks[3], (F, H), jnp.float32)
    wg = 0.1 * jax.random.normal(ks[4], (H, H), jnp.float32)
    bg = 0.01 * jax.random.normal(ks[5], (1, H), jnp.float32)
    wn = 0.1 * jax.random.normal(ks[6], (H, H), jnp.float32)
    bn = 0.01 * jax.random.normal(ks[7], (1, H), jnp.float32)
    alphas = jnp.array([0.25, 0.25, 0.25, 0.25], jnp.float32)  # enc0, enc1, proj, proj_n

    zg, zn = mvgrl_enc(alphas, a_view0, a_view1, x,
                       w_enc0, w_enc1, wg, bg, wn, bn, tm=256, tk=256)
    jax.block_until_ready((zg, zn))

    assert zg.shape == (1, H) and zn.shape == (N, H)

    # tight check against the reference using the same bf16-rounded A / XW as the kernel
    zg_q, zn_q = _reference(alphas, a_view0, a_view1, x,
                            w_enc0, w_enc1, wg, bg, wn, bn, simulate_bf16=True)
    assert bool(jnp.allclose(zg, zg_q, rtol=1e-2, atol=1e-2))
    assert bool(jnp.allclose(zn, zn_q, rtol=1e-2, atol=1e-2))

    # relaxed check against the pure-f32 module forward (bf16 quantization tolerance)
    zg_f, zn_f = _reference(alphas, a_view0, a_view1, x,
                            w_enc0, w_enc1, wg, bg, wn, bn, simulate_bf16=False)
    assert bool(jnp.allclose(zg, zg_f, rtol=5e-2, atol=5e-2))
    assert bool(jnp.allclose(zn, zn_f, rtol=5e-2, atol=5e-3))

    print("KERNEL_OK")
</pallas_src>

<mosaic_0001>
module attributes {stable_mosaic.version = 11 : i64} {
  func.func @mvgrl_main_kernel(%arg0: i32, %arg1: i32, %arg2: memref<4xf32, #tpu.memory_space<smem>>, %arg3: memref<2x256x256xbf16, #tpu.memory_space<vmem>>, %arg4: memref<2x256x128xbf16, #tpu.memory_space<vmem>>, %arg5: memref<128x128xf32, #tpu.memory_space<vmem>>, %arg6: memref<1x128xf32, #tpu.memory_space<vmem>>, %arg7: memref<256x128xf32, #tpu.memory_space<vmem>>, %arg8: memref<1x2x128xf32, #tpu.memory_space<vmem>>, %arg9: memref<256x128xf32, #tpu.memory_space<vmem>>, %arg10: memref<256x128xf32, #tpu.memory_space<vmem>>) attributes {dimension_semantics = [#tpu.dimension_semantics<parallel>, #tpu.dimension_semantics<arbitrary>], iteration_bounds = array<i64: 2, 2>, scalar_prefetch = 0 : i64, scratch_operands = 2 : i64, tpu.core_type = #tpu.core_type<tc>, window_params = [{transform_indices = @transform_0, window_bounds = array<i64: 4>}, {transform_indices = @transform_1, window_bounds = array<i64: 2, 256, 256>}, {transform_indices = @transform_2, window_bounds = array<i64: 2, 256, 128>}, {pipeline_mode = #tpu.pipeline_mode<synchronous>, transform_indices = @transform_3, window_bounds = array<i64: 128, 128>}, {pipeline_mode = #tpu.pipeline_mode<synchronous>, transform_indices = @transform_4, window_bounds = array<i64: 1, 128>}, {transform_indices = @transform_5, window_bounds = array<i64: 256, 128>}, {transform_indices = @transform_6, window_bounds = array<i64: 1, 2, 128>}]} {
    %c0_i32 = arith.constant 0 : i32
    %0 = arith.cmpi eq, %arg1, %c0_i32 : i32
    %1 = arith.extui %0 : i1 to i32
    %c0_i32_0 = arith.constant 0 : i32
    %2 = arith.cmpi ne, %1, %c0_i32_0 : i32
    scf.if %2 {
      %cst_21 = arith.constant 0.000000e+00 : f32
      %22 = vector.broadcast %cst_21 : f32 to vector<256x128xf32>
      %c0_22 = arith.constant 0 : index
      %c0_23 = arith.constant 0 : index
      %23 = vector.load %arg9[%c0_22, %c0_23] : memref<256x128xf32, #tpu.memory_space<vmem>>, vector<256x128xf32>
      tpu.vector_store %arg9[%c0_22, %c0_23], %22 {strides = array<i32>} : memref<256x128xf32, #tpu.memory_space<vmem>>, vector<256x128xf32>,
      %cst_24 = arith.constant 0.000000e+00 : f32
      %24 = vector.broadcast %cst_24 : f32 to vector<256x128xf32>
      %c0_25 = arith.constant 0 : index
      %c0_26 = arith.constant 0 : index
      %25 = vector.load %arg10[%c0_25, %c0_26] : memref<256x128xf32, #tpu.memory_space<vmem>>, vector<256x128xf32>
      tpu.vector_store %arg10[%c0_25, %c0_26], %24 {strides = array<i32>} : memref<256x128xf32, #tpu.memory_space<vmem>>, vector<256x128xf32>,
    } else {
    }
    %c0 = arith.constant 0 : index
    %c0_1 = arith.constant 0 : index
    %3 = vector.load %arg9[%c0, %c0_1] : memref<256x128xf32, #tpu.memory_space<vmem>>, vector<256x128xf32>
    %c0_2 = arith.constant 0 : index
    %c0_3 = arith.constant 0 : index
    %c0_4 = arith.constant 0 : index
    %4 = vector.load %arg3[%c0_2, %c0_3, %c0_4] : memref<2x256x256xbf16, #tpu.memory_space<vmem>>, vector<1x256x256xbf16>
    %5 = vector.shape_cast %4 : vector<1x256x256xbf16> to vector<256x256xbf16>
    %c0_5 = arith.constant 0 : index
    %c0_6 = arith.constant 0 : index
    %c0_7 = arith.constant 0 : index
    %6 = vector.load %arg4[%c0_5, %c0_6, %c0_7] : memref<2x256x128xbf16, #tpu.memory_space<vmem>>, vector<1x256x128xbf16>
    %7 = vector.shape_cast %6 : vector<1x256x128xbf16> to vector<256x128xbf16>
    %cst = arith.constant dense<0.000000e+00> : vector<256x128xf32>
    %8 = tpu.matmul %5, %7, %cst {dimension_numbers = #tpu.dot_dimension_numbers<[1], [0], [0], [1], [0, 0, 1, 1], [], []>} : vector<256x256xbf16>, vector<256x128xbf16>, vector<256x128xf32> -> vector<256x128xf32>
    %9 = arith.addf %3, %8 : vector<256x128xf32>
    %c0_8 = arith.constant 0 : index
    %c0_9 = arith.constant 0 : index
    %10 = vector.load %arg9[%c0_8, %c0_9] : memref<256x128xf32, #tpu.memory_space<vmem>>, vector<256x128xf32>
    tpu.vector_store %arg9[%c0_8, %c0_9], %9 {strides = array<i32>} : memref<256x128xf32, #tpu.memory_space<vmem>>, vector<256x128xf32>,
    %c0_10 = arith.constant 0 : index
    %c0_11 = arith.constant 0 : index
    %11 = vector.load %arg10[%c0_10, %c0_11] : memref<256x128xf32, #tpu.memory_space<vmem>>, vector<256x128xf32>
    %c1 = arith.constant 1 : index
    %c0_12 = arith.constant 0 : index
    %c0_13 = arith.constant 0 : index
    %12 = vector.load %arg3[%c1, %c0_12, %c0_13] : memref<2x256x256xbf16, #tpu.memory_space<vmem>>, vector<1x256x256xbf16>
    %13 = vector.shape_cast %12 : vector<1x256x256xbf16> to vector<256x256xbf16>
    %c1_14 = arith.constant 1 : index
    %c0_15 = arith.constant 0 : index
    %c0_16 = arith.constant 0 : index
    %14 = vector.load %arg4[%c1_14, %c0_15, %c0_16] : memref<2x256x128xbf16, #tpu.memory_space<vmem>>, vector<1x256x128xbf16>
    %15 = vector.shape_cast %14 : vector<1x256x128xbf16> to vector<256x128xbf16>
    %cst_17 = arith.constant dense<0.000000e+00> : vector<256x128xf32>
    %16 = tpu.matmul %13, %15, %cst_17 {dimension_numbers = #tpu.dot_dimension_numbers<[1], [0], [0], [1], [0, 0, 1, 1], [], []>} : vector<256x256xbf16>, vector<256x128xbf16>, vector<256x128xf32> -> vector<256x128xf32>
    %17 = arith.addf %11, %16 : vector<256x128xf32>
    %c0_18 = arith.constant 0 : index
    %c0_19 = arith.constant 0 : index
    %18 = vector.load %arg10[%c0_18, %c0_19] : memref<256x128xf32, #tpu.memory_space<vmem>>, vector<256x128xf32>
    tpu.vector_store %arg10[%c0_18, %c0_19], %17 {strides = array<i32>} : memref<256x128xf32, #tpu.memory_space<vmem>>, vector<256x128xf32>,
    %c1_i32 = arith.constant 1 : i32
    %19 = arith.cmpi eq, %arg1, %c1_i32 : i32
    %20 = arith.extui %19 : i1 to i32
    %c0_i32_20 = arith.constant 0 : i32
    %21 = arith.cmpi ne, %20, %c0_i32_20 : i32
    scf.if %21 {
      %c3 = arith.constant 3 : index
      %22 = memref.load %arg2[%c3] : memref<4xf32, #tpu.memory_space<smem>>
      %c0_21 = arith.constant 0 : index
      %c0_22 = arith.constant 0 : index
      %23 = vector.load %arg9[%c0_21, %c0_22] : memref<256x128xf32, #tpu.memory_space<vmem>>, vector<256x128xf32>
      %c0_23 = arith.constant 0 : index
      %24 = memref.load %arg2[%c0_23] : memref<4xf32, #tpu.memory_space<smem>>
      %cst_24 = arith.constant 0.000000e+00 : f32
      %25 = vector.broadcast %cst_24 : f32 to vector<256x128xf32>
      %26 = arith.cmpf ogt, %23, %25 : vector<256x128xf32>
      %27 = vector.broadcast %24 : f32 to vector<256x128xf32>
      %28 = arith.mulf %27, %23 : vector<256x128xf32>
      %29 = arith.select %26, %23, %28 : vector<256x128xi1>, vector<256x128xf32>
      %c0_25 = arith.constant 0 : index
      %c0_26 = arith.constant 0 : index
      %30 = vector.load %arg10[%c0_25, %c0_26] : memref<256x128xf32, #tpu.memory_space<vmem>>, vector<256x128xf32>
      %c1_27 = arith.constant 1 : index
      %31 = memref.load %arg2[%c1_27] : memref<4xf32, #tpu.memory_space<smem>>
      %cst_28 = arith.constant 0.000000e+00 : f32
      %32 = vector.broadcast %cst_28 : f32 to vector<256x128xf32>
      %33 = arith.cmpf ogt, %30, %32 : vector<256x128xf32>
      %34 = vector.broadcast %31 : f32 to vector<256x128xf32>
      %35 = arith.mulf %34, %30 : vector<256x128xf32>
      %36 = arith.select %33, %30, %35 : vector<256x128xi1>, vector<256x128xf32>
      %cst_29 = arith.constant dense<0.000000e+00> : vector<128xf32>
      %37 = vector.multi_reduction <add>, %29, %cst_29 [0] : vector<256x128xf32> to vector<128xf32>
      %38 = vector.shape_cast %37 : vector<128xf32> to vector<1x128xf32>
      %c0_30 = arith.constant 0 : index
      %c0_31 = arith.constant 0 : index
      %c0_32 = arith.constant 0 : index
      %39 = vector.load %arg8[%c0_30, %c0_31, %c0_32] : memref<1x2x128xf32, #tpu.memory_space<vmem>>, vector<1x1x128xf32>
      %40 = vector.shape_cast %39 : vector<1x1x128xf32> to vector<1x128xf32>
      %41 = vector.shape_cast %38 : vector<1x128xf32> to vector<1x1x128xf32>
      tpu.vector_store %arg8[%c0_30, %c0_31, %c0_32], %41 {strides = array<i32>} : memref<1x2x128xf32, #tpu.memory_space<vmem>>, vector<1x1x128xf32>,
      %cst_33 = arith.constant dense<0.000000e+00> : vector<128xf32>
      %42 = vector.multi_reduction <add>, %36, %cst_33 [0] : vector<256x128xf32> to vector<128xf32>
      %43 = vector.shape_cast %42 : vector<128xf32> to vector<1x128xf32>
      %c0_34 = arith.constant 0 : index
      %c1_35 = arith.constant 1 : index
      %c0_36 = arith.constant 0 : index
      %44 = vector.load %arg8[%c0_34, %c1_35, %c0_36] : memref<1x2x128xf32, #tpu.memory_space<vmem>>, vector<1x1x128xf32>
      %45 = vector.shape_cast %44 : vector<1x1x128xf32> to vector<1x128xf32>
      %46 = vector.shape_cast %43 : vector<1x128xf32> to vector<1x1x128xf32>
      tpu.vector_store %arg8[%c0_34, %c1_35, %c0_36], %46 {strides = array<i32>} : memref<1x2x128xf32, #tpu.memory_space<vmem>>, vector<1x1x128xf32>,
      %c0_37 = arith.constant 0 : index
      %c0_38 = arith.constant 0 : index
      %47 = vector.load %arg5[%c0_37, %c0_38] : memref<128x128xf32, #tpu.memory_space<vmem>>, vector<128x128xf32>
      %cst_39 = arith.constant dense<0.000000e+00> : vector<256x128xf32>
      %48 = tpu.matmul %29, %47, %cst_39 {dimension_numbers = #tpu.dot_dimension_numbers<[1], [0], [0], [1], [0, 0, 1, 1], [], []>} : vector<256x128xf32>, vector<128x128xf32>, vector<256x128xf32> -> vector<256x128xf32>
      %c0_40 = arith.constant 0 : index
      %c0_41 = arith.constant 0 : index
      %49 = vector.load %arg6[%c0_40, %c0_41] : memref<1x128xf32, #tpu.memory_space<vmem>>, vector<1x128xf32>
      %50 = vector.broadcast %49 : vector<1x128xf32> to vector<256x128xf32>
      %51 = arith.addf %48, %50 : vector<256x128xf32>
      %cst_42 = arith.constant 0.000000e+00 : f32
      %52 = vector.broadcast %cst_42 : f32 to vector<256x128xf32>
      %53 = arith.cmpf ogt, %51, %52 : vector<256x128xf32>
      %54 = vector.broadcast %22 : f32 to vector<256x128xf32>
      %55 = arith.mulf %54, %51 : vector<256x128xf32>
      %56 = arith.select %53, %51, %55 : vector<256x128xi1>, vector<256x128xf32>
      %c0_43 = arith.constant 0 : index
      %c0_44 = arith.constant 0 : index
      %57 = vector.load %arg5[%c0_43, %c0_44] : memref<128x128xf32, #tpu.memory_space<vmem>>, vector<128x128xf32>
      %cst_45 = arith.constant dense<0.000000e+00> : vector<256x128xf32>
      %58 = tpu.matmul %36, %57, %cst_45 {dimension_numbers = #tpu.dot_dimension_numbers<[1], [0], [0], [1], [0, 0, 1, 1], [], []>} : vector<256x128xf32>, vector<128x128xf32>, vector<256x128xf32> -> vector<256x128xf32>
      %c0_46 = arith.constant 0 : index
      %c0_47 = arith.constant 0 : index
      %59 = vector.load %arg6[%c0_46, %c0_47] : memref<1x128xf32, #tpu.memory_space<vmem>>, vector<1x128xf32>
      %60 = vector.broadcast %59 : vector<1x128xf32> to vector<256x128xf32>
      %61 = arith.addf %58, %60 : vector<256x128xf32>
      %cst_48 = arith.constant 0.000000e+00 : f32
      %62 = vector.broadcast %cst_48 : f32 to vector<256x128xf32>
      %63 = arith.cmpf ogt, %61, %62 : vector<256x128xf32>
      %64 = vector.broadcast %22 : f32 to vector<256x128xf32>
      %65 = arith.mulf %64, %61 : vector<256x128xf32>
      %66 = arith.select %63, %61, %65 : vector<256x128xi1>, vector<256x128xf32>
      %67 = arith.addf %56, %66 : vector<256x128xf32>
      %c0_49 = arith.constant 0 : index
      %c0_50 = arith.constant 0 : index
      %68 = vector.load %arg7[%c0_49, %c0_50] : memref<256x128xf32, #tpu.memory_space<vmem>>, vector<256x128xf32>
      tpu.vector_store %arg7[%c0_49, %c0_50], %67 {strides = array<i32>} : memref<256x128xf32, #tpu.memory_space<vmem>>, vector<256x128xf32>,
    } else {
    }
    return
  }
  func.func @transform_0(%arg0: i32, %arg1: i32) -> i32 {
    %c0_i32 = arith.constant 0 : i32
    %c0_i32_0 = arith.constant 0 : i32
    return %c0_i32 : i32
  }
  func.func @transform_1(%arg0: i32, %arg1: i32) -> (i32, i32, i32) {
    %c0_i32 = arith.constant 0 : i32
    %c0_i32_0 = arith.constant 0 : i32
    return %c0_i32, %arg0, %arg1 : i32, i32, i32
  }
  func.func @transform_2(%arg0: i32, %arg1: i32) -> (i32, i32, i32) {
    %c0_i32 = arith.constant 0 : i32
    %c0_i32_0 = arith.constant 0 : i32
    %c0_i32_1 = arith.constant 0 : i32
    return %c0_i32, %arg1, %c0_i32_0 : i32, i32, i32
  }
  func.func @transform_3(%arg0: i32, %arg1: i32) -> (i32, i32) {
    %c0_i32 = arith.constant 0 : i32
    %c0_i32_0 = arith.constant 0 : i32
    %c0_i32_1 = arith.constant 0 : i32
    return %c0_i32, %c0_i32_0 : i32, i32
  }
  func.func @transform_4(%arg0: i32, %arg1: i32) -> (i32, i32) {
    %c0_i32 = arith.constant 0 : i32
    %c0_i32_0 = arith.constant 0 : i32
    %c0_i32_1 = arith.constant 0 : i32
    return %c0_i32, %c0_i32_0 : i32, i32
  }
  func.func @transform_5(%arg0: i32, %arg1: i32) -> (i32, i32) {
    %c0_i32 = arith.constant 0 : i32
    %c0_i32_0 = arith.constant 0 : i32
    return %arg0, %c0_i32 : i32, i32
  }
  func.func @transform_6(%arg0: i32, %arg1: i32) -> (i32, i32, i32) {
    %c0_i32 = arith.constant 0 : i32
    %c0_i32_0 = arith.constant 0 : i32
    %c0_i32_1 = arith.constant 0 : i32
    return %arg0, %c0_i32, %c0_i32_0 : i32, i32, i32
  }
}

</mosaic_0001>

<bundles_post_ra>
// kernel: tpu_custom_call.1
= control target key start
LH: loop header
LB: loop body
LE: loop exit
PB: predicated region body
PF: predicated region fallthrough
CT: control target
= control target key end

     0   :  { %s4776_s0 = inlined_call_operand.hbm [shape: f32[4], index: 0, kind: input, shape index: {}]   ;;  %s4777_s1 = inlined_call_operand.hbm [shape: bf16[2,512,512], index: 1, kind: input, shape index: {}]   ;;  %s4778_s2 = inlined_call_operand.hbm [shape: bf16[2,512,128], index: 2, kind: input, shape index: {}]   ;;  %s4779_s3 = inlined_call_operand.hbm [shape: f32[128,128], index: 3, kind: input, shape index: {}]   ;;  %s4780_s4 = inlined_call_operand.vmem [shape: f32[1,128], index: 4, kind: input, shape index: {}]   ;;  %s4781_s5 = inlined_call_operand.hbm [shape: f32[512,128], index: 5, kind: output, shape index: {0}]   ;;  %s4782_s6 = inlined_call_operand.hbm [shape: f32[2,2,128], index: 6, kind: output, shape index: {1}]  }
   0x1   :  { %4796 = sst [smem:[#allocation39_spill]] %s4776_s0 }
   0x2   :  { %4797 = sst [smem:[#allocation40_spill]] %s4777_s1 }
   0x3   :  { %4798 = sst [smem:[#allocation41_spill]] %s4779_s3 }
   0x4   :  { %4799 = sst [smem:[#allocation42_spill]] %s4781_s5 }
   0x5   :  { %4800 = sst [smem:[#allocation43_spill]] %s4782_s6 }
   0x6   :  { %12 = vsyncpa [#allocation7], 0 }
   0x7   :  { %13 = vsyncpa [#allocation5], 0 }
   0x8   :  { %15 = vsyncpa [#allocation5 + $0x1], 0 }
   0x9   :  { %16 = vsyncpa [#allocation10], 0 }
   0xa   :  { %18 = vsyncpa [#allocation10 + $0x1], 0 }
   0xb   :  { %19 = vsyncpa [#allocation6], 0 }
   0xc   :  { %21 = vsyncpa [#allocation6 + $0x1], 0 }
   0xd   :  { %22 = vsyncpa [#allocation14], 0 }
   0xe   :  { %24 = vsyncpa [#allocation14 + $0x1], 0  ;;  %s3816_s21 = smov 0   ;;  %s3818_s22 = smov 0  }
   0xf   :  { %s3820_s23 = smov 0   ;;  %s3822_s24 = smov 0  }
  0x10   :  { %s3824_s25 = smov 0   ;;  %s3826_s26 = smov 0  }
  0x11   :  { %s3828_s27 = smov 0   ;;  %s3830_s28 = smov 0  }
  0x12   :  { %s3832_s29 = smov 0   ;;  %s3834_s30 = smov 0  }
  0x13   :  { %s3836_s7 = smov 0   ;;  %s3838_s8 = smov 0  }
  0x14   :  { %s3840_s9 = smov 0   ;;  %s3842_s10 = smov 0  }
  0x15 LB: > { %4801 = sst [smem:[#allocation27_spill]] %s3707_s21  ;;  %s3885_s11 = sadd.s32 4294967295, %s3759_s10   ;;  %s3759_s10 = sphi %s3842_s10, %s30_s10   ;;  %s3755_s9 = sphi %s3840_s9, %s4855_s9   ;;  %s3751_s8 = sphi %s3838_s8, %s4854_s8   ;;  %s3747_s7 = sphi %s3836_s7, %s4842_s7   ;;  %s3743_s30 = sphi %s3834_s30, %s4853_s30   ;;  %s3739_s29 = sphi %s3832_s29, %s4841_s29   ;;  %s3735_s28 = sphi %s3830_s28, %s4852_s28   ;;  %s3731_s27 = sphi %s3828_s27, %s4851_s27   ;;  %s3727_s26 = sphi %s3826_s26, %s4850_s26   ;;  %s3723_s25 = sphi %s3824_s25, %s4849_s25   ;;  %s3719_s24 = sphi %s3822_s24, %s4848_s24   ;;  %s3715_s23 = sphi %s3820_s23, %s4838_s23   ;;  %s3711_s22 = sphi %s3818_s22, %s4847_s22   ;;  %s3707_s21 = sphi %s3816_s21, %s4846_s21  }
  0x16   : > { %4802 = sst [smem:[#allocation28_spill]] %s3715_s23  ;;  %s39_s13 = sadd.s32 1, %s3751_s8 }
  0x17   : > { %4803 = sst [smem:[#allocation29_spill]] %s3739_s29  ;;  %s42_s14 = sadd.s32 1, %s3755_s9 }
  0x18   : > { %4804 = sst [smem:[#allocation30_spill]] %s3747_s7  ;;  %p40_p0 = scmp.ge.s32.totalorder %s39_s13, 2 }
  0x19   : > { %4805 = sst [smem:[#allocation31_spill]] %s3755_s9  ;;  %s72_s15 = sadd.s32 1, %s3739_s29 }
  0x1a   : > { %p79_p1 = scmp.ne.s32.totalorder %s3739_s29, %s3735_s28  ;;  %p80_p2 = scmp.eq.s32.totalorder %s3759_s10, 0 }
  0x1b   : > { %s4857_s13 = smov (%p40_p0, %s39_s13), 0  ;;  %s4859_s14 = smov (!%p40_p0, %s42_s14), %s3755_s9 }
  0x1c   : > { %4806 = sst [smem:[#allocation32_spill]] %s4857_s13  ;;  %s68_s16 = ssub.s32 %s3751_s8, %s4857_s13 }
  0x1d   : > { %p3901_p3 = por %p80_p2, %p79_p1  ;;  %p44_p4 = scmp.ge.s32.totalorder %s4859_s14, 2 }
  0x1e   : > { %p85_p5 = scmp.ne.s32.totalorder %s3735_s28, %s3731_s27  ;;  %p4787_p6 = scmp.eq.s32.totalorder %s3885_s11, 0 }
  0x1f   : > { %p96_p7 = scmp.eq.s32.totalorder %s68_s16, 0  ;;  %s4861_s14 = smov (%p44_p4, %s4859_s14), 0 }
  0x20   : > { %4808 = sst [smem:[#allocation33_spill]] %s4861_s14  ;;  %p3911_p8 = por %p4787_p6, %p85_p5 }
  0x21   : > { %s98_s19 = sadd.s32 1, %s3727_s26  ;;  %s67_s20 = ssub.s32 %s3755_s9, %s4861_s14 }
  0x22   : > { %p105_p9 = scmp.ne.s32.totalorder %s3727_s26, %s3723_s25  ;;  %s69_s27 = sor.u32 %s68_s16, %s67_s20 }
  0x23   : > { %p111_p10 = scmp.ne.s32.totalorder %s3723_s25, %s3719_s24  ;;  %p70_p11 = scmp.eq.s32.totalorder %s69_s27, 0 }
  0x24   : > { %p3924_p12 = por %p105_p9, %p80_p2  ;;  %p164_p0 = scmp.eq.s32.totalorder %s67_s20, 0 }
  0x25   : > { %s3929_s13 = scalar_select %p96_p7, %s3727_s26, %s98_s19  }
  0x26   : > { %s3932_s6 = scalar_select %p70_p11, %s3739_s29, %s72_s15  }
  0x27   : > { %4811 = sst [smem:[#allocation34_spill]] %s3929_s13  ;;  %p3936_p13 = por %p111_p10, %p4787_p6 }
  0x28   : > { %4812 = sst [smem:[#allocation35_spill]] %s3932_s6  ;;  %s166_s14 = sadd.s32 1, %s3715_s23 }
  0x29   : > { %p176_p1 = scmp.ne.s32.totalorder %s3715_s23, %s3711_s22  ;;  %p177_p4 = scmp.eq.s32.totalorder %s3885_s11, 3 }
  0x2a   : > { %s3944_s24 = scalar_select %p164_p0, %s3715_s23, %s166_s14  }
  0x2b   : > { %p182_p2 = scmp.ne.s32.totalorder %s3711_s22, %s3707_s21  ;;  %s4815_s16 = sadd.s32 4294967294, %s3759_s10  }
  0x2c   : > { %4814 = sst [smem:[#allocation36_spill]] %s3944_s24  ;;  %p183_p5 = scmp.eq.s32.totalorder %s4815_s16, 3 }
  0x2d   : > { %p2729_p9 = scmp.ge.s32.totalorder %s3759_s10, 1  ;;  %p3952_p7 = por %p177_p4, %p176_p1 }
  0x2e   : > { %p216_p11 = scmp.lt.s32.totalorder %s3759_s10, 5  ;;  %p3957_p10 = por %p183_p5, %p182_p2 }
  0x2f   : > { %s4816_s19 = scalar_select %p3952_p7, 1, 0 }
  0x30   : > { %s4818_s15 = scalar_select %p3957_p10, 1, 0 }
  0x31   : > { %4817 = sst [smem:[#allocation37_spill]] %s4816_s19  ;;  %p3961_p6 = pnand %p2729_p9, %p216_p11 }
  0x32   : > { %4819 = sst [smem:[#allocation38_spill]] %s4818_s15  ;;  %p4823_p1 = scmp.eq.s32.totalorder %s3885_s11, 0 }
  0x33   : > { %s4821_s0 = sld [smem:[#allocation39_spill]]  ;;  %p3372_p0 = pneg %p3961_p6 }
  0x34   : > { %s4822_s3 = sld [smem:[#allocation41_spill]]  ;;  %s3761_s23 = smov [#allocation11]  }
  0x35   : > { %p3373_p4 = pnand %p3372_p0, %p4823_p1  ;;  %s239_s15 = sshll.u32 %s3761_s23, 4  ;;  %s240_s15 = int_to_ptr.vmem [resolvable:$true] %s239_s15 }
  0x36   : > { %s3762_s21 = smov [#allocation4]   ;;  %s3763_s19 = smov 128  }
  0x37   : > { %s3764_s7 = smov 8   ;;  %p2732_p2 = scmp.ge.s32.totalorder %s3759_s10, 4 }
  0x39   : > { %s228_s6 = sshll.u32 %s4821_s0, 4  ;;  %252 = sbr.rel (%p2732_p2) target bundleno = 93 (0x5d), region = 28  ;;  %s229_s6 = int_to_ptr.hbm [resolvable:$true] %s228_s6 }
  0x3a   : > { %s237_s24 = sshll.u32 %s4822_s3, 4  ;;  %s238_s24 = int_to_ptr.hbm [resolvable:$true] %s237_s24 }
  0x3b   : > { %3375 = dma.hbm_to_smem (!%p3373_p4), %s229_s6, 16, %s3762_s21, [#allocation7]  }
  0x3c   : > { %3378 = dma.hbm_to_vmem [thread:$0]  (!%p3373_p4), %s238_s24, 2048, %s240_s15, [#allocation10], %s3763_s19, %s3763_s19, %s3764_s7  }
  0x3e   : > { %s256_s13 = sand.u32 1, %s3739_s29   ;;  %s2735_s14 = sshll.u32 %s3751_s8, 1 }
  0x3f   : > { %s2733_s27 = sshll.u32 %s256_s13, 9  ;;  %s3211_s16 = sshll.u32 %s3755_s9, 7 }
  0x40   : > { %s266_s23 = sadd.s32 %s3211_s16, %s2735_s14  ;;  %s260_s0 = scalar_lea.vmem [#allocation8], %s2733_s27 }
  0x41   : > { %s283_s6 = sshll.u32 %s260_s0, 4  ;;  %s2737_s21 = sshll.u32 %s266_s23, 2  ;;  %s284_s6 = int_to_ptr.vmem [resolvable:$true] %s283_s6 }
  0x42   : > { %s4824_s1 = sld [smem:[#allocation40_spill]]  ;;  %s3765_s29 = smov 16384  }
  0x43   : > { %s3346_s15 = scalar_select %p3901_p3, [#allocation0], [#allocation19] }
  0x44   : > { %3347 = sst [smem:[#allocation16]] (%p3901_p3), %s3765_s29  ;;  %s3766_s14 = smov 4096  }
  0x45   : > { %s273_s9 = sld [smem:[%s3346_s15]]   ;;  %s3767_s0 = smov 32  }
  0x46   : > { %3348 = sst [smem:[#allocation16 + $0x1]] (%p3901_p3), %s3766_s14  ;;  %s3768_s27 = smov 256  }
  0x47   : > { %3349 = sst [smem:[#allocation16 + $0x2]] (%p3901_p3), %s3767_s0  ;;  %s3769_s16 = smov 128  }
  0x48   : > { %s268_s19 = scalar_lea.hbm %s4824_s1, %s2737_s21  ;;  %3350 = sst [smem:[#allocation16 + $0x3]] (%p3901_p3), %s3768_s27 }
  0x49   : > { %s281_s3 = sshll.u32 %s268_s19, 4  ;;  %3351 = sst [smem:[#allocation16 + $0x4]] (%p3901_p3), %s3769_s16  ;;  %s282_s3 = int_to_ptr.hbm [resolvable:$true] %s281_s3 }
  0x4a   : > { %s3770_s21 = smov 8   ;;  %s257_s7 = scalar_lea.sflag [#allocation5], %s256_s13 }
  0x4b   : > { %s2738_s23 = sshll.u32 %s273_s9, 26  ;;  %3352 = sst [smem:[#allocation16 + $0x5]] (%p3901_p3), %s3770_s21 }
  0x4c   : > { %s2739_s29 = sadd.s32 134217728, %s2738_s23  ;;  %s3771_s24 = smov [#allocation15]  }
  0x4d   : > { %3353 = dma.general (%p3901_p3), %s282_s3, 8192, %s284_s6, %s257_s7, %s3771_s24, [#allocation16], %s2739_s29, 0  }
  0x4e   : > { %s306_s19 = sand.u32 1, %s3759_s10   ;;  %s308_s15 = sand.u32 1, %s3727_s26  }
  0x4f   : > { %s2740_s14 = sshll.u32 %s308_s15, 8  ;;  %s3212_s0 = sshll.u32 %s3751_s8, 7 }
  0x50   : > { %s315_s16 = scalar_lea.hbm %s4778_s2, %s3212_s0  ;;  %s310_s13 = scalar_lea.vmem [#allocation9], %s2740_s14 }
  0x51   : > { %s330_s17 = sshll.u32 %s310_s13, 4  ;;  %s328_s6 = sshll.u32 %s315_s16, 4  ;;  %s331_s17 = int_to_ptr.vmem [resolvable:$true] %s330_s17  ;;  %s329_s6 = int_to_ptr.hbm [resolvable:$true] %s328_s6 }
  0x52   : > { %s3354_s3 = scalar_select %p3924_p12, [#allocation0], [#allocation20] }
  0x53   : > { %s3772_s21 = smov 4096   ;;  %s3773_s29 = smov 2048  }
  0x54   : > { %s320_s23 = sld [smem:[%s3354_s3]]   ;;  %s3774_s7 = smov 32  }
  0x55   : > { %3355 = sst [smem:[#allocation18]] (%p3924_p12), %s3772_s21  ;;  %s3775_s24 = smov 64  }
  0x56   : > { %3356 = sst [smem:[#allocation18 + $0x1]] (%p3924_p12), %s3773_s29  ;;  %s3776_s0 = smov 4  }
  0x57   : > { %3357 = sst [smem:[#allocation18 + $0x2]] (%p3924_p12), %s3774_s7  ;;  %s307_s9 = scalar_lea.sflag [#allocation10], %s306_s19 }
  0x58   : > { %3358 = sst [smem:[#allocation18 + $0x3]] (%p3924_p12), %s3775_s24  ;;  %s3777_s27 = smov [#allocation17]  }
  0x59   : > { %3359 = sst [smem:[#allocation18 + $0x4]] (%p3924_p12), %s3775_s24 }
  0x5a   : > { %s2743_s15 = sshll.u32 %s320_s23, 26  ;;  %3360 = sst [smem:[#allocation18 + $0x5]] (%p3924_p12), %s3776_s0 }
  0x5b   : > { %s2744_s14 = sadd.s32 134217728, %s2743_s15 }
  0x5c   : > { %3361 = dma.general (%p3924_p12), %s329_s6, 4096, %s331_s17, %s307_s9, %s3777_s27, [#allocation18], %s2744_s14, 0  }
  0x5d PF: > { %355 = sbr.rel (%p3961_p6) target bundleno = 940 (0x3ac), region = 40  ;;  %p4825_p3 = scmp.eq.s32.totalorder (!%p3961_p6), %s3885_s11, 0 }
  0x62   : > { %3682 = dma.done.wait (%p4825_p3), [#allocation7], 16   ;;  %p4826_p5 = pmov %p4825_p3 }
  0x63   : > { %s362_s16 = sand.u32 1, %s3735_s28  }
  0x64   : > { %3684 = vsyncadd (%p4826_p5), [#allocation7], 4294967280  ;;  %s2747_s13 = sshll.u32 %s362_s16, 9  ;;  %s363_s3 = scalar_lea.sflag [#allocation5], %s362_s16 }
  0x65   : > { %s4027_s23 = scalar_lea.vmem [#allocation8], %s2747_s13 }
  0x66   : > { %3686 = dma.done.wait (%p3911_p8), %s363_s3, 8192  }
  0x67   : > { %3688 = vsyncadd (%p3911_p8), %s363_s3, 4294959104  ;;  %s372_s12 = sand.u32 1, %s3885_s11   ;;  %s374_s20 = sand.u32 1, %s3723_s25  }
  0x68   : > { %s2748_s19 = sshll.u32 %s374_s20, 8  ;;  %s373_s17 = scalar_lea.sflag [#allocation10], %s372_s12 }
  0x69   : > { %s4035_s6 = scalar_lea.vmem [#allocation9], %s2748_s19 }
  0x6a   : > { %3690 = dma.done.wait (%p3936_p13), %s373_s17, 4096  }
  0x6b   : > { %3692 = vsyncadd (%p3936_p13), %s373_s17, 4294963200  ;;  %p4827_p6 = pmov %p4825_p3 }
  0x6c   : > { %p4828_p12 = pmov %p4825_p3 }
  0x6d   : > { %3694 = dma.done.wait (%p4827_p6), [#allocation10], 2048  }
  0x6e   : > { %3696 = vsyncadd (%p4828_p12), [#allocation10], 4294965248 }
  0x6f   : > { %387 = sfence }
  0x70   : > { %s4046_s18 = sand.u32 1, %s3711_s22   ;;  %p2752_p8 = scmp.ne.s32.totalorder %s3743_s30, 0 }
  0x71   : > { %s2750_s21 = sshll.u32 %s4046_s18, 8  ;;  %s2751_s29 = sshll.u32 %s4046_s18, 1 }
  0x72   : > { %s4050_s7 = scalar_lea.vmem [#allocation12], %s2750_s21  ;;  %s4052_s24 = scalar_lea.vmem [#allocation13], %s2751_s29 }
  0x73   : > { %429 = sbr.rel (%p2752_p8) target bundleno = 185 (0xb9), region = 60 }
  0x78   : > { %v3778_v0 = vmov 0.0  }
  0x79   : > { %430 = vst [vmem:[#allocation2 + $0xb0] sm:$0xff] %v3778_v0 }
  0x7a   : > { %431 = vst [vmem:[#allocation2] sm:$0xff] %v3778_v0 }
  0x7b   : > { %432 = vst [vmem:[#allocation2 + $0xd8] sm:$0xff] %v3778_v0 }
  0x7c   : > { %433 = vst [vmem:[#allocation2 + $0x18] sm:$0xff] %v3778_v0 }
  0x7d   : > { %434 = vst [vmem:[#allocation2 + $0x50] sm:$0xff] %v3778_v0 }
  0x7e   : > { %435 = vst [vmem:[#allocation2 + $0x68] sm:$0xff] %v3778_v0 }
  0x7f   : > { %436 = vst [vmem:[#allocation2 + $0x30] sm:$0xff] %v3778_v0 }
  0x80   : > { %437 = vst [vmem:[#allocation2 + $0x48] sm:$0xff] %v3778_v0 }
  0x81   : > { %438 = vst [vmem:[#allocation2 + $0x80] sm:$0xff] %v3778_v0 }
  0x82   : > { %439 = vst [vmem:[#allocation2 + $0x88] sm:$0xff] %v3778_v0 }
  0x83   : > { %440 = vst [vmem:[#allocation2 + $0xe8] sm:$0xff] %v3778_v0 }
  0x84   : > { %441 = vst [vmem:[#allocation2 + $0xb8] sm:$0xff] %v3778_v0 }
  0x85   : > { %442 = vst [vmem:[#allocation2 + $0x60] sm:$0xff] %v3778_v0 }
  0x86   : > { %443 = vst [vmem:[#allocation2 + $0xf0] sm:$0xff] %v3778_v0 }
  0x87   : > { %444 = vst [vmem:[#allocation2 + $0x8] sm:$0xff] %v3778_v0 }
  0x88   : > { %445 = vst [vmem:[#allocation2 + $0x78] sm:$0xff] %v3778_v0 }
  0x89   : > { %446 = vst [vmem:[#allocation2 + $0x38] sm:$0xff] %v3778_v0 }
  0x8a   : > { %447 = vst [vmem:[#allocation2 + $0x58] sm:$0xff] %v3778_v0 }
  0x8b   : > { %448 = vst [vmem:[#allocation2 + $0x40] sm:$0xff] %v3778_v0 }
  0x8c   : > { %449 = vst [vmem:[#allocation2 + $0xc8] sm:$0xff] %v3778_v0 }
  0x8d   : > { %450 = vst [vmem:[#allocation2 + $0xe0] sm:$0xff] %v3778_v0 }
  0x8e   : > { %451 = vst [vmem:[#allocation2 + $0x90] sm:$0xff] %v3778_v0 }
  0x8f   : > { %452 = vst [vmem:[#allocation2 + $0x70] sm:$0xff] %v3778_v0 }
  0x90   : > { %453 = vst [vmem:[#allocation2 + $0xc0] sm:$0xff] %v3778_v0 }
  0x91   : > { %454 = vst [vmem:[#allocation2 + $0xa8] sm:$0xff] %v3778_v0 }
  0x92   : > { %455 = vst [vmem:[#allocation2 + $0xd0] sm:$0xff] %v3778_v0 }
  0x93   : > { %456 = vst [vmem:[#allocation2 + $0x10] sm:$0xff] %v3778_v0 }
  0x94   : > { %457 = vst [vmem:[#allocation2 + $0x28] sm:$0xff] %v3778_v0 }
  0x95   : > { %458 = vst [vmem:[#allocation2 + $0xa0] sm:$0xff] %v3778_v0 }
  0x96   : > { %459 = vst [vmem:[#allocation2 + $0xf8] sm:$0xff] %v3778_v0 }
  0x97   : > { %460 = vst [vmem:[#allocation2 + $0x20] sm:$0xff] %v3778_v0 }
  0x98   : > { %461 = vst [vmem:[#allocation2 + $0x98] sm:$0xff] %v3778_v0 }
  0x99   : > { %462 = vst [vmem:[#allocation3 + $0x80] sm:$0xff] %v3778_v0 }
  0x9a   : > { %463 = vst [vmem:[#allocation3 + $0xc8] sm:$0xff] %v3778_v0 }
  0x9b   : > { %464 = vst [vmem:[#allocation3 + $0xe8] sm:$0xff] %v3778_v0 }
  0x9c   : > { %465 = vst [vmem:[#allocation3 + $0x78] sm:$0xff] %v3778_v0 }
  0x9d   : > { %466 = vst [vmem:[#allocation3 + $0x8] sm:$0xff] %v3778_v0 }
  0x9e   : > { %467 = vst [vmem:[#allocation3 + $0x90] sm:$0xff] %v3778_v0 }
  0x9f   : > { %468 = vst [vmem:[#allocation3 + $0x58] sm:$0xff] %v3778_v0 }
  0xa0   : > { %469 = vst [vmem:[#allocation3 + $0xa8] sm:$0xff] %v3778_v0 }
  0xa1   : > { %470 = vst [vmem:[#allocation3 + $0xd0] sm:$0xff] %v3778_v0 }
  0xa2   : > { %471 = vst [vmem:[#allocation3 + $0xb0] sm:$0xff] %v3778_v0 }
  0xa3   : > { %472 = vst [vmem:[#allocation3 + $0x38] sm:$0xff] %v3778_v0 }
  0xa4   : > { %473 = vst [vmem:[#allocation3 + $0x40] sm:$0xff] %v3778_v0 }
  0xa5   : > { %474 = vst [vmem:[#allocation3 + $0xe0] sm:$0xff] %v3778_v0 }
  0xa6   : > { %475 = vst [vmem:[#allocation3 + $0x60] sm:$0xff] %v3778_v0 }
  0xa7   : > { %476 = vst [vmem:[#allocation3 + $0x18] sm:$0xff] %v3778_v0 }
  0xa8   : > { %477 = vst [vmem:[#allocation3 + $0x68] sm:$0xff] %v3778_v0 }
  0xa9   : > { %478 = vst [vmem:[#allocation3 + $0x10] sm:$0xff] %v3778_v0 }
  0xaa   : > { %479 = vst [vmem:[#allocation3 + $0x70] sm:$0xff] %v3778_v0 }
  0xab   : > { %480 = vst [vmem:[#allocation3 + $0x50] sm:$0xff] %v3778_v0 }
  0xac   : > { %481 = vst [vmem:[#allocation3 + $0xa0] sm:$0xff] %v3778_v0 }
  0xad   : > { %482 = vst [vmem:[#allocation3 + $0xd8] sm:$0xff] %v3778_v0 }
  0xae   : > { %483 = vst [vmem:[#allocation3 + $0x30] sm:$0xff] %v3778_v0 }
  0xaf   : > { %484 = vst [vmem:[#allocation3 + $0x20] sm:$0xff] %v3778_v0 }
  0xb0   : > { %485 = vst [vmem:[#allocation3 + $0xf0] sm:$0xff] %v3778_v0 }
  0xb1   : > { %486 = vst [vmem:[#allocation3 + $0x88] sm:$0xff] %v3778_v0 }
  0xb2   : > { %487 = vst [vmem:[#allocation3 + $0x48] sm:$0xff] %v3778_v0 }
  0xb3   : > { %488 = vst [vmem:[#allocation3 + $0xf8] sm:$0xff] %v3778_v0 }
  0xb4   : > { %489 = vst [vmem:[#allocation3 + $0xc0] sm:$0xff] %v3778_v0 }
  0xb5   : > { %490 = vst [vmem:[#allocation3 + $0xb8] sm:$0xff] %v3778_v0 }
  0xb6   : > { %491 = vst [vmem:[#allocation3] sm:$0xff] %v3778_v0 }
  0xb7   : > { %492 = vst [vmem:[#allocation3 + $0x28] sm:$0xff] %v3778_v0 }
  0xb8   : > { %493 = vst [vmem:[#allocation3 + $0x98] sm:$0xff] %v3778_v0 }
  0xb9 PF: > { %v3252_v1 = vld [vmem:[%s4035_s6 + $0x38] sm:$0xff]  ;;  %v3251_v5 = vld [vmem:[%s4035_s6 + $0x30] sm:$0xff]  ;;  %v3250_v9 = vld [vmem:[%s4035_s6 + $0x28] sm:$0xff]  ;;  %p3201_p13 = scmp.ne.s32.totalorder %s3743_s30, 1 }
  0xba   : > { %v3260_v2 = vld [vmem:[%s4035_s6 + $0x78] sm:$0xff]  ;;  %846 = vmatpush.bf16.msra.mxu0 %v3252_v1  ;;  %v3259_v6 = vld [vmem:[%s4035_s6 + $0x70] sm:$0xff]  ;;  %v3258_v10 = vld [vmem:[%s4035_s6 + $0x68] sm:$0xff]  ;;  %s3203_s5 = sld [smem:[#allocation4 + $0x1]] (!%p3201_p13) }
  0xbb   : > { %v3300_v3 = vld [vmem:[%s4035_s6 + $0xb8] sm:$0xff]  ;;  %935 = vmatpush.bf16.msra.mxu1 %v3260_v2  ;;  %v3299_v7 = vld [vmem:[%s4035_s6 + $0xb0] sm:$0xff]  ;;  %v3298_v11 = vld [vmem:[%s4035_s6 + $0xa8] sm:$0xff]  ;;  %s1721_s30 = sld [smem:[#allocation4]] (!%p3201_p13) }
  0xbc   : > { %v3308_v4 = vld [vmem:[%s4035_s6 + $0xf8] sm:$0xff]  ;;  %1442 = vmatpush.bf16.msra.mxu2 %v3300_v3  ;;  %v3307_v8 = vld [vmem:[%s4035_s6 + $0xf0] sm:$0xff]  ;;  %v3306_v12 = vld [vmem:[%s4035_s6 + $0xe8] sm:$0xff]  ;;  %s3202_s11 = sld [smem:[#allocation4 + $0x3]] (!%p3201_p13) }
  0xbd   : > { %1531 = vmatpush.bf16.msra.mxu3 %v3308_v4  ;;  %v3249_v13 = vld [vmem:[%s4035_s6 + $0x20] sm:$0xff]  ;;  %v3248_v17 = vld [vmem:[%s4035_s6 + $0x18] sm:$0xff]  ;;  %v3247_v21 = vld [vmem:[%s4035_s6 + $0x10] sm:$0xff] }
  0xbe   : > { %847 = vmatpush.bf16.msra.mxu0 %v3251_v5  ;;  %v3257_v14 = vld [vmem:[%s4035_s6 + $0x60] sm:$0xff]  ;;  %v3256_v18 = vld [vmem:[%s4035_s6 + $0x58] sm:$0xff]  ;;  %v3255_v22 = vld [vmem:[%s4035_s6 + $0x50] sm:$0xff] }
  0xbf   : > { %936 = vmatpush.bf16.msra.mxu1 %v3259_v6  ;;  %v3297_v15 = vld [vmem:[%s4035_s6 + $0xa0] sm:$0xff]  ;;  %v3296_v19 = vld [vmem:[%s4035_s6 + $0x98] sm:$0xff]  ;;  %v3295_v23 = vld [vmem:[%s4035_s6 + $0x90] sm:$0xff] }
  0xc0   : > { %1443 = vmatpush.bf16.msra.mxu2 %v3299_v7  ;;  %v3305_v16 = vld [vmem:[%s4035_s6 + $0xe0] sm:$0xff]  ;;  %v3304_v20 = vld [vmem:[%s4035_s6 + $0xd8] sm:$0xff]  ;;  %v3303_v24 = vld [vmem:[%s4035_s6 + $0xd0] sm:$0xff] }
  0xc1   : > { %1532 = vmatpush.bf16.msra.mxu3 %v3307_v8  ;;  %v3246_v25 = vld [vmem:[%s4035_s6 + $0x8] sm:$0xff]  ;;  %v3245_v29 = vld [vmem:[%s4035_s6] sm:$0xff]  ;;  %v2763_v45 = vld [vmem:[%s4027_s23 + $0x10] sm:$0xf] }
  0xc2   : > { %848 = vmatpush.bf16.msra.mxu0 %v3250_v9  ;;  %v3254_v26 = vld [vmem:[%s4035_s6 + $0x48] sm:$0xff]  ;;  %v3253_v30 = vld [vmem:[%s4035_s6 + $0x40] sm:$0xff]  ;;  %v3216_v46 = vld [vmem:[%s4027_s23 + $0x14] sm:$0xf0] }
  0xc3   : > { %937 = vmatpush.bf16.msra.mxu1 %v3258_v10  ;;  %v3294_v27 = vld [vmem:[%s4035_s6 + $0x88] sm:$0xff]  ;;  %v3293_v31 = vld [vmem:[%s4035_s6 + $0x80] sm:$0xff]  ;;  %v3215_v47 = vld [vmem:[%s4027_s23 + $0x14] sm:$0xf]  ;;  %v2764_v53 = vor.u32 %v3216_v46, %v2763_v45 }
  0xc4   : > { %1444 = vmatpush.bf16.msra.mxu2 %v3298_v11  ;;  %v3302_v28 = vld [vmem:[%s4035_s6 + $0xc8] sm:$0xff]  ;;  %v3301_v32 = vld [vmem:[%s4035_s6 + $0xc0] sm:$0xff]  ;;  %v2765_v48 = vld [vmem:[%s4027_s23 + $0x18] sm:$0xf0] }
  0xc5   : > { %1533 = vmatpush.bf16.msra.mxu3 %v3306_v12  ;;  %v2755_v33 = vld [vmem:[%s4027_s23] sm:$0xf]  ;;  %v3214_v34 = vld [vmem:[%s4027_s23 + $0x4] sm:$0xf0]  ;;  %v3213_v35 = vld [vmem:[%s4027_s23 + $0x4] sm:$0xf]  ;;  %v2768_v54 = vor.u32 %v3215_v47, %v2765_v48 }
  0xc6   : > { %849 = vmatpush.bf16.msra.mxu0 %v3249_v13  ;;  %v2757_v36 = vld [vmem:[%s4027_s23 + $0x8] sm:$0xf0]  ;;  %v3011_v37 = vld [vmem:[%s4027_s23 + $0x100] sm:$0xf]  ;;  %v3262_v38 = vld [vmem:[%s4027_s23 + $0x104] sm:$0xf0]  ;;  %v2756_v41 = vor.u32 %v3214_v34, %v2755_v33 }
  0xc7   : > { %938 = vmatpush.bf16.msra.mxu1 %v3257_v14  ;;  %v3261_v39 = vld [vmem:[%s4027_s23 + $0x104] sm:$0xf]  ;;  %v3013_v40 = vld [vmem:[%s4027_s23 + $0x108] sm:$0xf0]  ;;  %v2760_v42 = vor.u32 %v3213_v35, %v2757_v36  ;;  %v3012_v43 = vor.u32 %v3262_v38, %v3011_v37  ;;  %v3019_v49 = vld [vmem:[%s4027_s23 + $0x110] sm:$0xf] }
  0xc8   : > { %1445 = vmatpush.bf16.msra.mxu2 %v3297_v15  ;;  %v3016_v44 = vor.u32 %v3261_v39, %v3013_v40  ;;  %v3264_v50 = vld [vmem:[%s4027_s23 + $0x114] sm:$0xf0]  ;;  %v3263_v51 = vld [vmem:[%s4027_s23 + $0x114] sm:$0xf]  ;;  %v3021_v52 = vld [vmem:[%s4027_s23 + $0x118] sm:$0xf0] }
  0xc9   : > { %1534 = vmatpush.bf16.msra.mxu3 %v3305_v16  ;;  %v3020_v55 = vor.u32 %v3264_v50, %v3019_v49  ;;  %v3024_v56 = vor.u32 %v3263_v51, %v3021_v52  ;;  %v2771_v57 = vld [vmem:[%s4027_s23 + $0x20] sm:$0xf]  ;;  %v3218_v58 = vld [vmem:[%s4027_s23 + $0x24] sm:$0xf0]  ;;  %v3217_v59 = vld [vmem:[%s4027_s23 + $0x24] sm:$0xf] }
  0xca   : > { %850 = vmatpush.bf16.msra.mxu0 %v3248_v17  ;;  %v2773_v60 = vld [vmem:[%s4027_s23 + $0x28] sm:$0xf0]  ;;  %v3027_v61 = vld [vmem:[%s4027_s23 + $0x120] sm:$0xf]  ;;  %v3266_v62 = vld [vmem:[%s4027_s23 + $0x124] sm:$0xf0]  ;;  %v2772_v1 = vor.u32 %v3218_v58, %v2771_v57 }
  0xcb   : > { %939 = vmatpush.bf16.msra.mxu1 %v3256_v18  ;;  %v3265_v63 = vld [vmem:[%s4027_s23 + $0x124] sm:$0xf]  ;;  %v3029_v0 = vld [vmem:[%s4027_s23 + $0x128] sm:$0xf0]  ;;  %v2776_v2 = vor.u32 %v3217_v59, %v2773_v60  ;;  %v3028_v3 = vor.u32 %v3266_v62, %v3027_v61  ;;  %v2779_v5 = vld [vmem:[%s4027_s23 + $0x30] sm:$0xf] }
  0xcc   : > { %1446 = vmatpush.bf16.msra.mxu2 %v3296_v19  ;;  %v3032_v4 = vor.u32 %v3265_v63, %v3029_v0  ;;  %v3220_v6 = vld [vmem:[%s4027_s23 + $0x34] sm:$0xf0]  ;;  %v3219_v7 = vld [vmem:[%s4027_s23 + $0x34] sm:$0xf]  ;;  %v2781_v8 = vld [vmem:[%s4027_s23 + $0x38] sm:$0xf0] }
  0xcd   : > { %1535 = vmatpush.bf16.msra.mxu3 %v3304_v20  ;;  %v3035_v9 = vld [vmem:[%s4027_s23 + $0x130] sm:$0xf]  ;;  %v3268_v10 = vld [vmem:[%s4027_s23 + $0x134] sm:$0xf0]  ;;  %v3267_v11 = vld [vmem:[%s4027_s23 + $0x134] sm:$0xf]  ;;  %v2780_v13 = vor.u32 %v3220_v6, %v2779_v5  ;;  %v2784_v14 = vor.u32 %v3219_v7, %v2781_v8 }
  0xce   : > { %851 = vmatpush.bf16.msra.mxu0 %v3247_v21  ;;  %v3037_v12 = vld [vmem:[%s4027_s23 + $0x138] sm:$0xf0]  ;;  %v3036_v15 = vor.u32 %v3268_v10, %v3035_v9  ;;  %v2787_v17 = vld [vmem:[%s4027_s23 + $0x40] sm:$0xf]  ;;  %v3222_v18 = vld [vmem:[%s4027_s23 + $0x44] sm:$0xf0] }
  0xcf   : > { %940 = vmatpush.bf16.msra.mxu1 %v3255_v22  ;;  %v3040_v16 = vor.u32 %v3267_v11, %v3037_v12  ;;  %v3221_v19 = vld [vmem:[%s4027_s23 + $0x44] sm:$0xf]  ;;  %v2789_v20 = vld [vmem:[%s4027_s23 + $0x48] sm:$0xf0]  ;;  %v3043_v21 = vld [vmem:[%s4027_s23 + $0x140] sm:$0xf] }
  0xd0   : > { %1447 = vmatpush.bf16.msra.mxu2 %v3295_v23  ;;  %v3270_v22 = vld [vmem:[%s4027_s23 + $0x144] sm:$0xf0]  ;;  %v3269_v23 = vld [vmem:[%s4027_s23 + $0x144] sm:$0xf]  ;;  %v3051_v33 = vld [vmem:[%s4027_s23 + $0x150] sm:$0xf] }
  0xd1   : > { %1536 = vmatpush.bf16.msra.mxu3 %v3303_v24  ;;  %v3045_v24 = vld [vmem:[%s4027_s23 + $0x148] sm:$0xf0]  ;;  %v3272_v34 = vld [vmem:[%s4027_s23 + $0x154] sm:$0xf0]  ;;  %v3271_v35 = vld [vmem:[%s4027_s23 + $0x154] sm:$0xf] }
  0xd2   : > { %852 = vmatpush.bf16.msra.mxu0 %v3246_v25  ;;  %v2788_v25 = vor.u32 %v3222_v18, %v2787_v17  ;;  %v3053_v36 = vld [vmem:[%s4027_s23 + $0x158] sm:$0xf0]  ;;  %v3052_v39 = vor.u32 %v3272_v34, %v3051_v33  ;;  %v3059_v45 = vld [vmem:[%s4027_s23 + $0x160] sm:$0xf]  ;;  %v3274_v46 = vld [vmem:[%s4027_s23 + $0x164] sm:$0xf0] }
  0xd3   : > { %941 = vmatpush.bf16.msra.mxu1 %v3254_v26  ;;  %v2792_v26 = vor.u32 %v3221_v19, %v2789_v20  ;;  %v3056_v40 = vor.u32 %v3271_v35, %v3053_v36  ;;  %v3273_v47 = vld [vmem:[%s4027_s23 + $0x164] sm:$0xf]  ;;  %v3061_v48 = vld [vmem:[%s4027_s23 + $0x168] sm:$0xf0]  ;;  %v3060_v51 = vor.u32 %v3274_v46, %v3059_v45  ;;  %v3067_v57 = vld [vmem:[%s4027_s23 + $0x170] sm:$0xf] }
  0xd4   : > { %1448 = vmatpush.bf16.msra.mxu2 %v3294_v27  ;;  %v3044_v27 = vor.u32 %v3270_v22, %v3043_v21  ;;  %v3064_v52 = vor.u32 %v3273_v47, %v3061_v48  ;;  %v3276_v58 = vld [vmem:[%s4027_s23 + $0x174] sm:$0xf0]  ;;  %v3275_v59 = vld [vmem:[%s4027_s23 + $0x174] sm:$0xf]  ;;  %v3069_v60 = vld [vmem:[%s4027_s23 + $0x178] sm:$0xf0] }
  0xd5   : > { %1537 = vmatpush.bf16.msra.mxu3 %v3302_v28  ;;  %v3048_v28 = vor.u32 %v3269_v23, %v3045_v24  ;;  %v3068_v63 = vor.u32 %v3276_v58, %v3067_v57  ;;  %v3072_v0 = vor.u32 %v3275_v59, %v3069_v60  ;;  %v3075_v5 = vld [vmem:[%s4027_s23 + $0x180] sm:$0xf]  ;;  %v3278_v6 = vld [vmem:[%s4027_s23 + $0x184] sm:$0xf0]  ;;  %v3277_v7 = vld [vmem:[%s4027_s23 + $0x184] sm:$0xf] }
  0xd6   : > { %853 = vmatpush.bf16.msra.mxu0 %v3245_v29  ;;  %v2795_v29 = vld [vmem:[%s4027_s23 + $0x50] sm:$0xf]  ;;  %v3077_v8 = vld [vmem:[%s4027_s23 + $0x188] sm:$0xf0]  ;;  %v1088_v19 = vld [vmem:[#allocation3 + $0x80] sm:$0xff] }
  0xd7   : > { %942 = vmatpush.bf16.msra.mxu1 %v3253_v30  ;;  %v3224_v30 = vld [vmem:[%s4027_s23 + $0x54] sm:$0xf0]  ;;  %v494_v12 = vld [vmem:[#allocation2 + $0xb0] sm:$0xff]  ;;  %v495_v23 = vld [vmem:[#allocation2] sm:$0xff] }
  0xd8   : > { %1449 = vmatpush.bf16.msra.mxu2 %v3293_v31  ;;  %v3223_v31 = vld [vmem:[%s4027_s23 + $0x54] sm:$0xf]  ;;  %v2796_v37 = vor.u32 %v3224_v30, %v2795_v29  ;;  %v3232_v29 = vld [vmem:[%s4027_s23 + $0x94] sm:$0xf0]  ;;  %v3085_v35 = vld [vmem:[%s4027_s23 + $0x198] sm:$0xf0] }
  0xd9   : > { %1538 = vmatpush.bf16.msra.mxu3 %v3301_v32  ;;  %854 = vmatmul.bf16.vlgmr.msra.gmra.mxu0 %v2756_v41  ;;  %v2797_v32 = vld [vmem:[%s4027_s23 + $0x58] sm:$0xf0]  ;;  %v2803_v41 = vld [vmem:[%s4027_s23 + $0x60] sm:$0xf]  ;;  %v3231_v30 = vld [vmem:[%s4027_s23 + $0x94] sm:$0xf] }
  0xda   : > { %943 = vmatmul.bf16.vlgmr.msra.gmra.mxu1 %v2760_v42  ;;  %v2800_v38 = vor.u32 %v3223_v31, %v2797_v32  ;;  %v3226_v42 = vld [vmem:[%s4027_s23 + $0x64] sm:$0xf0]  ;;  %v2829_v31 = vld [vmem:[%s4027_s23 + $0x98] sm:$0xf0]  ;;  %v3083_v32 = vld [vmem:[%s4027_s23 + $0x190] sm:$0xf] }
  0xdb   : > { %1450 = vmatmul.bf16.vlgmr.msra.gmra.mxu2 %v3012_v43  ;;  %v3225_v43 = vld [vmem:[%s4027_s23 + $0x64] sm:$0xf]  ;;  %v2804_v49 = vor.u32 %v3226_v42, %v2803_v41  ;;  %v3280_v33 = vld [vmem:[%s4027_s23 + $0x194] sm:$0xf0]  ;;  %v3279_v34 = vld [vmem:[%s4027_s23 + $0x194] sm:$0xf] }
  0xdc   : > { %1539 = vmatmul.bf16.vlgmr.msra.gmra.mxu3 %v3016_v44  ;;  %v2805_v44 = vld [vmem:[%s4027_s23 + $0x68] sm:$0xf0]  ;;  %v3084_v45 = vor.u32 %v3280_v33, %v3083_v32  ;;  %v3088_v46 = vor.u32 %v3279_v34, %v3085_v35  ;;  %v2835_v59 = vld [vmem:[%s4027_s23 + $0xa0] sm:$0xf]  ;;  %v3099_v32 = vld [vmem:[%s4027_s23 + $0x1b0] sm:$0xf] }
  0xdd   : > { %v2808_v50 = vor.u32 %v3225_v43, %v2805_v44  ;;  %v496_v43 = vld [vmem:[#allocation2 + $0xd8] sm:$0xff]  ;;  %v3283_v34 = vld [vmem:[%s4027_s23 + $0x1b4] sm:$0xf] }
  0xde   : > { %v3284_v33 = vld [vmem:[%s4027_s23 + $0x1b4] sm:$0xf0]  ;;  %v3101_v35 = vld [vmem:[%s4027_s23 + $0x1b8] sm:$0xf0] }
  0xe9   : > { %859 = vmatmul.bf16.gmra.mxu0 %v2764_v53  ;;  %v2811_v53 = vld [vmem:[%s4027_s23 + $0x70] sm:$0xf] }
  0xea   : > { %948 = vmatmul.bf16.gmra.mxu1 %v2768_v54  ;;  %v3228_v54 = vld [vmem:[%s4027_s23 + $0x74] sm:$0xf0] }
  0xeb   : > { %1455 = vmatmul.bf16.gmra.mxu2 %v3020_v55  ;;  %v3227_v55 = vld [vmem:[%s4027_s23 + $0x74] sm:$0xf]  ;;  %v2812_v61 = vor.u32 %v3228_v54, %v2811_v53 }
  0xec   : > { %1544 = vmatmul.bf16.gmra.mxu3 %v3024_v56  ;;  %v2813_v56 = vld [vmem:[%s4027_s23 + $0x78] sm:$0xf0] }
  0xed   : > { %v2816_v62 = vor.u32 %v3227_v55, %v2813_v56  ;;  %v497_v55 = vld [vmem:[#allocation2 + $0x18] sm:$0xff] }
  0xf9   : > { %864 = vmatmul.bf16.gmra.mxu0 %v2772_v1  ;;  %v2819_v1 = vld [vmem:[%s4027_s23 + $0x80] sm:$0xf] }
  0xfa   : > { %953 = vmatmul.bf16.gmra.mxu1 %v2776_v2  ;;  %v3230_v2 = vld [vmem:[%s4027_s23 + $0x84] sm:$0xf0] }
  0xfb   : > { %1460 = vmatmul.bf16.gmra.mxu2 %v3028_v3  ;;  %v3229_v3 = vld [vmem:[%s4027_s23 + $0x84] sm:$0xf]  ;;  %v2820_v9 = vor.u32 %v3230_v2, %v2819_v1  ;;  %v3282_v1 = vld [vmem:[%s4027_s23 + $0x1a4] sm:$0xf0] }
  0xfc   : > { %1549 = vmatmul.bf16.gmra.mxu3 %v3032_v4  ;;  %v2821_v4 = vld [vmem:[%s4027_s23 + $0x88] sm:$0xf0]  ;;  %v3281_v2 = vld [vmem:[%s4027_s23 + $0x1a4] sm:$0xf] }
  0xfd   : > { %v2824_v10 = vor.u32 %v3229_v3, %v2821_v4  ;;  %v3093_v3 = vld [vmem:[%s4027_s23 + $0x1a8] sm:$0xf0] }
 0x109   : > { %869 = vmatmul.bf16.gmra.mxu0 %v2780_v13 }
 0x10a   : > { %958 = vmatmul.bf16.gmra.mxu1 %v2784_v14  ;;  %v3076_v14 = vor.u32 %v3278_v6, %v3075_v5  ;;  %v1091_v5 = vld [vmem:[#allocation3 + $0x78] sm:$0xff] }
 0x10b   : > { %1465 = vmatmul.bf16.gmra.mxu2 %v3036_v15  ;;  %v3080_v15 = vor.u32 %v3277_v7, %v3077_v8 }
 0x10c   : > { %1554 = vmatmul.bf16.gmra.mxu3 %v3040_v16 }
 0x119   : > { %874 = vmatmul.bf16.gmra.mxu0 %v2788_v25 }
 0x11a   : > { %963 = vmatmul.bf16.gmra.mxu1 %v2792_v26 }
 0x11b   : > { %1470 = vmatmul.bf16.gmra.mxu2 %v3044_v27  ;;  %v2827_v27 = vld [vmem:[%s4027_s23 + $0x90] sm:$0xf] }
 0x11c   : > { %1559 = vmatmul.bf16.gmra.mxu3 %v3048_v28 }
 0x129   : > { %879 = vmatmul.bf16.gmra.mxu0 %v2796_v37  ;;  %v1089_v37 = vld [vmem:[#allocation3 + $0xc8] sm:$0xff] }
 0x12a   : > { %968 = vmatmul.bf16.gmra.mxu1 %v2800_v38 }
 0x12b   : > { %1475 = vmatmul.bf16.gmra.mxu2 %v3052_v39  ;;  %v2828_v39 = vor.u32 %v3232_v29, %v2827_v27  ;;  %v2843_v27 = vld [vmem:[%s4027_s23 + $0xb0] sm:$0xf]  ;;  %v3236_v29 = vld [vmem:[%s4027_s23 + $0xb4] sm:$0xf0] }
 0x12c   : > { %1564 = vmatmul.bf16.gmra.mxu3 %v3056_v40  ;;  %v2832_v40 = vor.u32 %v3231_v30, %v2829_v31  ;;  %v3235_v30 = vld [vmem:[%s4027_s23 + $0xb4] sm:$0xf]  ;;  %v2845_v31 = vld [vmem:[%s4027_s23 + $0xb8] sm:$0xf0] }
 0x139   : > { %884 = vmatmul.bf16.gmra.mxu0 %v2804_v49 }
 0x13a   : > { %973 = vmatmul.bf16.gmra.mxu1 %v2808_v50 }
 0x13b   : > { %1480 = vmatmul.bf16.gmra.mxu2 %v3060_v51  ;;  %v1090_v51 = vld [vmem:[#allocation3 + $0xe8] sm:$0xff] }
 0x13c   : > { %1569 = vmatmul.bf16.gmra.mxu3 %v3064_v52 }
 0x149   : > { %889 = vmatmul.bf16.gmra.mxu0 %v2812_v61  ;;  %v3234_v61 = vld [vmem:[%s4027_s23 + $0xa4] sm:$0xf0] }
 0x14a   : > { %978 = vmatmul.bf16.gmra.mxu1 %v2816_v62  ;;  %v3233_v62 = vld [vmem:[%s4027_s23 + $0xa4] sm:$0xf]  ;;  %v2836_v7 = vor.u32 %v3234_v61, %v2835_v59  ;;  %v2851_v59 = vld [vmem:[%s4027_s23 + $0xc0] sm:$0xf]  ;;  %v3238_v61 = vld [vmem:[%s4027_s23 + $0xc4] sm:$0xf0] }
 0x14b   : > { %1485 = vmatmul.bf16.gmra.mxu2 %v3068_v63  ;;  %v2837_v63 = vld [vmem:[%s4027_s23 + $0xa8] sm:$0xf0] }
 0x14c   : > { %1574 = vmatmul.bf16.gmra.mxu3 %v3072_v0  ;;  %v3091_v0 = vld [vmem:[%s4027_s23 + $0x1a0] sm:$0xf]  ;;  %v2840_v8 = vor.u32 %v3233_v62, %v2837_v63  ;;  %v3237_v62 = vld [vmem:[%s4027_s23 + $0xc4] sm:$0xf]  ;;  %v2853_v63 = vld [vmem:[%s4027_s23 + $0xc8] sm:$0xf0] }
 0x156   : > { %v855_v11 = vpop.f32.mrf.mxu0 }
 0x157   : > { %v944_v13 = vpop.f32.mrf.mxu1 }
 0x158   : > { %v945_v16 = vadd.f32 %v944_v13, %v855_v11  ;;  %v498_v11 = vld [vmem:[#allocation2 + $0x50] sm:$0xff]  ;;  %v3092_v13 = vor.u32 %v3282_v1, %v3091_v0  ;;  %v3107_v0 = vld [vmem:[%s4027_s23 + $0x1c0] sm:$0xf]  ;;  %v3286_v1 = vld [vmem:[%s4027_s23 + $0x1c4] sm:$0xf0] }
 0x159   : > { %894 = vmatmul.bf16.gmra.mxu0 %v2820_v9 }
 0x15a   : > { %v1024_v17 = vadd.f32 %v945_v16, %v494_v12  ;;  %983 = vmatmul.bf16.gmra.mxu1 %v2824_v10 }
 0x15b   : > { %1490 = vmatmul.bf16.gmra.mxu2 %v3076_v14  ;;  %v3096_v14 = vor.u32 %v3281_v2, %v3093_v3  ;;  %v3285_v2 = vld [vmem:[%s4027_s23 + $0x1c4] sm:$0xf]  ;;  %v3109_v3 = vld [vmem:[%s4027_s23 + $0x1c8] sm:$0xf0] }
 0x15c   : > { %1579 = vmatmul.bf16.gmra.mxu3 %v3080_v15  ;;  %1056 = vst [vmem:[#allocation2 + $0xb0] sm:$0xff] %v1024_v17 }
 0x15e   : > { %v1451_v18 = vpop.f32.mrf.mxu2  ;;  %v857_v22 = vpop.f32.mrf.mxu0 }
 0x15f   : > { %v1540_v20 = vpop.f32.mrf.mxu3  ;;  %v946_v24 = vpop.f32.mrf.mxu1 }
 0x160   : > { %v1541_v21 = vadd.f32 %v1540_v20, %v1451_v18  ;;  %v947_v25 = vadd.f32 %v946_v24, %v857_v22 }
 0x162   : > { %v1620_v26 = vadd.f32 %v1541_v21, %v1088_v19  ;;  %v1025_v28 = vadd.f32 %v947_v25, %v495_v23  ;;  %v1092_v19 = vld [vmem:[#allocation3 + $0x8] sm:$0xff] }
 0x163   : > { %v499_v23 = vld [vmem:[#allocation2 + $0x68] sm:$0xff] }
 0x164   : > { %1652 = vst [vmem:[#allocation3 + $0x80] sm:$0xff] %v1620_v26 }
 0x165   : > { %1057 = vst [vmem:[#allocation2] sm:$0xff] %v1025_v28 }
 0x166   : > { %v1453_v36 = vpop.f32.mrf.mxu2  ;;  %v860_v42 = vpop.f32.mrf.mxu0 }
 0x167   : > { %v1542_v38 = vpop.f32.mrf.mxu3  ;;  %v949_v44 = vpop.f32.mrf.mxu1 }
 0x168   : > { %v1543_v41 = vadd.f32 %v1542_v38, %v1453_v36  ;;  %v950_v47 = vadd.f32 %v949_v44, %v860_v42 }
 0x169   : > { %899 = vmatmul.bf16.gmra.mxu0 %v2828_v39  ;;  %v2844_v39 = vor.u32 %v3236_v29, %v2843_v27  ;;  %v2859_v27 = vld [vmem:[%s4027_s23 + $0xd0] sm:$0xf]  ;;  %v3240_v29 = vld [vmem:[%s4027_s23 + $0xd4] sm:$0xf0] }
 0x16a   : > { %v1621_v48 = vadd.f32 %v1543_v41, %v1089_v37  ;;  %v1026_v49 = vadd.f32 %v950_v47, %v496_v43  ;;  %988 = vmatmul.bf16.gmra.mxu1 %v2832_v40  ;;  %v1093_v37 = vld [vmem:[#allocation3 + $0x90] sm:$0xff]  ;;  %v2848_v40 = vor.u32 %v3235_v30, %v2845_v31  ;;  %v2861_v31 = vld [vmem:[%s4027_s23 + $0xd8] sm:$0xf0] }
 0x16b   : > { %1495 = vmatmul.bf16.gmra.mxu2 %v3084_v45  ;;  %v500_v43 = vld [vmem:[#allocation2 + $0x30] sm:$0xff]  ;;  %v3100_v45 = vor.u32 %v3284_v33, %v3099_v32  ;;  %v3288_v33 = vld [vmem:[%s4027_s23 + $0x1d4] sm:$0xf0] }
 0x16c   : > { %1653 = vst [vmem:[#allocation3 + $0xc8] sm:$0xff] %v1621_v48  ;;  %1584 = vmatmul.bf16.gmra.mxu3 %v3088_v46  ;;  %v3104_v46 = vor.u32 %v3283_v34, %v3101_v35  ;;  %v3239_v30 = vld [vmem:[%s4027_s23 + $0xd4] sm:$0xf]  ;;  %v3115_v32 = vld [vmem:[%s4027_s23 + $0x1d0] sm:$0xf] }
 0x16d   : > { %1058 = vst [vmem:[#allocation2 + $0xd8] sm:$0xff] %v1026_v49  ;;  %v3287_v34 = vld [vmem:[%s4027_s23 + $0x1d4] sm:$0xf]  ;;  %v3117_v35 = vld [vmem:[%s4027_s23 + $0x1d8] sm:$0xf0] }
 0x16e   : > { %v1456_v50 = vpop.f32.mrf.mxu2  ;;  %v862_v54 = vpop.f32.mrf.mxu0 }
 0x16f   : > { %v1545_v52 = vpop.f32.mrf.mxu3  ;;  %v951_v56 = vpop.f32.mrf.mxu1 }
 0x170   : > { %v1546_v53 = vadd.f32 %v1545_v52, %v1456_v50  ;;  %v952_v57 = vadd.f32 %v951_v56, %v862_v54 }
 0x172   : > { %v1622_v58 = vadd.f32 %v1546_v53, %v1090_v51  ;;  %v1027_v60 = vadd.f32 %v952_v57, %v497_v55  ;;  %v1094_v51 = vld [vmem:[#allocation3 + $0x58] sm:$0xff]  ;;  %v501_v55 = vld [vmem:[#allocation2 + $0x48] sm:$0xff] }
 0x174   : > { %1654 = vst [vmem:[#allocation3 + $0xe8] sm:$0xff] %v1622_v58 }
 0x175   : > { %1059 = vst [vmem:[#allocation2 + $0x18] sm:$0xff] %v1027_v60 }
 0x176   : > { %v1458_v4 = vpop.f32.mrf.mxu2  ;;  %v865_v10 = vpop.f32.mrf.mxu0 }
 0x177   : > { %v1547_v6 = vpop.f32.mrf.mxu3  ;;  %v954_v12 = vpop.f32.mrf.mxu1 }
 0x178   : > { %v1548_v9 = vadd.f32 %v1547_v6, %v1458_v4  ;;  %v955_v15 = vadd.f32 %v954_v12, %v865_v10 }
 0x179   : > { %904 = vmatmul.bf16.gmra.mxu0 %v2836_v7  ;;  %v2852_v7 = vor.u32 %v3238_v61, %v2851_v59  ;;  %v2867_v59 = vld [vmem:[%s4027_s23 + $0xe0] sm:$0xf]  ;;  %v3242_v61 = vld [vmem:[%s4027_s23 + $0xe4] sm:$0xf0] }
 0x17a   : > { %v1623_v16 = vadd.f32 %v1548_v9, %v1091_v5  ;;  %v1028_v17 = vadd.f32 %v955_v15, %v498_v11  ;;  %993 = vmatmul.bf16.gmra.mxu1 %v2840_v8  ;;  %v1095_v5 = vld [vmem:[#allocation3 + $0xa8] sm:$0xff]  ;;  %v2856_v8 = vor.u32 %v3237_v62, %v2853_v63  ;;  %v502_v11 = vld [vmem:[#allocation2 + $0x80] sm:$0xff] }
 0x17b   : > { %1500 = vmatmul.bf16.gmra.mxu2 %v3092_v13  ;;  %v3108_v13 = vor.u32 %v3286_v1, %v3107_v0  ;;  %v3241_v62 = vld [vmem:[%s4027_s23 + $0xe4] sm:$0xf]  ;;  %v2869_v63 = vld [vmem:[%s4027_s23 + $0xe8] sm:$0xf0]  ;;  %v3123_v0 = vld [vmem:[%s4027_s23 + $0x1e0] sm:$0xf] }
 0x17c   : > { %1655 = vst [vmem:[#allocation3 + $0x78] sm:$0xff] %v1623_v16  ;;  %1589 = vmatmul.bf16.gmra.mxu3 %v3096_v14  ;;  %v3112_v14 = vor.u32 %v3285_v2, %v3109_v3  ;;  %v3290_v1 = vld [vmem:[%s4027_s23 + $0x1e4] sm:$0xf0]  ;;  %v3289_v2 = vld [vmem:[%s4027_s23 + $0x1e4] sm:$0xf] }
 0x17d   : > { %1060 = vst [vmem:[#allocation2 + $0x50] sm:$0xff] %v1028_v17  ;;  %v3125_v3 = vld [vmem:[%s4027_s23 + $0x1e8] sm:$0xf0] }
 0x17e   : > { %v1461_v18 = vpop.f32.mrf.mxu2  ;;  %v867_v22 = vpop.f32.mrf.mxu0 }
 0x17f   : > { %v1550_v20 = vpop.f32.mrf.mxu3  ;;  %v956_v24 = vpop.f32.mrf.mxu1 }
 0x180   : > { %v1551_v21 = vadd.f32 %v1550_v20, %v1461_v18  ;;  %v957_v25 = vadd.f32 %v956_v24, %v867_v22 }
 0x182   : > { %v1624_v26 = vadd.f32 %v1551_v21, %v1092_v19  ;;  %v1029_v28 = vadd.f32 %v957_v25, %v499_v23  ;;  %v1096_v19 = vld [vmem:[#allocation3 + $0xd0] sm:$0xff]  ;;  %v503_v23 = vld [vmem:[#allocation2 + $0x88] sm:$0xff] }
 0x184   : > { %1656 = vst [vmem:[#allocation3 + $0x8] sm:$0xff] %v1624_v26 }
 0x185   : > { %1061 = vst [vmem:[#allocation2 + $0x68] sm:$0xff] %v1029_v28 }
 0x186   : > { %v1463_v36 = vpop.f32.mrf.mxu2  ;;  %v870_v42 = vpop.f32.mrf.mxu0 }
 0x187   : > { %v1552_v38 = vpop.f32.mrf.mxu3  ;;  %v959_v44 = vpop.f32.mrf.mxu1 }
 0x188   : > { %v1553_v41 = vadd.f32 %v1552_v38, %v1463_v36  ;;  %v960_v47 = vadd.f32 %v959_v44, %v870_v42 }
 0x189   : > { %909 = vmatmul.bf16.gmra.mxu0 %v2844_v39  ;;  %v2860_v39 = vor.u32 %v3240_v29, %v2859_v27  ;;  %v2875_v27 = vld [vmem:[%s4027_s23 + $0xf0] sm:$0xf]  ;;  %v3244_v29 = vld [vmem:[%s4027_s23 + $0xf4] sm:$0xf0] }
 0x18a   : > { %v1625_v48 = vadd.f32 %v1553_v41, %v1093_v37  ;;  %v1030_v49 = vadd.f32 %v960_v47, %v500_v43  ;;  %998 = vmatmul.bf16.gmra.mxu1 %v2848_v40  ;;  %v1097_v37 = vld [vmem:[#allocation3 + $0xb0] sm:$0xff]  ;;  %v2864_v40 = vor.u32 %v3239_v30, %v2861_v31  ;;  %v504_v43 = vld [vmem:[#allocation2 + $0xe8] sm:$0xff]  ;;  %v2877_v31 = vld [vmem:[%s4027_s23 + $0xf8] sm:$0xf0] }
 0x18b   : > { %1505 = vmatmul.bf16.gmra.mxu2 %v3100_v45  ;;  %v3116_v45 = vor.u32 %v3288_v33, %v3115_v32  ;;  %v3243_v30 = vld [vmem:[%s4027_s23 + $0xf4] sm:$0xf]  ;;  %v3131_v32 = vld [vmem:[%s4027_s23 + $0x1f0] sm:$0xf]  ;;  %v3292_v33 = vld [vmem:[%s4027_s23 + $0x1f4] sm:$0xf0] }
 0x18c   : > { %1657 = vst [vmem:[#allocation3 + $0x90] sm:$0xff] %v1625_v48  ;;  %1594 = vmatmul.bf16.gmra.mxu3 %v3104_v46  ;;  %v3120_v46 = vor.u32 %v3287_v34, %v3117_v35  ;;  %v3291_v34 = vld [vmem:[%s4027_s23 + $0x1f4] sm:$0xf]  ;;  %v3133_v35 = vld [vmem:[%s4027_s23 + $0x1f8] sm:$0xf0] }
 0x18d   : > { %1062 = vst [vmem:[#allocation2 + $0x30] sm:$0xff] %v1030_v49 }
 0x18e   : > { %v1466_v50 = vpop.f32.mrf.mxu2  ;;  %v872_v54 = vpop.f32.mrf.mxu0 }
 0x18f   : > { %v1555_v52 = vpop.f32.mrf.mxu3  ;;  %v961_v56 = vpop.f32.mrf.mxu1 }
 0x190   : > { %v1556_v53 = vadd.f32 %v1555_v52, %v1466_v50  ;;  %v962_v57 = vadd.f32 %v961_v56, %v872_v54 }
 0x192   : > { %v1626_v58 = vadd.f32 %v1556_v53, %v1094_v51  ;;  %v1031_v60 = vadd.f32 %v962_v57, %v501_v55  ;;  %v1098_v51 = vld [vmem:[#allocation3 + $0x38] sm:$0xff] }
 0x193   : > { %v505_v55 = vld [vmem:[#allocation2 + $0xb8] sm:$0xff] }
 0x194   : > { %1658 = vst [vmem:[#allocation3 + $0x58] sm:$0xff] %v1626_v58 }
 0x195   : > { %1063 = vst [vmem:[#allocation2 + $0x48] sm:$0xff] %v1031_v60 }
 0x196   : > { %v1468_v4 = vpop.f32.mrf.mxu2  ;;  %v875_v10 = vpop.f32.mrf.mxu0 }
 0x197   : > { %v1557_v6 = vpop.f32.mrf.mxu3  ;;  %v964_v12 = vpop.f32.mrf.mxu1 }
 0x198   : > { %v1558_v9 = vadd.f32 %v1557_v6, %v1468_v4  ;;  %v965_v15 = vadd.f32 %v964_v12, %v875_v10 }
 0x199   : > { %914 = vmatmul.bf16.gmra.mxu0 %v2852_v7  ;;  %v2868_v7 = vor.u32 %v3242_v61, %v2867_v59  ;;  %v1103_v61 = vld [vmem:[#allocation3 + $0x68] sm:$0xff] }
 0x19a   : > { %v1627_v16 = vadd.f32 %v1558_v9, %v1095_v5  ;;  %v1032_v17 = vadd.f32 %v965_v15, %v502_v11  ;;  %1003 = vmatmul.bf16.gmra.mxu1 %v2856_v8  ;;  %v1099_v5 = vld [vmem:[#allocation3 + $0x40] sm:$0xff]  ;;  %v2872_v8 = vor.u32 %v3241_v62, %v2869_v63 }
 0x19b   : > { %1510 = vmatmul.bf16.gmra.mxu2 %v3108_v13  ;;  %v506_v11 = vld [vmem:[#allocation2 + $0x60] sm:$0xff]  ;;  %v3124_v13 = vor.u32 %v3290_v1, %v3123_v0  ;;  %v510_v1 = vld [vmem:[#allocation2 + $0x38] sm:$0xff] }
 0x19c   : > { %1659 = vst [vmem:[#allocation3 + $0xa8] sm:$0xff] %v1627_v16  ;;  %1599 = vmatmul.bf16.gmra.mxu3 %v3112_v14  ;;  %v3128_v14 = vor.u32 %v3289_v2, %v3125_v3 }
 0x19d   : > { %1064 = vst [vmem:[#allocation2 + $0x80] sm:$0xff] %v1032_v17 }
 0x19e   : > { %v1471_v18 = vpop.f32.mrf.mxu2  ;;  %v877_v22 = vpop.f32.mrf.mxu0 }
 0x19f   : > { %v1560_v20 = vpop.f32.mrf.mxu3  ;;  %v966_v24 = vpop.f32.mrf.mxu1 }
 0x1a0   : > { %v1561_v21 = vadd.f32 %v1560_v20, %v1471_v18  ;;  %v967_v25 = vadd.f32 %v966_v24, %v877_v22 }
 0x1a2   : > { %v1628_v26 = vadd.f32 %v1561_v21, %v1096_v19  ;;  %v1033_v28 = vadd.f32 %v967_v25, %v503_v23  ;;  %v1100_v19 = vld [vmem:[#allocation3 + $0xe0] sm:$0xff]  ;;  %v507_v23 = vld [vmem:[#allocation2 + $0xf0] sm:$0xff] }
 0x1a4   : > { %1660 = vst [vmem:[#allocation3 + $0xd0] sm:$0xff] %v1628_v26 }
 0x1a5   : > { %1065 = vst [vmem:[#allocation2 + $0x88] sm:$0xff] %v1033_v28 }
 0x1a6   : > { %v1473_v36 = vpop.f32.mrf.mxu2  ;;  %v880_v42 = vpop.f32.mrf.mxu0 }
 0x1a7   : > { %v1562_v38 = vpop.f32.mrf.mxu3  ;;  %v969_v44 = vpop.f32.mrf.mxu1 }
 0x1a8   : > { %v1563_v41 = vadd.f32 %v1562_v38, %v1473_v36  ;;  %v970_v47 = vadd.f32 %v969_v44, %v880_v42 }
 0x1a9   : > { %919 = vmatmul.bf16.gmra.mxu0 %v2860_v39  ;;  %v2876_v39 = vor.u32 %v3244_v29, %v2875_v27  ;;  %v1106_v27 = vld [vmem:[#allocation3 + $0x50] sm:$0xff] }
 0x1aa   : > { %v1629_v48 = vadd.f32 %v1563_v41, %v1097_v37  ;;  %v1034_v49 = vadd.f32 %v970_v47, %v504_v43  ;;  %1008 = vmatmul.bf16.gmra.mxu1 %v2864_v40  ;;  %v1101_v37 = vld [vmem:[#allocation3 + $0x60] sm:$0xff]  ;;  %v2880_v40 = vor.u32 %v3243_v30, %v2877_v31  ;;  %v508_v43 = vld [vmem:[#allocation2 + $0x8] sm:$0xff] }
 0x1ab   : > { %1515 = vmatmul.bf16.gmra.mxu2 %v3116_v45  ;;  %v3132_v45 = vor.u32 %v3292_v33, %v3131_v32  ;;  %v513_v31 = vld [vmem:[#allocation2 + $0xc8] sm:$0xff] }
 0x1ac   : > { %1661 = vst [vmem:[#allocation3 + $0xb0] sm:$0xff] %v1629_v48  ;;  %1604 = vmatmul.bf16.gmra.mxu3 %v3120_v46  ;;  %v3136_v46 = vor.u32 %v3291_v34, %v3133_v35 }
 0x1ad   : > { %1066 = vst [vmem:[#allocation2 + $0xe8] sm:$0xff] %v1034_v49 }
 0x1ae   : > { %v1476_v50 = vpop.f32.mrf.mxu2  ;;  %v882_v54 = vpop.f32.mrf.mxu0 }
 0x1af   : > { %v1565_v52 = vpop.f32.mrf.mxu3  ;;  %v971_v56 = vpop.f32.mrf.mxu1 }
 0x1b0   : > { %v1566_v53 = vadd.f32 %v1565_v52, %v1476_v50  ;;  %v972_v57 = vadd.f32 %v971_v56, %v882_v54 }
 0x1b2   : > { %v1630_v58 = vadd.f32 %v1566_v53, %v1098_v51  ;;  %v1035_v60 = vadd.f32 %v972_v57, %v505_v55  ;;  %v1102_v51 = vld [vmem:[#allocation3 + $0x18] sm:$0xff] }
 0x1b3   : > { %v509_v55 = vld [vmem:[#allocation2 + $0x78] sm:$0xff] }
 0x1b4   : > { %1662 = vst [vmem:[#allocation3 + $0x38] sm:$0xff] %v1630_v58 }
 0x1b5   : > { %1067 = vst [vmem:[#allocation2 + $0xb8] sm:$0xff] %v1035_v60 }
 0x1b6   : > { %v1478_v4 = vpop.f32.mrf.mxu2  ;;  %v885_v10 = vpop.f32.mrf.mxu0 }
 0x1b7   : > { %v1567_v6 = vpop.f32.mrf.mxu3  ;;  %v974_v12 = vpop.f32.mrf.mxu1 }
 0x1b8   : > { %v1568_v9 = vadd.f32 %v1567_v6, %v1478_v4  ;;  %v975_v15 = vadd.f32 %v974_v12, %v885_v10 }
 0x1b9   : > { %924 = vmatmul.bf16.gmra.mxu0 %v2868_v7  ;;  %v1104_v7 = vld [vmem:[#allocation3 + $0x10] sm:$0xff] }
 0x1ba   : > { %v1631_v16 = vadd.f32 %v1568_v9, %v1099_v5  ;;  %v1036_v17 = vadd.f32 %v975_v15, %v506_v11  ;;  %1013 = vmatmul.bf16.gmra.mxu1 %v2872_v8  ;;  %v511_v11 = vld [vmem:[#allocation2 + $0x58] sm:$0xff] }
 0x1bb   : > { %1520 = vmatmul.bf16.gmra.mxu2 %v3124_v13 }
 0x1bc   : > { %1663 = vst [vmem:[#allocation3 + $0x40] sm:$0xff] %v1631_v16  ;;  %1609 = vmatmul.bf16.gmra.mxu3 %v3128_v14 }
 0x1bd   : > { %1068 = vst [vmem:[#allocation2 + $0x60] sm:$0xff] %v1036_v17  ;;  %v1105_v17 = vld [vmem:[#allocation3 + $0x70] sm:$0xff] }
 0x1be   : > { %v1481_v18 = vpop.f32.mrf.mxu2  ;;  %v887_v22 = vpop.f32.mrf.mxu0 }
 0x1bf   : > { %v1570_v20 = vpop.f32.mrf.mxu3  ;;  %v976_v24 = vpop.f32.mrf.mxu1 }
 0x1c0   : > { %v1571_v21 = vadd.f32 %v1570_v20, %v1481_v18  ;;  %v977_v25 = vadd.f32 %v976_v24, %v887_v22 }
 0x1c2   : > { %v1632_v26 = vadd.f32 %v1571_v21, %v1100_v19  ;;  %v1037_v28 = vadd.f32 %v977_v25, %v507_v23  ;;  %v512_v21 = vld [vmem:[#allocation2 + $0x40] sm:$0xff] }
 0x1c4   : > { %1664 = vst [vmem:[#allocation3 + $0xe0] sm:$0xff] %v1632_v26 }
 0x1c5   : > { %1069 = vst [vmem:[#allocation2 + $0xf0] sm:$0xff] %v1037_v28 }
 0x1c6   : > { %v1483_v36 = vpop.f32.mrf.mxu2  ;;  %v890_v42 = vpop.f32.mrf.mxu0 }
 0x1c7   : > { %v1572_v38 = vpop.f32.mrf.mxu3  ;;  %v979_v44 = vpop.f32.mrf.mxu1 }
 0x1c8   : > { %v1573_v41 = vadd.f32 %v1572_v38, %v1483_v36  ;;  %v980_v47 = vadd.f32 %v979_v44, %v890_v42 }
 0x1c9   : > { %929 = vmatmul.bf16.gmra.mxu0 %v2876_v39 }
 0x1ca   : > { %v1633_v48 = vadd.f32 %v1573_v41, %v1101_v37  ;;  %v1038_v49 = vadd.f32 %v980_v47, %v508_v43  ;;  %1018 = vmatmul.bf16.gmra.mxu1 %v2880_v40  ;;  %v1107_v37 = vld [vmem:[#allocation3 + $0xa0] sm:$0xff]  ;;  %v1108_v47 = vld [vmem:[#allocation3 + $0xd8] sm:$0xff] }
 0x1cb   : > { %1525 = vmatmul.bf16.gmra.mxu2 %v3132_v45  ;;  %v514_v41 = vld [vmem:[#allocation2 + $0xe0] sm:$0xff] }
 0x1cc   : > { %1665 = vst [vmem:[#allocation3 + $0x60] sm:$0xff] %v1633_v48  ;;  %1614 = vmatmul.bf16.gmra.mxu3 %v3136_v46 }
 0x1cd   : > { %1070 = vst [vmem:[#allocation2 + $0x8] sm:$0xff] %v1038_v49 }
 0x1ce   : > { %v1486_v50 = vpop.f32.mrf.mxu2  ;;  %v892_v54 = vpop.f32.mrf.mxu0 }
 0x1cf   : > { %v1575_v52 = vpop.f32.mrf.mxu3  ;;  %v981_v56 = vpop.f32.mrf.mxu1 }
 0x1d0   : > { %v1576_v53 = vadd.f32 %v1575_v52, %v1486_v50  ;;  %v982_v57 = vadd.f32 %v981_v56, %v892_v54 }
 0x1d2   : > { %v1634_v58 = vadd.f32 %v1576_v53, %v1102_v51  ;;  %v1039_v59 = vadd.f32 %v982_v57, %v509_v55  ;;  %v515_v51 = vld [vmem:[#allocation2 + $0x90] sm:$0xff] }
 0x1d3   : > { %v1109_v57 = vld [vmem:[#allocation3 + $0x30] sm:$0xff] }
 0x1d4   : > { %1666 = vst [vmem:[#allocation3 + $0x18] sm:$0xff] %v1634_v58 }
 0x1d5   : > { %1071 = vst [vmem:[#allocation2 + $0x78] sm:$0xff] %v1039_v59 }
 0x1d6   : > { %v1488_v60 = vpop.f32.mrf.mxu2  ;;  %v895_v0 = vpop.f32.mrf.mxu0 }
 0x1d7   : > { %v1577_v62 = vpop.f32.mrf.mxu3  ;;  %v984_v2 = vpop.f32.mrf.mxu1 }
 0x1d8   : > { %v1578_v63 = vadd.f32 %v1577_v62, %v1488_v60  ;;  %v985_v3 = vadd.f32 %v984_v2, %v895_v0 }
 0x1da   : > { %v1635_v4 = vadd.f32 %v1578_v63, %v1103_v61  ;;  %v1040_v5 = vadd.f32 %v985_v3, %v510_v1  ;;  %v516_v61 = vld [vmem:[#allocation2 + $0x70] sm:$0xff]  ;;  %v1110_v3 = vld [vmem:[#allocation3 + $0x20] sm:$0xff] }
 0x1dc   : > { %1667 = vst [vmem:[#allocation3 + $0x68] sm:$0xff] %v1635_v4 }
 0x1dd   : > { %1072 = vst [vmem:[#allocation2 + $0x38] sm:$0xff] %v1040_v5 }
 0x1de   : > { %v1491_v6 = vpop.f32.mrf.mxu2  ;;  %v897_v10 = vpop.f32.mrf.mxu0 }
 0x1df   : > { %v1580_v8 = vpop.f32.mrf.mxu3  ;;  %v986_v12 = vpop.f32.mrf.mxu1 }
 0x1e0   : > { %v1581_v9 = vadd.f32 %v1580_v8, %v1491_v6  ;;  %v987_v13 = vadd.f32 %v986_v12, %v897_v10 }
 0x1e2   : > { %v1636_v14 = vadd.f32 %v1581_v9, %v1104_v7  ;;  %v1041_v15 = vadd.f32 %v987_v13, %v511_v11  ;;  %v517_v7 = vld [vmem:[#allocation2 + $0xc0] sm:$0xff]  ;;  %v1111_v13 = vld [vmem:[#allocation3 + $0xf0] sm:$0xff] }
 0x1e4   : > { %1668 = vst [vmem:[#allocation3 + $0x10] sm:$0xff] %v1636_v14 }
 0x1e5   : > { %1073 = vst [vmem:[#allocation2 + $0x58] sm:$0xff] %v1041_v15 }
 0x1e6   : > { %v1493_v16 = vpop.f32.mrf.mxu2  ;;  %v900_v20 = vpop.f32.mrf.mxu0 }
 0x1e7   : > { %v1582_v18 = vpop.f32.mrf.mxu3  ;;  %v989_v22 = vpop.f32.mrf.mxu1 }
 0x1e8   : > { %v1583_v19 = vadd.f32 %v1582_v18, %v1493_v16  ;;  %v990_v23 = vadd.f32 %v989_v22, %v900_v20 }
 0x1ea   : > { %v1637_v24 = vadd.f32 %v1583_v19, %v1105_v17  ;;  %v1042_v25 = vadd.f32 %v990_v23, %v512_v21  ;;  %v518_v17 = vld [vmem:[#allocation2 + $0xa8] sm:$0xff] }
 0x1eb   : > { %v1112_v23 = vld [vmem:[#allocation3 + $0x88] sm:$0xff] }
 0x1ec   : > { %1669 = vst [vmem:[#allocation3 + $0x70] sm:$0xff] %v1637_v24 }
 0x1ed   : > { %1074 = vst [vmem:[#allocation2 + $0x40] sm:$0xff] %v1042_v25 }
 0x1ee   : > { %v1496_v26 = vpop.f32.mrf.mxu2  ;;  %v902_v30 = vpop.f32.mrf.mxu0 }
 0x1ef   : > { %v1585_v28 = vpop.f32.mrf.mxu3  ;;  %v991_v32 = vpop.f32.mrf.mxu1 }
 0x1f0   : > { %v1586_v29 = vadd.f32 %v1585_v28, %v1496_v26  ;;  %v992_v33 = vadd.f32 %v991_v32, %v902_v30 }
 0x1f2   : > { %v1638_v34 = vadd.f32 %v1586_v29, %v1106_v27  ;;  %v1043_v35 = vadd.f32 %v992_v33, %v513_v31  ;;  %v519_v27 = vld [vmem:[#allocation2 + $0xd0] sm:$0xff]  ;;  %v1113_v33 = vld [vmem:[#allocation3 + $0x48] sm:$0xff] }
 0x1f4   : > { %1670 = vst [vmem:[#allocation3 + $0x50] sm:$0xff] %v1638_v34 }
 0x1f5   : > { %1075 = vst [vmem:[#allocation2 + $0xc8] sm:$0xff] %v1043_v35 }
 0x1f6   : > { %v1498_v36 = vpop.f32.mrf.mxu2  ;;  %v905_v40 = vpop.f32.mrf.mxu0 }
 0x1f7   : > { %v1587_v38 = vpop.f32.mrf.mxu3  ;;  %v994_v42 = vpop.f32.mrf.mxu1 }
 0x1f8   : > { %v1588_v39 = vadd.f32 %v1587_v38, %v1498_v36  ;;  %v995_v43 = vadd.f32 %v994_v42, %v905_v40 }
 0x1fa   : > { %v1639_v44 = vadd.f32 %v1588_v39, %v1107_v37  ;;  %v1044_v45 = vadd.f32 %v995_v43, %v514_v41  ;;  %v520_v37 = vld [vmem:[#allocation2 + $0x10] sm:$0xff]  ;;  %v1114_v43 = vld [vmem:[#allocation3 + $0xf8] sm:$0xff] }
 0x1fc   : > { %1671 = vst [vmem:[#allocation3 + $0xa0] sm:$0xff] %v1639_v44 }
 0x1fd   : > { %1076 = vst [vmem:[#allocation2 + $0xe0] sm:$0xff] %v1044_v45 }
 0x1fe   : > { %v1501_v46 = vpop.f32.mrf.mxu2  ;;  %v907_v50 = vpop.f32.mrf.mxu0 }
 0x1ff   : > { %v1590_v48 = vpop.f32.mrf.mxu3  ;;  %v996_v52 = vpop.f32.mrf.mxu1 }
 0x200   : > { %v1591_v49 = vadd.f32 %v1590_v48, %v1501_v46  ;;  %v997_v53 = vadd.f32 %v996_v52, %v907_v50 }
 0x202   : > { %v1640_v54 = vadd.f32 %v1591_v49, %v1108_v47  ;;  %v1045_v55 = vadd.f32 %v997_v53, %v515_v51  ;;  %v521_v47 = vld [vmem:[#allocation2 + $0x28] sm:$0xff]  ;;  %v1115_v53 = vld [vmem:[#allocation3 + $0xc0] sm:$0xff] }
 0x204   : > { %1672 = vst [vmem:[#allocation3 + $0xd8] sm:$0xff] %v1640_v54 }
 0x205   : > { %1077 = vst [vmem:[#allocation2 + $0x90] sm:$0xff] %v1045_v55 }
 0x206   : > { %v1503_v56 = vpop.f32.mrf.mxu2  ;;  %v910_v60 = vpop.f32.mrf.mxu0 }
 0x207   : > { %v1592_v58 = vpop.f32.mrf.mxu3  ;;  %v999_v62 = vpop.f32.mrf.mxu1 }
 0x208   : > { %v1593_v59 = vadd.f32 %v1592_v58, %v1503_v56  ;;  %v1000_v63 = vadd.f32 %v999_v62, %v910_v60 }
 0x20a   : > { %v1641_v0 = vadd.f32 %v1593_v59, %v1109_v57  ;;  %v1046_v1 = vadd.f32 %v1000_v63, %v516_v61  ;;  %v522_v57 = vld [vmem:[#allocation2 + $0xa0] sm:$0xff]  ;;  %v1116_v63 = vld [vmem:[#allocation3 + $0xb8] sm:$0xff] }
 0x20c   : > { %1673 = vst [vmem:[#allocation3 + $0x30] sm:$0xff] %v1641_v0 }
 0x20d   : > { %1078 = vst [vmem:[#allocation2 + $0x70] sm:$0xff] %v1046_v1 }
 0x20e   : > { %v1506_v2 = vpop.f32.mrf.mxu2  ;;  %v912_v6 = vpop.f32.mrf.mxu0 }
 0x20f   : > { %v1595_v4 = vpop.f32.mrf.mxu3  ;;  %v1001_v8 = vpop.f32.mrf.mxu1 }
 0x210   : > { %v1596_v5 = vadd.f32 %v1595_v4, %v1506_v2  ;;  %v1002_v9 = vadd.f32 %v1001_v8, %v912_v6 }
 0x212   : > { %v1642_v10 = vadd.f32 %v1596_v5, %v1110_v3  ;;  %v1047_v11 = vadd.f32 %v1002_v9, %v517_v7  ;;  %v523_v3 = vld [vmem:[#allocation2 + $0xf8] sm:$0xff]  ;;  %v1117_v9 = vld [vmem:[#allocation3] sm:$0xff] }
 0x214   : > { %1674 = vst [vmem:[#allocation3 + $0x20] sm:$0xff] %v1642_v10 }
 0x215   : > { %1079 = vst [vmem:[#allocation2 + $0xc0] sm:$0xff] %v1047_v11 }
 0x216   : > { %v1508_v12 = vpop.f32.mrf.mxu2  ;;  %v915_v16 = vpop.f32.mrf.mxu0 }
 0x217   : > { %v1597_v14 = vpop.f32.mrf.mxu3  ;;  %v1004_v18 = vpop.f32.mrf.mxu1 }
 0x218   : > { %v1598_v15 = vadd.f32 %v1597_v14, %v1508_v12  ;;  %v1005_v19 = vadd.f32 %v1004_v18, %v915_v16 }
 0x21a   : > { %v1643_v20 = vadd.f32 %v1598_v15, %v1111_v13  ;;  %v1048_v21 = vadd.f32 %v1005_v19, %v518_v17  ;;  %v524_v13 = vld [vmem:[#allocation2 + $0x20] sm:$0xff]  ;;  %v1118_v19 = vld [vmem:[#allocation3 + $0x28] sm:$0xff] }
 0x21c   : > { %1675 = vst [vmem:[#allocation3 + $0xf0] sm:$0xff] %v1643_v20 }
 0x21d   : > { %1080 = vst [vmem:[#allocation2 + $0xa8] sm:$0xff] %v1048_v21 }
 0x21e   : > { %v1511_v22 = vpop.f32.mrf.mxu2  ;;  %v917_v26 = vpop.f32.mrf.mxu0 }
 0x21f   : > { %v1600_v24 = vpop.f32.mrf.mxu3  ;;  %v1006_v28 = vpop.f32.mrf.mxu1 }
 0x220   : > { %v1601_v25 = vadd.f32 %v1600_v24, %v1511_v22  ;;  %v1007_v29 = vadd.f32 %v1006_v28, %v917_v26 }
 0x222   : > { %v1644_v30 = vadd.f32 %v1601_v25, %v1112_v23  ;;  %v1049_v31 = vadd.f32 %v1007_v29, %v519_v27  ;;  %v525_v23 = vld [vmem:[#allocation2 + $0x98] sm:$0xff] }
 0x223   : > { %v1119_v29 = vld [vmem:[#allocation3 + $0x98] sm:$0xff] }
 0x224   : > { %1676 = vst [vmem:[#allocation3 + $0x88] sm:$0xff] %v1644_v30 }
 0x225   : > { %1081 = vst [vmem:[#allocation2 + $0xd0] sm:$0xff] %v1049_v31 }
 0x226   : > { %v1513_v32 = vpop.f32.mrf.mxu2  ;;  %v920_v36 = vpop.f32.mrf.mxu0 }
 0x227   : > { %v1602_v34 = vpop.f32.mrf.mxu3  ;;  %v1009_v38 = vpop.f32.mrf.mxu1 }
 0x228   : > { %v1603_v35 = vadd.f32 %v1602_v34, %v1513_v32  ;;  %v1010_v39 = vadd.f32 %v1009_v38, %v920_v36 }
 0x22a   : > { %v1645_v40 = vadd.f32 %v1603_v35, %v1113_v33  ;;  %v1050_v41 = vadd.f32 %v1010_v39, %v520_v37 }
 0x22c   : > { %1677 = vst [vmem:[#allocation3 + $0x48] sm:$0xff] %v1645_v40 }
 0x22d   : > { %1082 = vst [vmem:[#allocation2 + $0x10] sm:$0xff] %v1050_v41 }
 0x22e   : > { %v1516_v42 = vpop.f32.mrf.mxu2  ;;  %v922_v46 = vpop.f32.mrf.mxu0 }
 0x22f   : > { %v1605_v44 = vpop.f32.mrf.mxu3  ;;  %v1011_v48 = vpop.f32.mrf.mxu1 }
 0x230   : > { %v1606_v45 = vadd.f32 %v1605_v44, %v1516_v42  ;;  %v1012_v49 = vadd.f32 %v1011_v48, %v922_v46 }
 0x232   : > { %v1646_v50 = vadd.f32 %v1606_v45, %v1114_v43  ;;  %v1051_v51 = vadd.f32 %v1012_v49, %v521_v47 }
 0x234   : > { %1678 = vst [vmem:[#allocation3 + $0xf8] sm:$0xff] %v1646_v50 }
 0x235   : > { %1083 = vst [vmem:[#allocation2 + $0x28] sm:$0xff] %v1051_v51 }
 0x236   : > { %v1518_v52 = vpop.f32.mrf.mxu2  ;;  %v925_v56 = vpop.f32.mrf.mxu0 }
 0x237   : > { %v1607_v54 = vpop.f32.mrf.mxu3  ;;  %v1014_v58 = vpop.f32.mrf.mxu1 }
 0x238   : > { %v1608_v55 = vadd.f32 %v1607_v54, %v1518_v52  ;;  %v1015_v59 = vadd.f32 %v1014_v58, %v925_v56 }
 0x23a   : > { %v1647_v60 = vadd.f32 %v1608_v55, %v1115_v53  ;;  %v1052_v61 = vadd.f32 %v1015_v59, %v522_v57 }
 0x23c   : > { %1679 = vst [vmem:[#allocation3 + $0xc0] sm:$0xff] %v1647_v60 }
 0x23d   : > { %1084 = vst [vmem:[#allocation2 + $0xa0] sm:$0xff] %v1052_v61 }
 0x23e   : > { %v1521_v62 = vpop.f32.mrf.mxu2  ;;  %v927_v2 = vpop.f32.mrf.mxu0 }
 0x23f   : > { %v1610_v0 = vpop.f32.mrf.mxu3  ;;  %v1016_v4 = vpop.f32.mrf.mxu1 }
 0x240   : > { %v1611_v1 = vadd.f32 %v1610_v0, %v1521_v62  ;;  %v1017_v5 = vadd.f32 %v1016_v4, %v927_v2 }
 0x242   : > { %v1648_v6 = vadd.f32 %v1611_v1, %v1116_v63  ;;  %v1053_v7 = vadd.f32 %v1017_v5, %v523_v3 }
 0x244   : > { %1680 = vst [vmem:[#allocation3 + $0xb8] sm:$0xff] %v1648_v6 }
 0x245   : > { %1085 = vst [vmem:[#allocation2 + $0xf8] sm:$0xff] %v1053_v7 }
 0x246   : > { %v1523_v8 = vpop.f32.mrf.mxu2  ;;  %v930_v12 = vpop.f32.mrf.mxu0 }
 0x247   : > { %v1612_v10 = vpop.f32.mrf.mxu3  ;;  %v1019_v14 = vpop.f32.mrf.mxu1 }
 0x248   : > { %v1613_v11 = vadd.f32 %v1612_v10, %v1523_v8  ;;  %v1020_v15 = vadd.f32 %v1019_v14, %v930_v12 }
 0x24a   : > { %v1649_v16 = vadd.f32 %v1613_v11, %v1117_v9  ;;  %v1054_v17 = vadd.f32 %v1020_v15, %v524_v13 }
 0x24c   : > { %1681 = vst [vmem:[#allocation3] sm:$0xff] %v1649_v16 }
 0x24d   : > { %1086 = vst [vmem:[#allocation2 + $0x20] sm:$0xff] %v1054_v17 }
 0x24e   : > { %v1526_v18 = vpop.f32.mrf.mxu2  ;;  %v932_v22 = vpop.f32.mrf.mxu0 }
 0x24f   : > { %v1615_v20 = vpop.f32.mrf.mxu3  ;;  %v1021_v24 = vpop.f32.mrf.mxu1 }
 0x250   : > { %v1616_v21 = vadd.f32 %v1615_v20, %v1526_v18  ;;  %v1022_v25 = vadd.f32 %v1021_v24, %v932_v22 }
 0x252   : > { %v1650_v26 = vadd.f32 %v1616_v21, %v1118_v19  ;;  %v1055_v27 = vadd.f32 %v1022_v25, %v525_v23 }
 0x254   : > { %1682 = vst [vmem:[#allocation3 + $0x28] sm:$0xff] %v1650_v26 }
 0x255   : > { %1087 = vst [vmem:[#allocation2 + $0x98] sm:$0xff] %v1055_v27 }
 0x256   : > { %v1528_v28 = vpop.f32.mrf.mxu2 }
 0x257   : > { %v1617_v30 = vpop.f32.mrf.mxu3 }
 0x258   : > { %v1618_v31 = vadd.f32 %v1617_v30, %v1528_v28  ;;  %1687 = sbr.rel (%p3201_p13) target bundleno = 897 (0x381), region = 64 }
 0x25a   : > { %v1651_v32 = vadd.f32 %v1618_v31, %v1119_v29 }
 0x25c   : > { %1683 = vst [vmem:[#allocation3 + $0x98] sm:$0xff] %v1651_v32 }
 0x25d   : > { %v2040_v33 = vld [vmem:[#allocation11 + $0x78] sm:$0xff]  ;;  %v2039_v34 = vld [vmem:[#allocation11 + $0x70] sm:$0xff]  ;;  %v2038_v35 = vld [vmem:[#allocation11 + $0x68] sm:$0xff]  ;;  %v4280_v40 = vstv %s3203_s5  ;;  %v4292_v55 = vstv %s1721_s30 }
 0x25e   : > { %3310 = vmatpush.msra.mxu2 %v2040_v33  ;;  %3326 = vmatpush.msra.mxu3 %v2040_v33  ;;  %v2037_v36 = vld [vmem:[#allocation11 + $0x60] sm:$0xff]  ;;  %v2036_v37 = vld [vmem:[#allocation11 + $0x58] sm:$0xff]  ;;  %v2035_v39 = vld [vmem:[#allocation11 + $0x50] sm:$0xff] }
 0x25f   : > { %2045 = vmatpush.msra.mxu0 %v2040_v33  ;;  %2255 = vmatpush.msra.mxu1 %v2040_v33  ;;  %v1819_v38 = vld [vmem:[#allocation3 + $0x80] sm:$0xff]  ;;  %v1820_v41 = vld [vmem:[#allocation3 + $0xc8] sm:$0xff]  ;;  %v2032_v48 = vld [vmem:[#allocation11 + $0x38] sm:$0xff] }
 0x260   : > { %3311 = vmatpush.msra.mxu2 %v2039_v34  ;;  %3327 = vmatpush.msra.mxu3 %v2039_v34  ;;  %v1885_v42 = vmul.f32 %v4280_v40, %v1819_v38  ;;  %v2034_v43 = vld [vmem:[#allocation11 + $0x48] sm:$0xff]  ;;  %vm1852_vm0 = vcmp.gt.f32.partialorder %v1819_v38, 0.0  ;;  %vm1853_vm1 = vcmp.gt.f32.partialorder %v1820_v41, 0.0  ;;  %v1886_v44 = vmul.f32 %v4280_v40, %v1820_v41  ;;  %v2033_v45 = vld [vmem:[#allocation11 + $0x40] sm:$0xff]  ;;  %v2031_v50 = vld [vmem:[#allocation11 + $0x30] sm:$0xff] }
 0x261   : > { %2046 = vmatpush.msra.mxu0 %v2039_v34  ;;  %2256 = vmatpush.msra.mxu1 %v2039_v34  ;;  %v2030_v51 = vld [vmem:[#allocation11 + $0x28] sm:$0xff]  ;;  %v2029_v52 = vld [vmem:[#allocation11 + $0x20] sm:$0xff]  ;;  %v2028_v53 = vld [vmem:[#allocation11 + $0x18] sm:$0xff] }
 0x262   : > { %3312 = vmatpush.msra.mxu2 %v2038_v35  ;;  %3328 = vmatpush.msra.mxu3 %v2038_v35  ;;  %v4284_v46 = vsel %vm1852_vm0, %v1819_v38, %v1885_v42  ;;  %v4286_v47 = vsel %vm1853_vm1, %v1820_v41, %v1886_v44  ;;  %v1705_v54 = vld [vmem:[#allocation2 + $0x38] sm:$0xff]  ;;  %v1835_v56 = vld [vmem:[#allocation3 + $0x10] sm:$0xff]  ;;  %v2026_v61 = vld [vmem:[#allocation11 + $0x8] sm:$0xff] }
 0x263   : > { %2047 = vmatpush.msra.mxu0 %v2038_v35  ;;  %2257 = vmatpush.msra.mxu1 %v2038_v35  ;;  %v4290_v49 = vadd.f32 %v4286_v47, %v4284_v46  ;;  %v2027_v57 = vld [vmem:[#allocation11 + $0x10] sm:$0xff]  ;;  %v1771_v59 = vmul.f32 %v4292_v55, %v1705_v54  ;;  %v1901_v60 = vmul.f32 %v4280_v40, %v1835_v56  ;;  %vm1738_vm2 = vcmp.gt.f32.partialorder %v1705_v54, 0.0  ;;  %v2025_v63 = vld [vmem:[#allocation11] sm:$0xff]  ;;  %v1706_v2 = vld [vmem:[#allocation2 + $0x58] sm:$0xff] }
 0x264   : > { %3313 = vmatpush.msra.mxu2 %v2037_v36  ;;  %3329 = vmatpush.msra.mxu3 %v2037_v36  ;;  %v1689_v58 = vld [vmem:[#allocation2 + $0xb0] sm:$0xff]  ;;  %vm1868_vm3 = vcmp.gt.f32.partialorder %v1835_v56, 0.0  ;;  %v1690_v5 = vld [vmem:[#allocation2] sm:$0xff]  ;;  %v1772_v6 = vmul.f32 %v4292_v55, %v1706_v2  ;;  %vm1739_vm5 = vcmp.gt.f32.partialorder %v1706_v2, 0.0  ;;  %v1691_v14 = vld [vmem:[#allocation2 + $0xd8] sm:$0xff] }
 0x265   : > { %2048 = vmatpush.msra.mxu0 %v2037_v36  ;;  %2258 = vmatpush.msra.mxu1 %v2037_v36  ;;  %v1755_v62 = vmul.f32 %v4292_v55, %v1689_v58  ;;  %vm1722_vm4 = vcmp.gt.f32.partialorder %v1689_v58, 0.0  ;;  %v4297_v0 = vsel %vm1738_vm2, %v1705_v54, %v1771_v59  ;;  %v4299_v1 = vsel %vm1868_vm3, %v1835_v56, %v1901_v60  ;;  %v1836_v3 = vld [vmem:[#allocation3 + $0x70] sm:$0xff]  ;;  %v1707_v11 = vld [vmem:[#allocation2 + $0x40] sm:$0xff]  ;;  %v1821_v15 = vld [vmem:[#allocation3 + $0xe8] sm:$0xff] }
 0x266   : > { %3314 = vmatpush.msra.mxu2 %v2036_v37  ;;  %3330 = vmatpush.msra.mxu3 %v2036_v37  ;;  %v1902_v7 = vmul.f32 %v4280_v40, %v1836_v3  ;;  %vm1869_vm6 = vcmp.gt.f32.partialorder %v1836_v3, 0.0  ;;  %v1756_v8 = vmul.f32 %v4292_v55, %v1690_v5  ;;  %vm1723_vm7 = vcmp.gt.f32.partialorder %v1690_v5, 0.0  ;;  %v1837_v12 = vld [vmem:[#allocation3 + $0x50] sm:$0xff]  ;;  %v1708_v22 = vld [vmem:[#allocation2 + $0xc8] sm:$0xff]  ;;  %v1838_v23 = vld [vmem:[#allocation3 + $0xa0] sm:$0xff] }
 0x267   : > { %2049 = vmatpush.msra.mxu0 %v2036_v37  ;;  %2259 = vmatpush.msra.mxu1 %v2036_v37  ;;  %v4301_v4 = vsel %vm1722_vm4, %v1689_v58, %v1755_v62  ;;  %v4310_v9 = vsel %vm1739_vm5, %v1706_v2, %v1772_v6  ;;  %v1773_v16 = vmul.f32 %v4292_v55, %v1707_v11  ;;  %vm1740_vm8 = vcmp.gt.f32.partialorder %v1707_v11, 0.0  ;;  %v1692_v26 = vld [vmem:[#allocation2 + $0x18] sm:$0xff]  ;;  %v1709_v34 = vld [vmem:[#allocation2 + $0xe0] sm:$0xff]  ;;  %v1693_v38 = vld [vmem:[#allocation2 + $0x50] sm:$0xff] }
 0x268   : > { %3315 = vmatpush.msra.mxu2 %v2035_v39  ;;  %3331 = vmatpush.msra.mxu3 %v2035_v39  ;;  %v4312_v10 = vsel %vm1869_vm6, %v1836_v3, %v1902_v7  ;;  %v4314_v13 = vsel %vm1723_vm7, %v1690_v5, %v1756_v8  ;;  %v1903_v17 = vmul.f32 %v4280_v40, %v1837_v12  ;;  %vm1870_vm9 = vcmp.gt.f32.partialorder %v1837_v12, 0.0  ;;  %v1822_v27 = vld [vmem:[#allocation3 + $0x78] sm:$0xff]  ;;  %v1711_v62 = vld [vmem:[#allocation2 + $0x70] sm:$0xff] }
 0x269   : > { %2050 = vmatpush.msra.mxu0 %v2035_v39  ;;  %2260 = vmatpush.msra.mxu1 %v2035_v39  ;;  %v1757_v18 = vmul.f32 %v4292_v55, %v1691_v14  ;;  %v1887_v19 = vmul.f32 %v4280_v40, %v1821_v15  ;;  %vm1724_vm10 = vcmp.gt.f32.partialorder %v1691_v14, 0.0  ;;  %vm1854_vm11 = vcmp.gt.f32.partialorder %v1821_v15, 0.0  ;;  %v1839_v35 = vld [vmem:[#allocation3 + $0xd8] sm:$0xff]  ;;  %v1823_v39 = vld [vmem:[#allocation3 + $0x8] sm:$0xff]  ;;  %v1695_v6 = vld [vmem:[#allocation2 + $0x30] sm:$0xff] }
 0x26a   : > { %3316 = vmatpush.msra.mxu2 %v2034_v43  ;;  %3332 = vmatpush.msra.mxu3 %v2034_v43  ;;  %v4324_v20 = vsel %vm1740_vm8, %v1707_v11, %v1773_v16  ;;  %v4326_v21 = vsel %vm1870_vm9, %v1837_v12, %v1903_v17  ;;  %v1774_v28 = vmul.f32 %v4292_v55, %v1708_v22  ;;  %vm1741_vm12 = vcmp.gt.f32.partialorder %v1708_v22, 0.0  ;;  %v1825_v7 = vld [vmem:[#allocation3 + $0x58] sm:$0xff]  ;;  %v1712_v16 = vld [vmem:[#allocation2 + $0xc0] sm:$0xff]  ;;  %v1842_v17 = vld [vmem:[#allocation3 + $0xf0] sm:$0xff] }
 0x26b   : > { %2051 = vmatpush.msra.mxu0 %v2034_v43  ;;  %2261 = vmatpush.msra.mxu1 %v2034_v43  ;;  %v4328_v24 = vsel %vm1724_vm10, %v1691_v14, %v1757_v18  ;;  %v4330_v25 = vsel %vm1854_vm11, %v1821_v15, %v1887_v19  ;;  %v1904_v29 = vmul.f32 %v4280_v40, %v1838_v23  ;;  %vm1871_vm13 = vcmp.gt.f32.partialorder %v1838_v23, 0.0 }
 0x26c   : > { %3317 = vmatpush.msra.mxu2 %v2033_v45  ;;  %3333 = vmatpush.msra.mxu3 %v2033_v45  ;;  %v1758_v30 = vmul.f32 %v4292_v55, %v1692_v26  ;;  %v1888_v31 = vmul.f32 %v4280_v40, %v1822_v27  ;;  %vm1725_vm14 = vcmp.gt.f32.partialorder %v1692_v26, 0.0  ;;  %vm1855_vm15 = vcmp.gt.f32.partialorder %v1822_v27, 0.0 }
 0x26d   : > { %2052 = vmatpush.msra.mxu0 %v2033_v45  ;;  %2262 = vmatpush.msra.mxu1 %v2033_v45  ;;  %v4340_v32 = vsel %vm1741_vm12, %v1708_v22, %v1774_v28  ;;  %v4342_v33 = vsel %vm1871_vm13, %v1838_v23, %v1904_v29  ;;  %v1775_v41 = vmul.f32 %v4292_v55, %v1709_v34  ;;  %vm1742_vm0 = vcmp.gt.f32.partialorder %v1709_v34, 0.0  ;;  %v1696_v23 = vld [vmem:[#allocation2 + $0x48] sm:$0xff] }
 0x26e   : > { %3318 = vmatpush.msra.mxu2 %v2032_v48  ;;  %3334 = vmatpush.msra.mxu3 %v2032_v48  ;;  %v1790_v36 = vsel %vm1725_vm14, %v1692_v26, %v1758_v30  ;;  %v4344_v37 = vsel %vm1855_vm15, %v1822_v27, %v1888_v31  ;;  %v1905_v42 = vmul.f32 %v4280_v40, %v1839_v35  ;;  %vm1872_vm1 = vcmp.gt.f32.partialorder %v1839_v35, 0.0 }
 0x26f   : > { %2053 = vmatpush.msra.mxu0 %v2032_v48  ;;  %2263 = vmatpush.msra.mxu1 %v2032_v48  ;;  %v1759_v43 = vmul.f32 %v4292_v55, %v1693_v38  ;;  %v1889_v44 = vmul.f32 %v4280_v40, %v1823_v39  ;;  %vm1726_vm2 = vcmp.gt.f32.partialorder %v1693_v38, 0.0  ;;  %vm1856_vm3 = vcmp.gt.f32.partialorder %v1823_v39, 0.0  ;;  %v1840_v48 = vld [vmem:[#allocation3 + $0x30] sm:$0xff] }
 0x270   : > { %3319 = vmatpush.msra.mxu2 %v2031_v50  ;;  %3335 = vmatpush.msra.mxu3 %v2031_v50  ;;  %v4353_v45 = vsel %vm1742_vm0, %v1709_v34, %v1775_v41  ;;  %v1906_v56 = vmul.f32 %v4280_v40, %v1840_v48  ;;  %vm1873_vm5 = vcmp.gt.f32.partialorder %v1840_v48, 0.0  ;;  %v1949_v59 = vadd.f32 %v4314_v13, %v4301_v4 }
 0x271   : > { %2054 = vmatpush.msra.mxu0 %v2031_v50  ;;  %2264 = vmatpush.msra.mxu1 %v2031_v50  ;;  %v1791_v50 = vsel %vm1726_vm2, %v1693_v38, %v1759_v43  ;;  %vm1744_vm8 = vcmp.gt.f32.partialorder %v1711_v62, 0.0  ;;  %v1761_v11 = vmul.f32 %v4292_v55, %v1695_v6  ;;  %v1891_v12 = vmul.f32 %v4280_v40, %v1825_v7  ;;  %v1843_v38 = vld [vmem:[#allocation3 + $0x88] sm:$0xff]  ;;  %v1697_v43 = vld [vmem:[#allocation2 + $0x80] sm:$0xff] }
 0x272   : > { %3320 = vmatpush.msra.mxu2 %v2030_v51  ;;  %3336 = vmatpush.msra.mxu3 %v2030_v51  ;;  %v1950_v5 = vadd.f32 %v1949_v59, %v4328_v24  ;;  %vm1728_vm10 = vcmp.gt.f32.partialorder %v1695_v6, 0.0  ;;  %vm1858_vm11 = vcmp.gt.f32.partialorder %v1825_v7, 0.0  ;;  %v1778_v26 = vmul.f32 %v4292_v55, %v1712_v16 }
 0x273   : > { %2055 = vmatpush.msra.mxu0 %v2030_v51  ;;  %2265 = vmatpush.msra.mxu1 %v2030_v51  ;;  %v4357_v51 = vsel %vm1856_vm3, %v1823_v39, %v1889_v44  ;;  %v1793_v18 = vsel %vm1728_vm10, %v1695_v6, %v1761_v11  ;;  %v4386_v19 = vsel %vm1858_vm11, %v1825_v7, %v1891_v12  ;;  %vm1745_vm12 = vcmp.gt.f32.partialorder %v1712_v16, 0.0  ;;  %v1827_v44 = vld [vmem:[#allocation3 + $0xd0] sm:$0xff]  ;;  %v1699_v6 = vld [vmem:[#allocation2 + $0xe8] sm:$0xff] }
 0x274   : > { %3321 = vmatpush.msra.mxu2 %v2029_v52  ;;  %3337 = vmatpush.msra.mxu3 %v2029_v52  ;;  %v1908_v27 = vmul.f32 %v4280_v40, %v1842_v17  ;;  %vm1875_vm13 = vcmp.gt.f32.partialorder %v1842_v17, 0.0  ;;  %v1762_v28 = vmul.f32 %v4292_v55, %v1696_v23  ;;  %vm1729_vm14 = vcmp.gt.f32.partialorder %v1696_v23, 0.0 }
 0x275   : > { %2056 = vmatpush.msra.mxu0 %v2029_v52  ;;  %2266 = vmatpush.msra.mxu1 %v2029_v52  ;;  %v1694_v52 = vld [vmem:[#allocation2 + $0x68] sm:$0xff]  ;;  %v4395_v31 = vsel %vm1745_vm12, %v1712_v16, %v1778_v26  ;;  %vm1730_vm2 = vcmp.gt.f32.partialorder %v1697_v43, 0.0  ;;  %vm1860_vm3 = vcmp.gt.f32.partialorder %v1827_v44, 0.0  ;;  %v1765_v12 = vmul.f32 %v4292_v55, %v1699_v6  ;;  %v1700_v16 = vld [vmem:[#allocation2 + $0xb8] sm:$0xff] }
 0x276   : > { %3322 = vmatpush.msra.mxu2 %v2028_v53  ;;  %3338 = vmatpush.msra.mxu3 %v2028_v53  ;;  %vm1727_vm6 = vcmp.gt.f32.partialorder %v1694_v52, 0.0  ;;  %v4397_v34 = vsel %vm1875_vm13, %v1842_v17, %v1908_v27  ;;  %v1794_v39 = vsel %vm1729_vm14, %v1696_v23, %v1762_v28  ;;  %v1845_v23 = vld [vmem:[#allocation3 + $0xf8] sm:$0xff]  ;;  %v1766_v27 = vmul.f32 %v4292_v55, %v1700_v16 }
 0x277   : > { %2057 = vmatpush.msra.mxu0 %v2028_v53  ;;  %2267 = vmatpush.msra.mxu1 %v2028_v53  ;;  %v1824_v53 = vld [vmem:[#allocation3 + $0x90] sm:$0xff]  ;;  %vm1878_vm11 = vcmp.gt.f32.partialorder %v1845_v23, 0.0 }
 0x278   : > { %3323 = vmatpush.msra.mxu2 %v2027_v57  ;;  %3339 = vmatpush.msra.mxu3 %v2027_v57  ;;  %v1890_v58 = vmul.f32 %v4280_v40, %v1824_v53  ;;  %vm1857_vm7 = vcmp.gt.f32.partialorder %v1824_v53, 0.0 }
 0x279   : > { %2058 = vmatpush.msra.mxu0 %v2027_v57  ;;  %2268 = vmatpush.msra.mxu1 %v2027_v57  ;;  %v1760_v57 = vmul.f32 %v4292_v55, %v1694_v52 }
 0x27a   : > { %3324 = vmatpush.msra.mxu2 %v2026_v61  ;;  %3340 = vmatpush.msra.mxu3 %v2026_v61  ;;  %v4372_v3 = vsel %vm1857_vm7, %v1824_v53, %v1890_v58  ;;  %v1698_v53 = vld [vmem:[#allocation2 + $0x88] sm:$0xff] }
 0x27b   : > { %2059 = vmatpush.msra.mxu0 %v2026_v61  ;;  %2269 = vmatpush.msra.mxu1 %v2026_v61  ;;  %v4370_v61 = vsel %vm1873_vm5, %v1840_v48, %v1906_v56  ;;  %v1792_v2 = vsel %vm1727_vm6, %v1694_v52, %v1760_v57  ;;  %v1909_v48 = vmul.f32 %v4280_v40, %v1843_v38  ;;  %v1844_v58 = vld [vmem:[#allocation3 + $0x48] sm:$0xff] }
 0x27c   : > { %3325 = vmatpush.msra.mxu2 %v2025_v63  ;;  %3341 = vmatpush.msra.mxu3 %v2025_v63  ;;  %vm1877_vm6 = vcmp.gt.f32.partialorder %v1844_v58, 0.0 }
 0x27d   : > { %2109 = vmatmul.f32.vlgmr.msra.gmra.mxu2 %v4297_v0  ;;  %2319 = vmatmul.f32.vlgmr.msra.gmra.mxu3 %v4299_v1 }
 0x27e   : > { %2060 = vmatpush.msra.mxu0 %v2025_v63  ;;  %2270 = vmatpush.msra.mxu1 %v2025_v63  ;;  %v1841_v63 = vld [vmem:[#allocation3 + $0x20] sm:$0xff] }
 0x27f   : > { %2061 = vmatmul.f32.vlgmr.msra.gmra.mxu0 %v4301_v4  ;;  %2271 = vmatmul.f32.vlgmr.msra.gmra.mxu1 %v4284_v46  ;;  %v4355_v46 = vsel %vm1872_vm1, %v1839_v35, %v1905_v42  ;;  %v1777_v4 = vmul.f32 %v4292_v55, %v1711_v62  ;;  %v1907_v8 = vmul.f32 %v4280_v40, %v1841_v63  ;;  %vm1874_vm9 = vcmp.gt.f32.partialorder %v1841_v63, 0.0 }
 0x280   : > { %v1988_v35 = vadd.f32 %v4290_v49, %v4330_v25  ;;  %vm1876_vm1 = vcmp.gt.f32.partialorder %v1843_v38, 0.0  ;;  %v1763_v49 = vmul.f32 %v4292_v55, %v1697_v43 }
 0x281   : > { %v4382_v14 = vsel %vm1744_vm8, %v1711_v62, %v1777_v4  ;;  %v4384_v15 = vsel %vm1874_vm9, %v1841_v63, %v1907_v8  ;;  %v4413_v56 = vsel %vm1876_vm1, %v1843_v38, %v1909_v48  ;;  %v1764_v63 = vmul.f32 %v4292_v55, %v1698_v53 }
 0x282   : > { %v1795_v59 = vsel %vm1730_vm2, %v1697_v43, %v1763_v49  ;;  %v1910_v4 = vmul.f32 %v4280_v40, %v1844_v58  ;;  %vm1732_vm8 = vcmp.gt.f32.partialorder %v1699_v6, 0.0  ;;  %vm1733_vm9 = vcmp.gt.f32.partialorder %v1700_v16, 0.0  ;;  %v1716_v49 = vld [vmem:[#allocation2 + $0x28] sm:$0xff] }
 0x283   : > { %v1797_v26 = vsel %vm1732_vm8, %v1699_v6, %v1765_v12  ;;  %v1847_v12 = vld [vmem:[#allocation3 + $0xb8] sm:$0xff] }
 0x285   : > { %2112 = vmatmul.f32.gmra.mxu2 %v4310_v9  ;;  %2322 = vmatmul.f32.gmra.mxu3 %v4312_v10 }
 0x287   : > { %2064 = vmatmul.f32.gmra.mxu0 %v4314_v13  ;;  %2274 = vmatmul.f32.gmra.mxu1 %v4286_v47  ;;  %v1710_v47 = vld [vmem:[#allocation2 + $0x90] sm:$0xff]  ;;  %v1951_v13 = vadd.f32 %v1950_v5, %v1790_v36 }
 0x288   : > { %v1776_v54 = vmul.f32 %v4292_v55, %v1710_v47  ;;  %vm1743_vm4 = vcmp.gt.f32.partialorder %v1710_v47, 0.0  ;;  %v1828_v5 = vld [vmem:[#allocation3 + $0xb0] sm:$0xff] }
 0x289   : > { %v1952_v22 = vadd.f32 %v1951_v13, %v1791_v50  ;;  %v1894_v11 = vmul.f32 %v4280_v40, %v1828_v5  ;;  %vm1861_vm7 = vcmp.gt.f32.partialorder %v1828_v5, 0.0 }
 0x28a   : > { %v4368_v60 = vsel %vm1743_vm4, %v1710_v47, %v1776_v54  ;;  %vm1731_vm4 = vcmp.gt.f32.partialorder %v1698_v53, 0.0 }
 0x28b   : > { %v1953_v30 = vadd.f32 %v1952_v22, %v1792_v2  ;;  %v1796_v8 = vsel %vm1731_vm4, %v1698_v53, %v1764_v63 }
 0x28d   : > { %2115 = vmatmul.f32.gmra.mxu2 %v4324_v20  ;;  %2325 = vmatmul.f32.gmra.mxu3 %v4326_v21  ;;  %v1954_v42 = vadd.f32 %v1953_v30, %v1793_v18  ;;  %v1701_v30 = vld [vmem:[#allocation2 + $0x60] sm:$0xff] }
 0x28e   : > { %vm1734_vm13 = vcmp.gt.f32.partialorder %v1701_v30, 0.0 }
 0x28f   : > { %2067 = vmatmul.f32.gmra.mxu0 %v4328_v24  ;;  %2277 = vmatmul.f32.gmra.mxu1 %v4330_v25  ;;  %v1826_v24 = vld [vmem:[#allocation3 + $0xa8] sm:$0xff]  ;;  %v1893_v25 = vmul.f32 %v4280_v40, %v1827_v44  ;;  %v1955_v52 = vadd.f32 %v1954_v42, %v1794_v39  ;;  %v1767_v42 = vmul.f32 %v4292_v55, %v1701_v30 }
 0x290   : > { %v1892_v29 = vmul.f32 %v4280_v40, %v1826_v24  ;;  %vm1859_vm15 = vcmp.gt.f32.partialorder %v1826_v24, 0.0 }
 0x291   : > { %v1925_v62 = vsel %vm1860_vm3, %v1827_v44, %v1893_v25  ;;  %v1702_v44 = vld [vmem:[#allocation2 + $0xf0] sm:$0xff] }
 0x292   : > { %v4401_v41 = vsel %vm1859_vm15, %v1826_v24, %v1892_v29  ;;  %v1926_v24 = vsel %vm1861_vm7, %v1828_v5, %v1894_v11  ;;  %v1829_v29 = vld [vmem:[#allocation3 + $0x38] sm:$0xff]  ;;  %v1768_v53 = vmul.f32 %v4292_v55, %v1702_v44  ;;  %vm1735_vm14 = vcmp.gt.f32.partialorder %v1702_v44, 0.0 }
 0x293   : > { %v1895_v38 = vmul.f32 %v4280_v40, %v1829_v29  ;;  %vm1862_vm12 = vcmp.gt.f32.partialorder %v1829_v29, 0.0  ;;  %vm1749_vm15 = vcmp.gt.f32.partialorder %v1716_v49, 0.0 }
 0x294   : > { %v4450_v5 = vsel %vm1735_vm14, %v1702_v44, %v1768_v53 }
 0x295   : > { %2118 = vmatmul.f32.gmra.mxu2 %v4340_v32  ;;  %2328 = vmatmul.f32.gmra.mxu3 %v4342_v33  ;;  %v1927_v25 = vsel %vm1862_vm12, %v1829_v29, %v1895_v38 }
 0x297   : > { %2070 = vmatmul.f32.gmra.mxu0 %v1790_v36  ;;  %2280 = vmatmul.f32.gmra.mxu1 %v4344_v37  ;;  %v1713_v36 = vld [vmem:[#allocation2 + $0xa8] sm:$0xff] }
 0x298   : > { %v1779_v47 = vmul.f32 %v4292_v55, %v1713_v36  ;;  %vm1746_vm0 = vcmp.gt.f32.partialorder %v1713_v36, 0.0 }
 0x29a   : > { %v4411_v54 = vsel %vm1746_vm0, %v1713_v36, %v1779_v47  ;;  %v1911_v36 = vmul.f32 %v4280_v40, %v1845_v23 }
 0x29c   : > { %v4439_v48 = vsel %vm1878_vm11, %v1845_v23, %v1911_v36 }
 0x29d   : > { %2121 = vmatmul.f32.gmra.mxu2 %v4353_v45  ;;  %2331 = vmatmul.f32.gmra.mxu3 %v4355_v46 }
 0x29f   : > { %2073 = vmatmul.f32.gmra.mxu0 %v1791_v50  ;;  %2283 = vmatmul.f32.gmra.mxu1 %v4357_v51  ;;  %v1989_v50 = vadd.f32 %v1988_v35, %v4344_v37  ;;  %v1714_v37 = vld [vmem:[#allocation2 + $0xd0] sm:$0xff] }
 0x2a0   : > { %v1780_v7 = vmul.f32 %v4292_v55, %v1714_v37  ;;  %vm1747_vm5 = vcmp.gt.f32.partialorder %v1714_v37, 0.0 }
 0x2a1   : > { %v1990_v57 = vadd.f32 %v1989_v50, %v4357_v51 }
 0x2a2   : > { %v4424_v17 = vsel %vm1747_vm5, %v1714_v37, %v1780_v7  ;;  %vm1880_vm5 = vcmp.gt.f32.partialorder %v1847_v12, 0.0 }
 0x2a3   : > { %v1991_v51 = vadd.f32 %v1990_v57, %v4372_v3  ;;  %v1830_v57 = vld [vmem:[#allocation3 + $0x40] sm:$0xff] }
 0x2a4   : > { %vm1863_vm1 = vcmp.gt.f32.partialorder %v1830_v57, 0.0 }
 0x2a5   : > { %2124 = vmatmul.f32.gmra.mxu2 %v4368_v60  ;;  %2334 = vmatmul.f32.gmra.mxu3 %v4370_v61  ;;  %v1992_v22 = vadd.f32 %v1991_v51, %v4386_v19 }
 0x2a7   : > { %2076 = vmatmul.f32.gmra.mxu0 %v1792_v2  ;;  %2286 = vmatmul.f32.gmra.mxu1 %v4372_v3  ;;  %v1956_v2 = vadd.f32 %v1955_v52, %v1795_v59  ;;  %v1715_v3 = vld [vmem:[#allocation2 + $0x10] sm:$0xff]  ;;  %v4441_v52 = vsel %vm1734_vm13, %v1701_v30, %v1767_v42  ;;  %v1832_v30 = vld [vmem:[#allocation3 + $0x60] sm:$0xff] }
 0x2a8   : > { %v1781_v35 = vmul.f32 %v4292_v55, %v1715_v3  ;;  %vm1748_vm10 = vcmp.gt.f32.partialorder %v1715_v3, 0.0  ;;  %v1898_v44 = vmul.f32 %v4280_v40, %v1832_v30  ;;  %vm1865_vm7 = vcmp.gt.f32.partialorder %v1832_v30, 0.0 }
 0x2a9   : > { %v1957_v13 = vadd.f32 %v1956_v2, %v1796_v8  ;;  %v1896_v2 = vmul.f32 %v4280_v40, %v1830_v57 }
 0x2aa   : > { %v4437_v47 = vsel %vm1748_vm10, %v1715_v3, %v1781_v35 }
 0x2ab   : > { %v1958_v28 = vadd.f32 %v1957_v13, %v1797_v26  ;;  %v1831_v13 = vld [vmem:[#allocation3 + $0xe0] sm:$0xff] }
 0x2ad   : > { %2127 = vmatmul.f32.gmra.mxu2 %v4382_v14  ;;  %2337 = vmatmul.f32.gmra.mxu3 %v4384_v15 }
 0x2af   : > { %2079 = vmatmul.f32.gmra.mxu0 %v1793_v18  ;;  %2289 = vmatmul.f32.gmra.mxu1 %v4386_v19  ;;  %v4426_v18 = vsel %vm1877_vm6, %v1844_v58, %v1910_v4  ;;  %v1993_v19 = vadd.f32 %v1992_v22, %v4401_v41  ;;  %v1703_v58 = vld [vmem:[#allocation2 + $0x8] sm:$0xff]  ;;  %vm1864_vm6 = vcmp.gt.f32.partialorder %v1831_v13, 0.0 }
 0x2b0   : > { %v1769_v6 = vmul.f32 %v4292_v55, %v1703_v58  ;;  %vm1736_vm2 = vcmp.gt.f32.partialorder %v1703_v58, 0.0 }
 0x2b1   : > { %v1994_v50 = vadd.f32 %v1993_v19, %v1925_v62 }
 0x2b2   : > { %v4458_v22 = vsel %vm1736_vm2, %v1703_v58, %v1769_v6 }
 0x2b3   : > { %v1995_v63 = vadd.f32 %v1994_v50, %v1926_v24 }
 0x2b5   : > { %2130 = vmatmul.f32.gmra.mxu2 %v4395_v31  ;;  %2340 = vmatmul.f32.gmra.mxu3 %v4397_v34  ;;  %v1996_v11 = vadd.f32 %v1995_v63, %v1927_v25 }
 0x2b7   : > { %2082 = vmatmul.f32.gmra.mxu0 %v1794_v39  ;;  %2292 = vmatmul.f32.gmra.mxu1 %v4401_v41  ;;  %v1798_v39 = vsel %vm1733_vm9, %v1700_v16, %v1766_v27  ;;  %v1846_v41 = vld [vmem:[#allocation3 + $0xc0] sm:$0xff]  ;;  %v1928_v16 = vsel %vm1863_vm1, %v1830_v57, %v1896_v2  ;;  %v1897_v27 = vmul.f32 %v4280_v40, %v1831_v13 }
 0x2b8   : > { %v1959_v43 = vadd.f32 %v1958_v28, %v1798_v39  ;;  %vm1879_vm0 = vcmp.gt.f32.partialorder %v1846_v41, 0.0  ;;  %v1997_v29 = vadd.f32 %v1996_v11, %v1928_v16  ;;  %v1849_v11 = vld [vmem:[#allocation3 + $0x28] sm:$0xff] }
 0x2b9   : > { %v1929_v42 = vsel %vm1864_vm6, %v1831_v13, %v1897_v27  ;;  %vm1882_vm13 = vcmp.gt.f32.partialorder %v1849_v11, 0.0 }
 0x2ba   : > { %v1960_v37 = vadd.f32 %v1959_v43, %v4441_v52  ;;  %v1718_v43 = vld [vmem:[#allocation2 + $0xf8] sm:$0xff]  ;;  %v1998_v50 = vadd.f32 %v1997_v29, %v1929_v42 }
 0x2bb   : > { %vm1751_vm8 = vcmp.gt.f32.partialorder %v1718_v43, 0.0  ;;  %v1784_v53 = vmul.f32 %v4292_v55, %v1718_v43 }
 0x2bc   : > { %v1961_v7 = vadd.f32 %v1960_v37, %v4450_v5  ;;  %v1930_v37 = vsel %vm1865_vm7, %v1832_v30, %v1898_v44 }
 0x2bd   : > { %2133 = vmatmul.f32.gmra.mxu2 %v4411_v54  ;;  %2343 = vmatmul.f32.gmra.mxu3 %v4413_v56  ;;  %v1816_v2 = vsel %vm1751_vm8, %v1718_v43, %v1784_v53 }
 0x2be   : > { %v1962_v23 = vadd.f32 %v1961_v7, %v4458_v22 }
 0x2bf   : > { %2085 = vmatmul.f32.gmra.mxu0 %v1795_v59  ;;  %2295 = vmatmul.f32.gmra.mxu1 %v1925_v62  ;;  %v1782_v59 = vmul.f32 %v4292_v55, %v1716_v49  ;;  %v1912_v62 = vmul.f32 %v4280_v40, %v1846_v41 }
 0x2c1   : > { %v4454_v4 = vsel %vm1749_vm15, %v1716_v49, %v1782_v59  ;;  %v4456_v51 = vsel %vm1879_vm0, %v1846_v41, %v1912_v62  ;;  %v1833_v49 = vld [vmem:[#allocation3 + $0x18] sm:$0xff]  ;;  %v1999_v59 = vadd.f32 %v1998_v50, %v1930_v37  ;;  %v1834_v62 = vld [vmem:[#allocation3 + $0x68] sm:$0xff] }
 0x2c2   : > { %v1899_v58 = vmul.f32 %v4280_v40, %v1833_v49  ;;  %vm1866_vm10 = vcmp.gt.f32.partialorder %v1833_v49, 0.0  ;;  %v1900_v7 = vmul.f32 %v4280_v40, %v1834_v62  ;;  %vm1867_vm11 = vcmp.gt.f32.partialorder %v1834_v62, 0.0 }
 0x2c4   : > { %v1931_v6 = vsel %vm1866_vm10, %v1833_v49, %v1899_v58 }
 0x2c5   : > { %2136 = vmatmul.f32.gmra.mxu2 %v4424_v17  ;;  %2346 = vmatmul.f32.gmra.mxu3 %v4426_v18 }
 0x2c7   : > { %2088 = vmatmul.f32.gmra.mxu0 %v1796_v8  ;;  %2298 = vmatmul.f32.gmra.mxu1 %v1926_v24  ;;  %v1717_v8 = vld [vmem:[#allocation2 + $0xa0] sm:$0xff]  ;;  %v1704_v24 = vld [vmem:[#allocation2 + $0x78] sm:$0xff] }
 0x2c8   : > { %v1783_v3 = vmul.f32 %v4292_v55, %v1717_v8  ;;  %vm1737_vm3 = vcmp.gt.f32.partialorder %v1704_v24, 0.0  ;;  %v1770_v28 = vmul.f32 %v4292_v55, %v1704_v24  ;;  %vm1750_vm4 = vcmp.gt.f32.partialorder %v1717_v8, 0.0 }
 0x2ca   : > { %v4467_v35 = vsel %vm1737_vm3, %v1704_v24, %v1770_v28  ;;  %v4470_v19 = vsel %vm1750_vm4, %v1717_v8, %v1783_v3  ;;  %v1719_v8 = vld [vmem:[#allocation2 + $0x20] sm:$0xff]  ;;  %v1850_v28 = vld [vmem:[#allocation3 + $0x98] sm:$0xff] }
 0x2cb   : > { %v1963_v36 = vadd.f32 %v1962_v23, %v4467_v35  ;;  %v1785_v13 = vmul.f32 %v4292_v55, %v1719_v8  ;;  %vm1752_vm12 = vcmp.gt.f32.partialorder %v1719_v8, 0.0  ;;  %vm1883_vm15 = vcmp.gt.f32.partialorder %v1850_v28, 0.0 }
 0x2cd   : > { %2139 = vmatmul.f32.gmra.mxu2 %v4437_v47  ;;  %2349 = vmatmul.f32.gmra.mxu3 %v4439_v48  ;;  %v1964_v41 = vadd.f32 %v1963_v36, %v4297_v0 }
 0x2cf   : > { %2091 = vmatmul.f32.gmra.mxu0 %v1797_v26  ;;  %2301 = vmatmul.f32.gmra.mxu1 %v1927_v25  ;;  %v1913_v26 = vmul.f32 %v4280_v40, %v1847_v12  ;;  %v1965_v25 = vadd.f32 %v1964_v41, %v4310_v9 }
 0x2d1   : > { %v4472_v38 = vsel %vm1880_vm5, %v1847_v12, %v1913_v26  ;;  %v1966_v0 = vadd.f32 %v1965_v25, %v4324_v20  ;;  %v2000_v12 = vadd.f32 %v1999_v59, %v1931_v6  ;;  %v1817_v26 = vsel %vm1752_vm12, %v1719_v8, %v1785_v13 }
 0x2d3   : > { %v1967_v63 = vadd.f32 %v1966_v0, %v4340_v32  ;;  %v1915_v32 = vmul.f32 %v4280_v40, %v1849_v11 }
 0x2d5   : > { %2142 = vmatmul.f32.gmra.mxu2 %v4454_v4  ;;  %2352 = vmatmul.f32.gmra.mxu3 %v4456_v51  ;;  %v4497_v27 = vsel %vm1882_vm13, %v1849_v11, %v1915_v32 }
 0x2d7   : > { %2094 = vmatmul.f32.gmra.mxu0 %v1798_v39  ;;  %2304 = vmatmul.f32.gmra.mxu1 %v1928_v16  ;;  %v1848_v39 = vld [vmem:[#allocation3] sm:$0xff]  ;;  %v1932_v16 = vsel %vm1867_vm11, %v1834_v62, %v1900_v7 }
 0x2d8   : > { %v1914_v57 = vmul.f32 %v4280_v40, %v1848_v39  ;;  %vm1881_vm9 = vcmp.gt.f32.partialorder %v1848_v39, 0.0  ;;  %v2001_v23 = vadd.f32 %v2000_v12, %v1932_v16 }
 0x2da   : > { %v4485_v9 = vsel %vm1881_vm9, %v1848_v39, %v1914_v57  ;;  %v2002_v24 = vadd.f32 %v2001_v23, %v4299_v1  ;;  %v1916_v1 = vmul.f32 %v4280_v40, %v1850_v28  ;;  %v4523_v39 = vstv %s3202_s11 }
 0x2dc   : > { %v2003_v30 = vadd.f32 %v2002_v24, %v4312_v10  ;;  %v1948_v43 = vsel %vm1883_vm15, %v1850_v28, %v1916_v1 }
 0x2dd   : > { %2145 = vmatmul.f32.gmra.mxu2 %v4470_v19  ;;  %2355 = vmatmul.f32.gmra.mxu3 %v4472_v38 }
 0x2df   : > { %2097 = vmatmul.f32.gmra.mxu0 %v4441_v52  ;;  %2307 = vmatmul.f32.gmra.mxu1 %v1929_v42  ;;  %v1968_v52 = vadd.f32 %v1967_v63, %v4353_v45 }
 0x2e1   : > { %v1969_v20 = vadd.f32 %v1968_v52, %v4368_v60  ;;  %v1720_v60 = vld [vmem:[#allocation2 + $0x98] sm:$0xff] }
 0x2e2   : > { %vm1753_vm14 = vcmp.gt.f32.partialorder %v1720_v60, 0.0 }
 0x2e3   : > { %v1970_v3 = vadd.f32 %v1969_v20, %v4382_v14  ;;  %v2004_v14 = vadd.f32 %v2003_v30, %v4326_v21 }
 0x2e5   : > { %2148 = vmatmul.f32.gmra.mxu2 %v1816_v2  ;;  %2358 = vmatmul.f32.gmra.mxu3 %v4485_v9  ;;  %v1971_v45 = vadd.f32 %v1970_v3, %v4395_v31  ;;  %v1786_v31 = vmul.f32 %v4292_v55, %v1720_v60  ;;  %v2005_v10 = vadd.f32 %v2004_v14, %v4342_v33 }
 0x2e7   : > { %2100 = vmatmul.f32.gmra.mxu0 %v4450_v5  ;;  %2310 = vmatmul.f32.gmra.mxu1 %v1930_v37  ;;  %v1972_v29 = vadd.f32 %v1971_v45, %v4411_v54  ;;  %v2006_v42 = vadd.f32 %v2005_v10, %v4355_v46 }
 0x2e9   : > { %v1973_v5 = vadd.f32 %v1972_v29, %v4424_v17  ;;  %v1818_v17 = vsel %vm1753_vm14, %v1720_v60, %v1786_v31  ;;  %v2007_v55 = vadd.f32 %v2006_v42, %v4370_v61 }
 0x2eb   : > { %v1974_v54 = vadd.f32 %v1973_v5, %v4437_v47 }
 0x2ed   : > { %2151 = vmatmul.f32.gmra.mxu2 %v1817_v26  ;;  %2361 = vmatmul.f32.gmra.mxu3 %v4497_v27  ;;  %v1975_v36 = vadd.f32 %v1974_v54, %v4454_v4  ;;  %v4520_v4 = vld [vmem:[%s4780_s4] ss:$0 sm:$0xff] }
 0x2ef   : > { %2103 = vmatmul.f32.gmra.mxu0 %v4458_v22  ;;  %2313 = vmatmul.f32.gmra.mxu1 %v1931_v6  ;;  %v1976_v21 = vadd.f32 %v1975_v36, %v4470_v19  ;;  %v2008_v22 = vadd.f32 %v2007_v55, %v4384_v15 }
 0x2f1   : > { %v1977_v40 = vadd.f32 %v1976_v21, %v1816_v2  ;;  %v2009_v33 = vadd.f32 %v2008_v22, %v4397_v34 }
 0x2f3   : > { %v1978_v44 = vadd.f32 %v1977_v40, %v1817_v26  ;;  %v2010_v46 = vadd.f32 %v2009_v33, %v4413_v56 }
 0x2f5   : > { %2154 = vmatmul.f32.gmra.mxu2 %v1818_v17  ;;  %2364 = vmatmul.f32.gmra.mxu3 %v1948_v43  ;;  %v1979_v47 = vadd.f32 %v1978_v44, %v1818_v17  ;;  %v2011_v19 = vadd.f32 %v2010_v46, %v4426_v18 }
 0x2f7   : > { %2106 = vmatmul.f32.gmra.mxu0 %v4467_v35  ;;  %2316 = vmatmul.f32.gmra.mxu1 %v1932_v16  ;;  %v1980_v61 = vrot.slane %v1979_v47, 4  ;;  %v2012_v35 = vadd.f32 %v2011_v19, %v4439_v48 }
 0x2f9   : > { %v1981_v49 = vadd.f32 %v1980_v61, %v1979_v47  ;;  %v2013_v25 = vadd.f32 %v2012_v35, %v4456_v51 }
 0x2fb   : > { %v1982_v56 = vrot.slane %v1981_v49, 2  ;;  %v2014_v59 = vadd.f32 %v2013_v25, %v4472_v38 }
 0x2fc   : > { %v2062_v50 = vpop.f32.mrf.mxu0  ;;  %v2272_v15 = vpop.f32.mrf.mxu1 }
 0x2fd   : > { %v2063_v34 = vadd.f32 %v4520_v4, %v2062_v50  ;;  %v2273_v41 = vadd.f32 %v4520_v4, %v2272_v15  ;;  %v1983_v58 = vadd.f32 %v1982_v56, %v1981_v49  ;;  %v2015_v51 = vadd.f32 %v2014_v59, %v4485_v9 }
 0x2ff   : > { %vm2158_vm0 = vcmp.gt.f32.partialorder %v2063_v34, 0.0  ;;  %v2191_v53 = vmul.f32 %v4523_v39, %v2063_v34  ;;  %vm2368_vm1 = vcmp.gt.f32.partialorder %v2273_v41, 0.0  ;;  %v2400_v18 = vmul.f32 %v2273_v41, %v4523_v39 }
 0x300   : > { %v2110_v57 = vpop.f32.mrf.mxu2  ;;  %v2320_v37 = vpop.f32.mrf.mxu3  ;;  %v1984_v2 = vrot.slane %v1983_v58, 1  ;;  %v2016_v52 = vadd.f32 %v2015_v51, %v4497_v27 }
 0x301   : > { %v2223_v48 = vsel %vm2158_vm0, %v2063_v34, %v2191_v53  ;;  %v2111_v0 = vadd.f32 %v4520_v4, %v2110_v57  ;;  %v2432_v62 = vsel %vm2368_vm1, %v2273_v41, %v2400_v18  ;;  %v2321_v63 = vadd.f32 %v4520_v4, %v2320_v37 }
 0x302   : > { %v2464_v6 = vadd.f32 %v2432_v62, %v2223_v48  ;;  %v1985_v12 = vadd.f32 %v1984_v2, %v1983_v58  ;;  %v2017_v16 = vadd.f32 %v2016_v52, %v1948_v43 }
 0x303   : > { %vm2174_vm2 = vcmp.gt.f32.partialorder %v2111_v0, 0.0  ;;  %v2207_v7 = vmul.f32 %v4523_v39, %v2111_v0  ;;  %vm2384_vm3 = vcmp.gt.f32.partialorder %v2321_v63, 0.0  ;;  %v2416_v8 = vmul.f32 %v2321_v63, %v4523_v39 }
 0x304   : > { %v2065_v11 = vpop.f32.mrf.mxu0  ;;  %v2275_v38 = vpop.f32.mrf.mxu1  ;;  %2496 = vst [vmem:[%s4050_s7] sm:$0xff] %v2464_v6  ;;  %v2018_v27 = vrot.slane %v2017_v16, 4 }
 0x305   : > { %v2066_v20 = vadd.f32 %v4520_v4, %v2065_v11  ;;  %v2276_v13 = vadd.f32 %v4520_v4, %v2275_v38  ;;  %v2239_v32 = vsel %vm2174_vm2, %v2111_v0, %v2207_v7  ;;  %v2448_v9 = vsel %vm2384_vm3, %v2321_v63, %v2416_v8  ;;  %1986 = vst [vmem:[%s4052_s24] sm:$0x1] %v1985_v12 }
 0x306   : > { %v2480_v3 = vadd.f32 %v2448_v9, %v2239_v32  ;;  %v2019_v5 = vadd.f32 %v2018_v27, %v2017_v16 }
 0x307   : > { %vm2159_vm4 = vcmp.gt.f32.partialorder %v2066_v20, 0.0  ;;  %v2192_v23 = vmul.f32 %v4523_v39, %v2066_v20  ;;  %vm2369_vm5 = vcmp.gt.f32.partialorder %v2276_v13, 0.0  ;;  %v2401_v45 = vmul.f32 %v2276_v13, %v4523_v39 }
 0x308   : > { %v2113_v24 = vpop.f32.mrf.mxu2  ;;  %v2323_v26 = vpop.f32.mrf.mxu3  ;;  %2512 = vst [vmem:[%s4050_s7 + $0x80] sm:$0xff] %v2480_v3  ;;  %v2020_v36 = vrot.slane %v2019_v5, 2 }
 0x309   : > { %v2224_v60 = vsel %vm2159_vm4, %v2066_v20, %v2192_v23  ;;  %v2114_v28 = vadd.f32 %v4520_v4, %v2113_v24  ;;  %v2324_v29 = vadd.f32 %v4520_v4, %v2323_v26  ;;  %v2433_v30 = vsel %vm2369_vm5, %v2276_v13, %v2401_v45 }
 0x30a   : > { %v2465_v14 = vadd.f32 %v2433_v30, %v2224_v60  ;;  %v2021_v55 = vadd.f32 %v2020_v36, %v2019_v5 }
 0x30b   : > { %vm2175_vm6 = vcmp.gt.f32.partialorder %v2114_v28, 0.0  ;;  %v2208_v31 = vmul.f32 %v4523_v39, %v2114_v28  ;;  %vm2385_vm7 = vcmp.gt.f32.partialorder %v2324_v29, 0.0  ;;  %v2417_v1 = vmul.f32 %v2324_v29, %v4523_v39 }
 0x30c   : > { %v2068_v54 = vpop.f32.mrf.mxu0  ;;  %v2278_v10 = vpop.f32.mrf.mxu1  ;;  %2497 = vst [vmem:[%s4050_s7 + $0x8] sm:$0xff] %v2465_v14  ;;  %v2022_v46 = vrot.slane %v2021_v55, 1 }
 0x30d   : > { %v2240_v42 = vsel %vm2175_vm6, %v2114_v28, %v2208_v31  ;;  %v2069_v17 = vadd.f32 %v4520_v4, %v2068_v54  ;;  %v2279_v43 = vadd.f32 %v4520_v4, %v2278_v10  ;;  %v2449_v21 = vsel %vm2385_vm7, %v2324_v29, %v2417_v1 }
 0x30e   : > { %v2481_v40 = vadd.f32 %v2449_v21, %v2240_v42  ;;  %v2023_v49 = vadd.f32 %v2022_v46, %v2021_v55 }
 0x30f   : > { %vm2160_vm8 = vcmp.gt.f32.partialorder %v2069_v17, 0.0  ;;  %v2193_v22 = vmul.f32 %v4523_v39, %v2069_v17  ;;  %vm2370_vm9 = vcmp.gt.f32.partialorder %v2279_v43, 0.0  ;;  %v2402_v44 = vmul.f32 %v2279_v43, %v4523_v39 }
 0x310   : > { %v2116_v33 = vpop.f32.mrf.mxu2  ;;  %v2326_v47 = vpop.f32.mrf.mxu3  ;;  %2513 = vst [vmem:[%s4050_s7 + $0x88] sm:$0xff] %v2481_v40 }
 0x311   : > { %v2225_v61 = vsel %vm2160_vm8, %v2069_v17, %v2193_v22  ;;  %v2117_v19 = vadd.f32 %v4520_v4, %v2116_v33  ;;  %v2327_v50 = vadd.f32 %v4520_v4, %v2326_v47  ;;  %v2434_v15 = vsel %vm2370_vm9, %v2279_v43, %v2402_v44  ;;  %2024 = vst [vmem:[%s4052_s24 + $0x1] sm:$0x1] %v2023_v49 }
 0x312   : > { %v2466_v35 = vadd.f32 %v2434_v15, %v2225_v61 }
 0x313   : > { %vm2176_vm10 = vcmp.gt.f32.partialorder %v2117_v19, 0.0  ;;  %v2209_v34 = vmul.f32 %v4523_v39, %v2117_v19  ;;  %vm2386_vm11 = vcmp.gt.f32.partialorder %v2327_v50, 0.0  ;;  %v2418_v41 = vmul.f32 %v2327_v50, %v4523_v39 }
 0x314   : > { %v2071_v56 = vpop.f32.mrf.mxu0  ;;  %v2281_v25 = vpop.f32.mrf.mxu1  ;;  %2498 = vst [vmem:[%s4050_s7 + $0x10] sm:$0xff] %v2466_v35 }
 0x315   : > { %v2241_v53 = vsel %vm2176_vm10, %v2117_v19, %v2209_v34  ;;  %v2072_v18 = vadd.f32 %v4520_v4, %v2071_v56  ;;  %v2282_v57 = vadd.f32 %v4520_v4, %v2281_v25  ;;  %v2450_v37 = vsel %vm2386_vm11, %v2327_v50, %v2418_v41 }
 0x316   : > { %v2482_v58 = vadd.f32 %v2450_v37, %v2241_v53 }
 0x317   : > { %vm2161_vm12 = vcmp.gt.f32.partialorder %v2072_v18, 0.0  ;;  %v2194_v59 = vmul.f32 %v4523_v39, %v2072_v18  ;;  %vm2371_vm13 = vcmp.gt.f32.partialorder %v2282_v57, 0.0  ;;  %v2403_v48 = vmul.f32 %v2282_v57, %v4523_v39 }
 0x318   : > { %v2119_v0 = vpop.f32.mrf.mxu2  ;;  %v2329_v62 = vpop.f32.mrf.mxu3  ;;  %2514 = vst [vmem:[%s4050_s7 + $0x90] sm:$0xff] %v2482_v58 }
 0x319   : > { %v2226_v63 = vsel %vm2161_vm12, %v2072_v18, %v2194_v59  ;;  %v2120_v2 = vadd.f32 %v4520_v4, %v2119_v0  ;;  %v2330_v51 = vadd.f32 %v4520_v4, %v2329_v62  ;;  %v2435_v6 = vsel %vm2371_vm13, %v2282_v57, %v2403_v48 }
 0x31a   : > { %v2467_v7 = vadd.f32 %v2435_v6, %v2226_v63 }
 0x31b   : > { %vm2177_vm14 = vcmp.gt.f32.partialorder %v2120_v2, 0.0  ;;  %v2210_v8 = vmul.f32 %v4523_v39, %v2120_v2  ;;  %vm2387_vm15 = vcmp.gt.f32.partialorder %v2330_v51, 0.0  ;;  %v2419_v11 = vmul.f32 %v2330_v51, %v4523_v39 }
 0x31c   : > { %v2074_v38 = vpop.f32.mrf.mxu0  ;;  %v2284_v12 = vpop.f32.mrf.mxu1  ;;  %2499 = vst [vmem:[%s4050_s7 + $0x18] sm:$0xff] %v2467_v7 }
 0x31d   : > { %v2242_v52 = vsel %vm2177_vm14, %v2120_v2, %v2210_v8  ;;  %v2075_v20 = vadd.f32 %v4520_v4, %v2074_v38  ;;  %v2285_v13 = vadd.f32 %v4520_v4, %v2284_v12  ;;  %v2451_v32 = vsel %vm2387_vm15, %v2330_v51, %v2419_v11 }
 0x31e   : > { %v2483_v9 = vadd.f32 %v2451_v32, %v2242_v52 }
 0x31f   : > { %vm2162_vm0 = vcmp.gt.f32.partialorder %v2075_v20, 0.0  ;;  %v2195_v16 = vmul.f32 %v4523_v39, %v2075_v20  ;;  %vm2372_vm1 = vcmp.gt.f32.partialorder %v2285_v13, 0.0  ;;  %v2404_v3 = vmul.f32 %v2285_v13, %v4523_v39 }
 0x320   : > { %v2122_v23 = vpop.f32.mrf.mxu2  ;;  %v2332_v45 = vpop.f32.mrf.mxu3  ;;  %2515 = vst [vmem:[%s4050_s7 + $0x98] sm:$0xff] %v2483_v9 }
 0x321   : > { %v2227_v24 = vsel %vm2162_vm0, %v2075_v20, %v2195_v16  ;;  %v2123_v26 = vadd.f32 %v4520_v4, %v2122_v23  ;;  %v2333_v27 = vadd.f32 %v4520_v4, %v2332_v45  ;;  %v2436_v60 = vsel %vm2372_vm1, %v2285_v13, %v2404_v3 }
 0x322   : > { %v2468_v28 = vadd.f32 %v2436_v60, %v2227_v24 }
 0x323   : > { %vm2178_vm2 = vcmp.gt.f32.partialorder %v2123_v26, 0.0  ;;  %v2211_v29 = vmul.f32 %v4523_v39, %v2123_v26  ;;  %vm2388_vm3 = vcmp.gt.f32.partialorder %v2333_v27, 0.0  ;;  %v2420_v30 = vmul.f32 %v2333_v27, %v4523_v39 }
 0x324   : > { %v2077_v5 = vpop.f32.mrf.mxu0  ;;  %v2287_v14 = vpop.f32.mrf.mxu1  ;;  %2500 = vst [vmem:[%s4050_s7 + $0x20] sm:$0xff] %v2468_v28 }
 0x325   : > { %v2243_v31 = vsel %vm2178_vm2, %v2123_v26, %v2211_v29  ;;  %v2078_v1 = vadd.f32 %v4520_v4, %v2077_v5  ;;  %v2288_v54 = vadd.f32 %v4520_v4, %v2287_v14  ;;  %v2452_v10 = vsel %vm2388_vm3, %v2333_v27, %v2420_v30 }
 0x326   : > { %v2484_v36 = vadd.f32 %v2452_v10, %v2243_v31 }
 0x327   : > { %vm2163_vm4 = vcmp.gt.f32.partialorder %v2078_v1, 0.0  ;;  %v2196_v42 = vmul.f32 %v4523_v39, %v2078_v1  ;;  %vm2373_vm5 = vcmp.gt.f32.partialorder %v2288_v54, 0.0  ;;  %v2405_v17 = vmul.f32 %v2288_v54, %v4523_v39 }
 0x328   : > { %v2125_v43 = vpop.f32.mrf.mxu2  ;;  %v2335_v21 = vpop.f32.mrf.mxu3  ;;  %2516 = vst [vmem:[%s4050_s7 + $0xa0] sm:$0xff] %v2484_v36 }
 0x329   : > { %v2228_v55 = vsel %vm2163_vm4, %v2078_v1, %v2196_v42  ;;  %v2126_v40 = vadd.f32 %v4520_v4, %v2125_v43  ;;  %v2336_v22 = vadd.f32 %v4520_v4, %v2335_v21  ;;  %v2437_v44 = vsel %vm2373_vm5, %v2288_v54, %v2405_v17 }
 0x32a   : > { %v2469_v33 = vadd.f32 %v2437_v44, %v2228_v55 }
 0x32b   : > { %vm2179_vm6 = vcmp.gt.f32.partialorder %v2126_v40, 0.0  ;;  %v2212_v47 = vmul.f32 %v4523_v39, %v2126_v40  ;;  %vm2389_vm7 = vcmp.gt.f32.partialorder %v2336_v22, 0.0  ;;  %v2421_v46 = vmul.f32 %v2336_v22, %v4523_v39 }
 0x32c   : > { %v2080_v61 = vpop.f32.mrf.mxu0  ;;  %v2290_v19 = vpop.f32.mrf.mxu1  ;;  %2501 = vst [vmem:[%s4050_s7 + $0x28] sm:$0xff] %v2469_v33 }
 0x32d   : > { %v2244_v50 = vsel %vm2179_vm6, %v2126_v40, %v2212_v47  ;;  %v2081_v15 = vadd.f32 %v4520_v4, %v2080_v61  ;;  %v2291_v49 = vadd.f32 %v4520_v4, %v2290_v19  ;;  %v2453_v35 = vsel %vm2389_vm7, %v2336_v22, %v2421_v46 }
 0x32e   : > { %v2485_v34 = vadd.f32 %v2453_v35, %v2244_v50 }
 0x32f   : > { %vm2164_vm8 = vcmp.gt.f32.partialorder %v2081_v15, 0.0  ;;  %v2197_v41 = vmul.f32 %v4523_v39, %v2081_v15  ;;  %vm2374_vm9 = vcmp.gt.f32.partialorder %v2291_v49, 0.0  ;;  %v2406_v56 = vmul.f32 %v2291_v49, %v4523_v39 }
 0x330   : > { %v2128_v25 = vpop.f32.mrf.mxu2  ;;  %v2338_v53 = vpop.f32.mrf.mxu3  ;;  %2517 = vst [vmem:[%s4050_s7 + $0xa8] sm:$0xff] %v2485_v34 }
 0x331   : > { %v2229_v18 = vsel %vm2164_vm8, %v2081_v15, %v2197_v41  ;;  %v2129_v57 = vadd.f32 %v4520_v4, %v2128_v25  ;;  %v2339_v37 = vadd.f32 %v4520_v4, %v2338_v53  ;;  %v2438_v58 = vsel %vm2374_vm9, %v2291_v49, %v2406_v56 }
 0x332   : > { %v2470_v59 = vadd.f32 %v2438_v58, %v2229_v18 }
 0x333   : > { %vm2180_vm10 = vcmp.gt.f32.partialorder %v2129_v57, 0.0  ;;  %v2213_v48 = vmul.f32 %v4523_v39, %v2129_v57  ;;  %vm2390_vm11 = vcmp.gt.f32.partialorder %v2339_v37, 0.0  ;;  %v2422_v0 = vmul.f32 %v2339_v37, %v4523_v39 }
 0x334   : > { %v2083_v62 = vpop.f32.mrf.mxu0  ;;  %v2293_v63 = vpop.f32.mrf.mxu1  ;;  %2502 = vst [vmem:[%s4050_s7 + $0x30] sm:$0xff] %v2470_v59 }
 0x335   : > { %v2245_v2 = vsel %vm2180_vm10, %v2129_v57, %v2213_v48  ;;  %v2084_v51 = vadd.f32 %v4520_v4, %v2083_v62  ;;  %v2294_v6 = vadd.f32 %v4520_v4, %v2293_v63  ;;  %v2454_v7 = vsel %vm2390_vm11, %v2339_v37, %v2422_v0 }
 0x336   : > { %v2486_v8 = vadd.f32 %v2454_v7, %v2245_v2 }
 0x337   : > { %vm2165_vm12 = vcmp.gt.f32.partialorder %v2084_v51, 0.0  ;;  %v2198_v11 = vmul.f32 %v4523_v39, %v2084_v51  ;;  %vm2375_vm13 = vcmp.gt.f32.partialorder %v2294_v6, 0.0  ;;  %v2407_v38 = vmul.f32 %v2294_v6, %v4523_v39 }
 0x338   : > { %v2131_v12 = vpop.f32.mrf.mxu2  ;;  %v2341_v52 = vpop.f32.mrf.mxu3  ;;  %2518 = vst [vmem:[%s4050_s7 + $0xb0] sm:$0xff] %v2486_v8 }
 0x339   : > { %v2230_v20 = vsel %vm2165_vm12, %v2084_v51, %v2198_v11  ;;  %v2132_v13 = vadd.f32 %v4520_v4, %v2131_v12  ;;  %v2342_v32 = vadd.f32 %v4520_v4, %v2341_v52  ;;  %v2439_v9 = vsel %vm2375_vm13, %v2294_v6, %v2407_v38 }
 0x33a   : > { %v2471_v16 = vadd.f32 %v2439_v9, %v2230_v20 }
 0x33b   : > { %vm2181_vm14 = vcmp.gt.f32.partialorder %v2132_v13, 0.0  ;;  %v2214_v3 = vmul.f32 %v4523_v39, %v2132_v13  ;;  %vm2391_vm15 = vcmp.gt.f32.partialorder %v2342_v32, 0.0  ;;  %v2423_v23 = vmul.f32 %v2342_v32, %v4523_v39 }
 0x33c   : > { %v2086_v45 = vpop.f32.mrf.mxu0  ;;  %v2296_v24 = vpop.f32.mrf.mxu1  ;;  %2503 = vst [vmem:[%s4050_s7 + $0x38] sm:$0xff] %v2471_v16 }
 0x33d   : > { %v2246_v26 = vsel %vm2181_vm14, %v2132_v13, %v2214_v3  ;;  %v2087_v27 = vadd.f32 %v4520_v4, %v2086_v45  ;;  %v2297_v60 = vadd.f32 %v4520_v4, %v2296_v24  ;;  %v2455_v28 = vsel %vm2391_vm15, %v2342_v32, %v2423_v23 }
 0x33e   : > { %v2487_v29 = vadd.f32 %v2455_v28, %v2246_v26 }
 0x33f   : > { %vm2166_vm0 = vcmp.gt.f32.partialorder %v2087_v27, 0.0  ;;  %v2199_v30 = vmul.f32 %v4523_v39, %v2087_v27  ;;  %vm2376_vm1 = vcmp.gt.f32.partialorder %v2297_v60, 0.0  ;;  %v2408_v5 = vmul.f32 %v2297_v60, %v4523_v39 }
 0x340   : > { %v2134_v14 = vpop.f32.mrf.mxu2  ;;  %v2344_v31 = vpop.f32.mrf.mxu3  ;;  %2519 = vst [vmem:[%s4050_s7 + $0xb8] sm:$0xff] %v2487_v29 }
 0x341   : > { %v2231_v1 = vsel %vm2166_vm0, %v2087_v27, %v2199_v30  ;;  %v2135_v54 = vadd.f32 %v4520_v4, %v2134_v14  ;;  %v2345_v10 = vadd.f32 %v4520_v4, %v2344_v31  ;;  %v2440_v36 = vsel %vm2376_vm1, %v2297_v60, %v2408_v5 }
 0x342   : > { %v2472_v42 = vadd.f32 %v2440_v36, %v2231_v1 }
 0x343   : > { %vm2182_vm2 = vcmp.gt.f32.partialorder %v2135_v54, 0.0  ;;  %v2215_v17 = vmul.f32 %v4523_v39, %v2135_v54  ;;  %vm2392_vm3 = vcmp.gt.f32.partialorder %v2345_v10, 0.0  ;;  %v2424_v43 = vmul.f32 %v2345_v10, %v4523_v39 }
 0x344   : > { %v2089_v21 = vpop.f32.mrf.mxu0  ;;  %v2299_v55 = vpop.f32.mrf.mxu1  ;;  %2504 = vst [vmem:[%s4050_s7 + $0x40] sm:$0xff] %v2472_v42 }
 0x345   : > { %v2247_v40 = vsel %vm2182_vm2, %v2135_v54, %v2215_v17  ;;  %v2090_v22 = vadd.f32 %v4520_v4, %v2089_v21  ;;  %v2300_v44 = vadd.f32 %v4520_v4, %v2299_v55  ;;  %v2456_v33 = vsel %vm2392_vm3, %v2345_v10, %v2424_v43 }
 0x346   : > { %v2488_v47 = vadd.f32 %v2456_v33, %v2247_v40 }
 0x347   : > { %vm2167_vm4 = vcmp.gt.f32.partialorder %v2090_v22, 0.0  ;;  %v2200_v46 = vmul.f32 %v4523_v39, %v2090_v22  ;;  %vm2377_vm5 = vcmp.gt.f32.partialorder %v2300_v44, 0.0  ;;  %v2409_v61 = vmul.f32 %v2300_v44, %v4523_v39 }
 0x348   : > { %v2137_v19 = vpop.f32.mrf.mxu2  ;;  %v2347_v50 = vpop.f32.mrf.mxu3  ;;  %2520 = vst [vmem:[%s4050_s7 + $0xc0] sm:$0xff] %v2488_v47 }
 0x349   : > { %v2232_v15 = vsel %vm2167_vm4, %v2090_v22, %v2200_v46  ;;  %v2138_v49 = vadd.f32 %v4520_v4, %v2137_v19  ;;  %v2348_v35 = vadd.f32 %v4520_v4, %v2347_v50  ;;  %v2441_v34 = vsel %vm2377_vm5, %v2300_v44, %v2409_v61 }
 0x34a   : > { %v2473_v41 = vadd.f32 %v2441_v34, %v2232_v15 }
 0x34b   : > { %vm2183_vm6 = vcmp.gt.f32.partialorder %v2138_v49, 0.0  ;;  %v2216_v56 = vmul.f32 %v4523_v39, %v2138_v49  ;;  %vm2393_vm7 = vcmp.gt.f32.partialorder %v2348_v35, 0.0  ;;  %v2425_v25 = vmul.f32 %v2348_v35, %v4523_v39 }
 0x34c   : > { %v2092_v53 = vpop.f32.mrf.mxu0  ;;  %v2302_v18 = vpop.f32.mrf.mxu1  ;;  %2505 = vst [vmem:[%s4050_s7 + $0x48] sm:$0xff] %v2473_v41 }
 0x34d   : > { %v2248_v57 = vsel %vm2183_vm6, %v2138_v49, %v2216_v56  ;;  %v2093_v37 = vadd.f32 %v4520_v4, %v2092_v53  ;;  %v2303_v58 = vadd.f32 %v4520_v4, %v2302_v18  ;;  %v2457_v59 = vsel %vm2393_vm7, %v2348_v35, %v2425_v25 }
 0x34e   : > { %v2489_v48 = vadd.f32 %v2457_v59, %v2248_v57 }
 0x34f   : > { %vm2168_vm8 = vcmp.gt.f32.partialorder %v2093_v37, 0.0  ;;  %v2201_v0 = vmul.f32 %v4523_v39, %v2093_v37  ;;  %vm2378_vm9 = vcmp.gt.f32.partialorder %v2303_v58, 0.0  ;;  %v2410_v62 = vmul.f32 %v2303_v58, %v4523_v39 }
 0x350   : > { %v2140_v63 = vpop.f32.mrf.mxu2  ;;  %v2350_v2 = vpop.f32.mrf.mxu3  ;;  %2521 = vst [vmem:[%s4050_s7 + $0xc8] sm:$0xff] %v2489_v48 }
 0x351   : > { %v2233_v51 = vsel %vm2168_vm8, %v2093_v37, %v2201_v0  ;;  %v2141_v6 = vadd.f32 %v4520_v4, %v2140_v63  ;;  %v2351_v7 = vadd.f32 %v4520_v4, %v2350_v2  ;;  %v2442_v8 = vsel %vm2378_vm9, %v2303_v58, %v2410_v62 }
 0x352   : > { %v2474_v11 = vadd.f32 %v2442_v8, %v2233_v51 }
 0x353   : > { %vm2184_vm10 = vcmp.gt.f32.partialorder %v2141_v6, 0.0  ;;  %v2217_v38 = vmul.f32 %v4523_v39, %v2141_v6  ;;  %vm2394_vm11 = vcmp.gt.f32.partialorder %v2351_v7, 0.0  ;;  %v2426_v12 = vmul.f32 %v2351_v7, %v4523_v39 }
 0x354   : > { %v2095_v52 = vpop.f32.mrf.mxu0  ;;  %v2305_v20 = vpop.f32.mrf.mxu1  ;;  %2506 = vst [vmem:[%s4050_s7 + $0x50] sm:$0xff] %v2474_v11 }
 0x355   : > { %v2249_v13 = vsel %vm2184_vm10, %v2141_v6, %v2217_v38  ;;  %v2096_v32 = vadd.f32 %v4520_v4, %v2095_v52  ;;  %v2306_v9 = vadd.f32 %v4520_v4, %v2305_v20  ;;  %v2458_v16 = vsel %vm2394_vm11, %v2351_v7, %v2426_v12 }
 0x356   : > { %v2490_v3 = vadd.f32 %v2458_v16, %v2249_v13 }
 0x357   : > { %vm2169_vm12 = vcmp.gt.f32.partialorder %v2096_v32, 0.0  ;;  %v2202_v23 = vmul.f32 %v4523_v39, %v2096_v32  ;;  %vm2379_vm13 = vcmp.gt.f32.partialorder %v2306_v9, 0.0  ;;  %v2411_v45 = vmul.f32 %v2306_v9, %v4523_v39 }
 0x358   : > { %v2143_v24 = vpop.f32.mrf.mxu2  ;;  %v2353_v26 = vpop.f32.mrf.mxu3  ;;  %2522 = vst [vmem:[%s4050_s7 + $0xd0] sm:$0xff] %v2490_v3 }
 0x359   : > { %v2234_v27 = vsel %vm2169_vm12, %v2096_v32, %v2202_v23  ;;  %v2144_v60 = vadd.f32 %v4520_v4, %v2143_v24  ;;  %v2354_v28 = vadd.f32 %v4520_v4, %v2353_v26  ;;  %v2443_v29 = vsel %vm2379_vm13, %v2306_v9, %v2411_v45 }
 0x35a   : > { %v2475_v30 = vadd.f32 %v2443_v29, %v2234_v27 }
 0x35b   : > { %vm2185_vm14 = vcmp.gt.f32.partialorder %v2144_v60, 0.0  ;;  %v2218_v5 = vmul.f32 %v4523_v39, %v2144_v60  ;;  %vm2395_vm15 = vcmp.gt.f32.partialorder %v2354_v28, 0.0  ;;  %v2427_v14 = vmul.f32 %v2354_v28, %v4523_v39 }
 0x35c   : > { %v2098_v31 = vpop.f32.mrf.mxu0  ;;  %v2308_v1 = vpop.f32.mrf.mxu1  ;;  %2507 = vst [vmem:[%s4050_s7 + $0x58] sm:$0xff] %v2475_v30 }
 0x35d   : > { %v2250_v54 = vsel %vm2185_vm14, %v2144_v60, %v2218_v5  ;;  %v2099_v10 = vadd.f32 %v4520_v4, %v2098_v31  ;;  %v2309_v36 = vadd.f32 %v4520_v4, %v2308_v1  ;;  %v2459_v42 = vsel %vm2395_vm15, %v2354_v28, %v2427_v14 }
 0x35e   : > { %v2491_v17 = vadd.f32 %v2459_v42, %v2250_v54 }
 0x35f   : > { %vm2170_vm0 = vcmp.gt.f32.partialorder %v2099_v10, 0.0  ;;  %v2203_v43 = vmul.f32 %v4523_v39, %v2099_v10  ;;  %vm2380_vm1 = vcmp.gt.f32.partialorder %v2309_v36, 0.0  ;;  %v2412_v21 = vmul.f32 %v2309_v36, %v4523_v39 }
 0x360   : > { %v2146_v55 = vpop.f32.mrf.mxu2  ;;  %v2356_v40 = vpop.f32.mrf.mxu3  ;;  %2523 = vst [vmem:[%s4050_s7 + $0xd8] sm:$0xff] %v2491_v17 }
 0x361   : > { %v2235_v22 = vsel %vm2170_vm0, %v2099_v10, %v2203_v43  ;;  %v2147_v44 = vadd.f32 %v4520_v4, %v2146_v55  ;;  %v2357_v33 = vadd.f32 %v4520_v4, %v2356_v40  ;;  %v2444_v47 = vsel %vm2380_vm1, %v2309_v36, %v2412_v21 }
 0x362   : > { %v2476_v46 = vadd.f32 %v2444_v47, %v2235_v22 }
 0x363   : > { %vm2186_vm2 = vcmp.gt.f32.partialorder %v2147_v44, 0.0  ;;  %v2219_v61 = vmul.f32 %v4523_v39, %v2147_v44  ;;  %vm2396_vm3 = vcmp.gt.f32.partialorder %v2357_v33, 0.0  ;;  %v2428_v19 = vmul.f32 %v2357_v33, %v4523_v39 }
 0x364   : > { %v2101_v50 = vpop.f32.mrf.mxu0  ;;  %v2311_v15 = vpop.f32.mrf.mxu1  ;;  %2508 = vst [vmem:[%s4050_s7 + $0x60] sm:$0xff] %v2476_v46 }
 0x365   : > { %v2251_v49 = vsel %vm2186_vm2, %v2147_v44, %v2219_v61  ;;  %v2102_v35 = vadd.f32 %v4520_v4, %v2101_v50  ;;  %v2312_v34 = vadd.f32 %v4520_v4, %v2311_v15  ;;  %v2460_v41 = vsel %vm2396_vm3, %v2357_v33, %v2428_v19 }
 0x366   : > { %v2492_v56 = vadd.f32 %v2460_v41, %v2251_v49 }
 0x367   : > { %vm2171_vm4 = vcmp.gt.f32.partialorder %v2102_v35, 0.0  ;;  %v2204_v25 = vmul.f32 %v4523_v39, %v2102_v35  ;;  %vm2381_vm5 = vcmp.gt.f32.partialorder %v2312_v34, 0.0  ;;  %v2413_v53 = vmul.f32 %v2312_v34, %v4523_v39 }
 0x368   : > { %v2149_v18 = vpop.f32.mrf.mxu2  ;;  %v2359_v57 = vpop.f32.mrf.mxu3  ;;  %2524 = vst [vmem:[%s4050_s7 + $0xe0] sm:$0xff] %v2492_v56 }
 0x369   : > { %v2236_v37 = vsel %vm2171_vm4, %v2102_v35, %v2204_v25  ;;  %v2150_v58 = vadd.f32 %v4520_v4, %v2149_v18  ;;  %v2360_v59 = vadd.f32 %v4520_v4, %v2359_v57  ;;  %v2445_v48 = vsel %vm2381_vm5, %v2312_v34, %v2413_v53 }
 0x36a   : > { %v2477_v0 = vadd.f32 %v2445_v48, %v2236_v37 }
 0x36b   : > { %vm2187_vm6 = vcmp.gt.f32.partialorder %v2150_v58, 0.0  ;;  %v2220_v62 = vmul.f32 %v4523_v39, %v2150_v58  ;;  %vm2397_vm7 = vcmp.gt.f32.partialorder %v2360_v59, 0.0  ;;  %v2429_v63 = vmul.f32 %v2360_v59, %v4523_v39 }
 0x36c   : > { %v2104_v2 = vpop.f32.mrf.mxu0  ;;  %v2314_v51 = vpop.f32.mrf.mxu1  ;;  %2509 = vst [vmem:[%s4050_s7 + $0x68] sm:$0xff] %v2477_v0 }
 0x36d   : > { %v2252_v6 = vsel %vm2187_vm6, %v2150_v58, %v2220_v62  ;;  %v2105_v7 = vadd.f32 %v4520_v4, %v2104_v2  ;;  %v2315_v8 = vadd.f32 %v4520_v4, %v2314_v51  ;;  %v2461_v11 = vsel %vm2397_vm7, %v2360_v59, %v2429_v63 }
 0x36e   : > { %v2493_v38 = vadd.f32 %v2461_v11, %v2252_v6 }
 0x36f   : > { %vm2172_vm8 = vcmp.gt.f32.partialorder %v2105_v7, 0.0  ;;  %v2205_v12 = vmul.f32 %v4523_v39, %v2105_v7  ;;  %vm2382_vm9 = vcmp.gt.f32.partialorder %v2315_v8, 0.0  ;;  %v2414_v52 = vmul.f32 %v2315_v8, %v4523_v39 }
 0x370   : > { %v2152_v20 = vpop.f32.mrf.mxu2  ;;  %v2362_v13 = vpop.f32.mrf.mxu3  ;;  %2525 = vst [vmem:[%s4050_s7 + $0xe8] sm:$0xff] %v2493_v38 }
 0x371   : > { %v2237_v32 = vsel %vm2172_vm8, %v2105_v7, %v2205_v12  ;;  %v2153_v9 = vadd.f32 %v4520_v4, %v2152_v20  ;;  %v2363_v16 = vadd.f32 %v4520_v4, %v2362_v13  ;;  %v2446_v3 = vsel %vm2382_vm9, %v2315_v8, %v2414_v52 }
 0x372   : > { %v2478_v23 = vadd.f32 %v2446_v3, %v2237_v32 }
 0x373   : > { %vm2188_vm10 = vcmp.gt.f32.partialorder %v2153_v9, 0.0  ;;  %v2221_v45 = vmul.f32 %v4523_v39, %v2153_v9  ;;  %vm2398_vm11 = vcmp.gt.f32.partialorder %v2363_v16, 0.0  ;;  %v2430_v24 = vmul.f32 %v2363_v16, %v4523_v39 }
 0x374   : > { %v2107_v26 = vpop.f32.mrf.mxu0  ;;  %v2317_v27 = vpop.f32.mrf.mxu1  ;;  %2510 = vst [vmem:[%s4050_s7 + $0x70] sm:$0xff] %v2478_v23 }
 0x375   : > { %v2253_v60 = vsel %vm2188_vm10, %v2153_v9, %v2221_v45  ;;  %v2108_v28 = vadd.f32 %v4520_v4, %v2107_v26  ;;  %v2318_v29 = vadd.f32 %v4520_v4, %v2317_v27  ;;  %v2462_v30 = vsel %vm2398_vm11, %v2363_v16, %v2430_v24 }
 0x376   : > { %v2494_v5 = vadd.f32 %v2462_v30, %v2253_v60 }
 0x377   : > { %vm2173_vm12 = vcmp.gt.f32.partialorder %v2108_v28, 0.0  ;;  %v2206_v14 = vmul.f32 %v4523_v39, %v2108_v28  ;;  %vm2383_vm13 = vcmp.gt.f32.partialorder %v2318_v29, 0.0  ;;  %v2415_v31 = vmul.f32 %v2318_v29, %v4523_v39 }
 0x378   : > { %v2155_v1 = vpop.f32.mrf.mxu2  ;;  %v2365_v54 = vpop.f32.mrf.mxu3  ;;  %2526 = vst [vmem:[%s4050_s7 + $0xf0] sm:$0xff] %v2494_v5 }
 0x379   : > { %v2238_v10 = vsel %vm2173_vm12, %v2108_v28, %v2206_v14  ;;  %v2156_v36 = vadd.f32 %v4520_v4, %v2155_v1  ;;  %v2366_v42 = vadd.f32 %v4520_v4, %v2365_v54  ;;  %v2447_v17 = vsel %vm2383_vm13, %v2318_v29, %v2415_v31 }
 0x37a   : > { %v2479_v43 = vadd.f32 %v2447_v17, %v2238_v10 }
 0x37b   : > { %vm2189_vm14 = vcmp.gt.f32.partialorder %v2156_v36, 0.0  ;;  %v2222_v21 = vmul.f32 %v4523_v39, %v2156_v36  ;;  %vm2399_vm15 = vcmp.gt.f32.partialorder %v2366_v42, 0.0  ;;  %v2431_v55 = vmul.f32 %v2366_v42, %v4523_v39 }
 0x37c   : > { %2511 = vst [vmem:[%s4050_s7 + $0x78] sm:$0xff] %v2479_v43 }
 0x37d   : > { %v2254_v40 = vsel %vm2189_vm14, %v2156_v36, %v2222_v21  ;;  %v2463_v22 = vsel %vm2399_vm15, %v2366_v42, %v2431_v55 }
 0x37e   : > { %v2495_v44 = vadd.f32 %v2463_v22, %v2254_v40 }
 0x380   : > { %2527 = vst [vmem:[%s4050_s7 + $0xf8] sm:$0xff] %v2495_v44 }
 0x381 PF: > { %s4829_s0 = sld [smem:[#allocation30_spill]]  ;;  %s2546_s12 = sshll.u32 %s4050_s7, 4  ;;  %s2547_s12 = int_to_ptr.vmem [resolvable:$true] %s2546_s12 }
 0x382   : > { %s4831_s3 = sld [smem:[#allocation42_spill]]  ;;  %s2529_s19 = scalar_lea.sflag [#allocation6], %s4046_s18 }
 0x387   : > { %s3309_s27 = sshll.u32 %s4829_s0, 8 }
 0x388   : > { %s2545_s23 = scalar_lea.hbm %s4831_s3, %s3309_s27  ;;  %s3589_s5 = scalar_lea.hbm %s4831_s3, 512 }
 0x389   : > { %s2548_s20 = sshll.u32 %s2545_s23, 4  ;;  %s2549_s20 = int_to_ptr.hbm [resolvable:$true] %s2548_s20 }
 0x38a   : > { %s3583_s17 = sshra.s32 %s2549_s20, 4  ;;  %s3584_s17 = int_to_ptr.hbm [resolvable:$true] %s3583_s17 }
 0x38b   : > { %s3585_s6 = scalar_lea.hbm %s3584_s17, 256  ;;  %p3590_p1 = scmp.lt.s32.totalorder %s3584_s17, %s4831_s3 }
 0x38c   : > { %p3586_p9 = scmp.ne.s32.totalorder %s3584_s17, %s3585_s6  ;;  %p3591_p4 = scmp.lt.s32.totalorder %s3589_s5, %s3585_s6 }
 0x38e   : > { %p3587_p11 = pnand %p3586_p9, %p3952_p7  ;;  %p3592_p2 = por %p3591_p4, %p3590_p1 }
 0x390   : > { %p3588_p0 = pneg %p3587_p11 }
 0x392   : > { %p3593_p3 = pnand %p3592_p2, %p3588_p0 }
 0x394   : > { %3596 = shalt.err (!%p3593_p3)
}
 0x395   : > { %s3779_s7 = smov 128   ;;  %s3780_s15 = smov 8  }
 0x396   : > { %3368 = dma.vmem_to_hbm [thread:$0]  (%p3952_p7), %s2547_s12, 4096, %s2549_s20, %s2529_s19, %s3779_s7, %s3779_s7, %s3780_s15  }
 0x397   : > { %s3208_s14 = sshll.u32 %s4829_s0, 1  ;;  %s2563_s27 = sshll.u32 %s4052_s24, 4  ;;  %s2564_s27 = int_to_ptr.vmem [resolvable:$true] %s2563_s27 }
 0x398   : > { %s4832_s23 = sld [smem:[#allocation43_spill]]  ;;  %s2534_s6 = scalar_lea.sflag [#allocation14], %s4046_s18 }
 0x39e   : > { %s4833_s1 = smov %s4832_s23  ;;  %s2561_s21 = scalar_lea.hbm %s4832_s23, %s3208_s14 }
 0x39f   : > { %s2565_s17 = sshll.u32 %s2561_s21, 4  ;;  %s3617_s0 = scalar_lea.hbm %s4833_s1, 4  ;;  %s2566_s17 = int_to_ptr.hbm [resolvable:$true] %s2565_s17 }
 0x3a0   : > { %s3611_s29 = sshra.s32 %s2566_s17, 4  ;;  %s3612_s29 = int_to_ptr.hbm [resolvable:$true] %s3611_s29 }
 0x3a1   : > { %s3613_s5 = scalar_lea.hbm %s3612_s29, 2  ;;  %p3618_p8 = scmp.lt.s32.totalorder %s3612_s29, %s4833_s1 }
 0x3a2   : > { %p3614_p5 = scmp.ne.s32.totalorder %s3612_s29, %s3613_s5  ;;  %p3619_p13 = scmp.lt.s32.totalorder %s3617_s0, %s3613_s5 }
 0x3a4   : > { %p3615_p6 = pnand %p3614_p5, %p3952_p7  ;;  %p3620_p9 = por %p3619_p13, %p3618_p8 }
 0x3a6   : > { %p3616_p12 = pneg %p3615_p6 }
 0x3a8   : > { %p3621_p11 = pnand %p3620_p9, %p3616_p12 }
 0x3aa   : > { %3624 = shalt.err (!%p3621_p11)
}
 0x3ab   : > { %3369 = dma.vmem_to_hbm [thread:$0]  (%p3952_p7), %s2564_s27, 32, %s2566_s17, %s2534_s6  }
 0x3ac PF: > { %s4834_s18 = sld [smem:[#allocation27_spill]]  ;;  %p3390_p0 = scmp.ge.s32.totalorder %s3759_s10, 2 }
 0x3ae   : > { %p3380_p1 = pnand %p3390_p0, %p3957_p10 }
 0x3b0   : > { %p3381_p4 = pneg %p3380_p1 }
 0x3b2   : > { %s2577_s19 = sand.u32 1, %s4834_s18  }
 0x3b3   : > { %s2578_s7 = scalar_lea.sflag [#allocation6], %s2577_s19 }
 0x3b4   : > { %3698 = dma.done.wait (%p3381_p4), %s2578_s7, 4096  }
 0x3b5   : > { %3700 = vsyncadd (%p3381_p4), %s2578_s7, 4294963200  ;;  %s2588_s15 = scalar_lea.sflag [#allocation14], %s2577_s19 }
 0x3b6   : > { %3702 = dma.done.wait (%p3381_p4), %s2588_s15, 32  }
 0x3b7   : > { %3704 = vsyncadd (%p3381_p4), %s2588_s15, 4294967264  ;;  %s30_s10 = sadd.s32 1, %s3759_s10   ;;  %s4837_s14 = sld [smem:[#allocation28_spill]] }
 0x3b8   : > { %p4729_p2 = scmp.ge.s32.totalorder %s30_s10, 6   ;;  %s4838_s23 = sld [smem:[#allocation36_spill]] }
 0x3b9   : > { %s4839_s27 = sld [smem:[#allocation34_spill]]  ;;  %s4846_s21 = smov %s3711_s22 }
 0x3ba   : > { %s4840_s16 = sld [smem:[#allocation29_spill]]  ;;  %s4848_s24 = smov %s3723_s25 }
 0x3bb   : > { %s4841_s29 = sld [smem:[#allocation35_spill]]  ;;  %s4849_s25 = smov %s3727_s26 }
 0x3bc   : > { %s4842_s7 = sld [smem:[#allocation31_spill]]  ;;  %s4853_s30 = smov %s3751_s8 }
 0x3bd   : > { %s4843_s13 = sld [smem:[#allocation32_spill]]  ;;  %s4847_s22 = smov %s4837_s14 }
 0x3be   : > { %s4844_s17 = sld [smem:[#allocation33_spill]] }
 0x3bf   : > { %s4850_s26 = smov %s4839_s27  ;;  %s4851_s27 = smov %s3735_s28 }
 0x3c0   : > { %s4852_s28 = smov %s4840_s16  ;;  %29 = sbr.rel (!%p4729_p2) target bundleno = 21 (0x15), region = 144 }
 0x3c3   : > { %s4854_s8 = smov %s4843_s13 }
 0x3c4   : > { %s4855_s9 = smov %s4844_s17 }
 0x3c5   :  { %2594 = vsyncpa [#allocation5], 1 }
 0x3c6   :  { %2596 = vsyncpa [#allocation5 + $0x1], 1 }
 0x3c7   :  { %2597 = vsyncpa [#allocation10], 1 }
 0x3c8   :  { %2599 = vsyncpa [#allocation10 + $0x1], 1 }
 0x3c9   :  { %2600 = vsyncpa [#allocation6], 1 }
 0x3ca   :  { %2602 = vsyncpa [#allocation6 + $0x1], 1 }
 0x3cb   :  { %2603 = vsyncpa [#allocation14], 1 }
 0x3cc   :  { %2605 = vsyncpa [#allocation14 + $0x1], 1 }
 0x3cd   :  { %2606 = vsyncpa [#allocation7], 1 }
 0x3ce   :  { %2608 = vsyncpa [#allocation7 + $0x1], 1 }

</bundles_post_ra>
